<compile_context>
chip_gen: v7x
topology: tpu7x:2x2x1
jax: 0.10.0
libtpu: 0.0.40
codegen_flags: <defaults>
</compile_context>

<pallas_src>
import functools

import jax
import jax.numpy as jnp
from jax import lax
from jax.experimental import pallas as pl
from jax.experimental.pallas import tpu as pltpu


def _round_up(x, m):
    return (x + m - 1) // m * m


def _chunk_plan(T, Cmax):
    """Static list of (start_t, num_steps) chunks covering [0, T)."""
    out = []
    t0 = 0
    while t0 < T:
        c = min(Cmax, T - t0)
        out.append((t0, c))
        t0 += c
    return tuple(out)


def _make_lstm_kernel(num_layers, Bp, Hp, chunks, unroll):
    """Kernel closure for a fixed layer count / padded shapes / chunk plan."""
    have_seq = num_layers > 1

    def kernel(*refs):
        # refs = x_ref, (w_ih, w_hh, bias) * L, fc_w, fc_b, out_ref,
        #        gx_ref[, seq_ref]
        x_ref = refs[0]
        layer_refs = refs[1:1 + 3 * num_layers]
        fc_w_ref = refs[1 + 3 * num_layers]      # (Hp, O)       bf16
        fc_b_ref = refs[2 + 3 * num_layers]      # (1, O)        f32
        out_ref = refs[3 + 3 * num_layers]       # (Bp, O)       f32
        gx_ref = refs[4 + 3 * num_layers]        # (Cmax*Bp, 4*Hp) bf16 scratch
        seq_ref = refs[5 + 3 * num_layers] if have_seq else None  # (T*Bp, Hp) bf16

        h_last = jnp.zeros((Bp, Hp), jnp.float32)

        for l in range(num_layers):
            w_ih_ref = layer_refs[3 * l]       # (D_in_l, 4*Hp) bf16
            w_hh_ref = layer_refs[3 * l + 1]   # (Hp, 4*Hp)     bf16
            b_ref = layer_refs[3 * l + 2]      # (1, 4*Hp)      f32
            last_layer = (l == num_layers - 1)

            h = jnp.zeros((Bp, Hp), jnp.float32)
            c = jnp.zeros((Bp, Hp), jnp.float32)

            for (t0, csz) in chunks:
                # Chunked input projection (off the serial critical path):
                # one MXU matmul over csz timesteps; result stored bf16.
                if l == 0:
                    x_in = x_ref[pl.ds(t0 * Bp, csz * Bp), :]        # bf16
                else:
                    # Reads layer l-1's outputs; this chunk region is only
                    # overwritten (with layer l's outputs) AFTER this read.
                    x_in = seq_ref[pl.ds(t0 * Bp, csz * Bp), :]      # bf16
                gx_ref[pl.ds(0, csz * Bp), :] = jnp.dot(
                    x_in, w_ih_ref[...],
                    preferred_element_type=jnp.float32).astype(jnp.bfloat16)

                def step(t, carry, *, w_hh_ref=w_hh_ref, b_ref=b_ref,
                         t0=t0, last_layer=last_layer):
                    h, c = carry                           # f32 (Bp, Hp)
                    off = pl.multiple_of(t * Bp, Bp)
                    # Only the recurrent matmul (+ bias/gx adds) stays serial.
                    gates = (jnp.dot(h.astype(jnp.bfloat16), w_hh_ref[...],
                                     preferred_element_type=jnp.float32)
                             + gx_ref[pl.ds(off, Bp), :]
                             + b_ref[...])                 # (Bp, 4*Hp) f32
                    # Lane-aligned gate slices (Hp is a multiple of 128).
                    i_g = jax.nn.sigmoid(gates[:, 0 * Hp:1 * Hp])
                    f_g = jax.nn.sigmoid(gates[:, 1 * Hp:2 * Hp])
                    g_g = jnp.tanh(gates[:, 2 * Hp:3 * Hp])
                    o_g = jax.nn.sigmoid(gates[:, 3 * Hp:4 * Hp])
                    c_new = f_g * c + i_g * g_g
                    h_new = o_g * jnp.tanh(c_new)
                    if not last_layer:
                        # Reuse the bf16 cast already needed for the matmul path.
                        seq_off = pl.multiple_of((t0 + t) * Bp, Bp)
                        seq_ref[pl.ds(seq_off, Bp), :] = h_new.astype(jnp.bfloat16)
                    return (h_new, c_new)

                h, c = lax.fori_loop(0, csz, step, (h, c), unroll=unroll)

            h_last = h

        # fc on the last time step's hidden state of the top layer.
        out_ref[...] = (jnp.dot(h_last.astype(jnp.bfloat16), fc_w_ref[...],
                                preferred_element_type=jnp.float32)
                        + fc_b_ref[...])

    return kernel


def init_lstm_params(key, input_dim, hidden_dim, num_layers, output_dim):
    """Deterministic uniform(-1/sqrt(H), 1/sqrt(H)) init, PyTorch-style shapes."""
    H = hidden_dim
    bound = 1.0 / jnp.sqrt(jnp.float32(H))
    params = {"layers": [], "fc_w": None, "fc_b": None}
    for l in range(num_layers):
        d_in = input_dim if l == 0 else hidden_dim
        key, k1, k2, k3, k4 = jax.random.split(key, 5)
        w_ih = jax.random.uniform(k1, (4 * H, d_in), jnp.float32, -bound, bound)
        w_hh = jax.random.uniform(k2, (4 * H, H), jnp.float32, -bound, bound)
        b_ih = jax.random.uniform(k3, (4 * H,), jnp.float32, -bound, bound)
        b_hh = jax.random.uniform(k4, (4 * H,), jnp.float32, -bound, bound)
        params["layers"].append((w_ih, w_hh, b_ih, b_hh))
    key, k1, k2 = jax.random.split(key, 3)
    params["fc_w"] = jax.random.uniform(k1, (output_dim, H), jnp.float32,
                                        -bound, bound)
    params["fc_b"] = jax.random.uniform(k2, (output_dim,), jnp.float32,
                                        -bound, bound)
    return params


def _pad_gate_cols(w, H, Hp):
    """(in, 4H) -> (in, 4Hp); each PyTorch gate block (i,f,g,o) zero-padded to Hp."""
    if Hp == H:
        return w
    parts = []
    for k in range(4):
        blk = w[:, k * H:(k + 1) * H]
        parts.append(jnp.pad(blk, ((0, 0), (0, Hp - H))))
    return jnp.concatenate(parts, axis=1)


def prepare_params(params, input_dim, hidden_dim, num_layers, output_dim):
    """One-time conversion to kernel layout: transpose, pad H->Hp, cast to bf16."""
    H = hidden_dim
    Hp = _round_up(H, 128)
    layers = []
    for l, (w_ih, w_hh, b_ih, b_hh) in enumerate(params["layers"]):
        w_ih_t = jnp.transpose(w_ih)                     # (d_in, 4H)
        if l > 0 and Hp != H:                            # inter-layer input is Hp wide
            w_ih_t = jnp.pad(w_ih_t, ((0, Hp - H), (0, 0)))
        w_ih_t = _pad_gate_cols(w_ih_t, H, Hp).astype(jnp.bfloat16)

        w_hh_t = jnp.transpose(w_hh)                     # (H, 4H)
        if Hp != H:
            w_hh_t = jnp.pad(w_hh_t, ((0, Hp - H), (0, 0)))
        w_hh_t = _pad_gate_cols(w_hh_t, H, Hp).astype(jnp.bfloat16)

        bias = _pad_gate_cols((b_ih + b_hh).reshape(1, 4 * H), H, Hp)
        layers.append((w_ih_t, w_hh_t, bias.astype(jnp.float32)))

    fc_w_t = jnp.transpose(params["fc_w"])               # (H, O)
    if Hp != H:
        fc_w_t = jnp.pad(fc_w_t, ((0, Hp - H), (0, 0)))
    return {"layers": layers,
            "fc_w": fc_w_t.astype(jnp.bfloat16),
            "fc_b": params["fc_b"].reshape(1, output_dim).astype(jnp.float32)}


@functools.partial(jax.jit, static_argnames=("hidden_dim", "num_layers",
                                             "output_dim"))
def lstm_forward(x, prep, *, hidden_dim, num_layers, output_dim):
    """x: (B, T, input_dim) float32 -> (B, output_dim) float32."""
    B, T, D = x.shape
    Hp = _round_up(hidden_dim, 128)
    # Bp multiple of 16 so every dynamic row offset into bf16 scratch is aligned
    # to the bf16 (16, 128) packed tile.
    Bp = _round_up(max(B, 16), 16)

    xp = x.astype(jnp.float32)
    if Bp != B:
        xp = jnp.pad(xp, ((0, Bp - B), (0, 0), (0, 0)))
    # Time-major, flattened to (T*Bp, D); bf16 feeds the chunked MXU projection.
    x_tb = jnp.transpose(xp, (1, 0, 2)).reshape(T * Bp, D).astype(jnp.bfloat16)

    inputs = [x_tb]
    for (w_ih_t, w_hh_t, bias) in prep["layers"]:
        inputs += [w_ih_t, w_hh_t, bias]
    inputs += [prep["fc_w"], prep["fc_b"]]

    # Chunk the whole-sequence input projection so the gates scratch is O(Cmax),
    # not O(T) (cap the bf16 gx buffer at ~8 MiB).
    gx_row_bytes = Bp * 4 * Hp * 2
    Cmax = max(1, min(T, (8 << 20) // gx_row_bytes))
    chunks = _chunk_plan(T, Cmax)

    # Unroll by vreg pressure: the per-step live set is dominated by the
    # (Bp, 4*Hp) f32 gates (1 vreg = 1024 f32).
    gate_vregs = (Bp * 4 * Hp) // 1024
    if gate_vregs >= 32:
        unroll = 1
    elif gate_vregs >= 16:
        unroll = 2
    else:
        unroll = max(1, min(8, T))

    # Scratch buffers (bf16).
    scratch_shapes = [pltpu.VMEM((Cmax * Bp, 4 * Hp), jnp.bfloat16)]
    if num_layers > 1:
        scratch_shapes.append(pltpu.VMEM((T * Bp, Hp), jnp.bfloat16))

    # VMEM budget: size from actual residency, capped at real chip capacity.
    needed = sum(a.size * a.dtype.itemsize for a in inputs)
    needed += Cmax * Bp * 4 * Hp * 2                     # gx scratch (bf16)
    if num_layers > 1:
        needed += T * Bp * Hp * 2                        # seq scratch (bf16)
    needed += Bp * output_dim * 4                        # output
    try:
        vmem_cap = int(pltpu.get_tpu_info().vmem_capacity_bytes)
    except Exception:
        vmem_cap = 64 << 20                              # conservative (v7x)
    vmem_limit = int(min(max(int(1.35 * needed) + (4 << 20), 16 << 20),
                         vmem_cap - (6 << 20)))

    kernel = _make_lstm_kernel(num_layers, Bp, Hp, chunks, unroll)

    out = pl.pallas_call(
        kernel,
        out_shape=jax.ShapeDtypeStruct((Bp, output_dim), jnp.float32),
        in_specs=[pl.BlockSpec(memory_space=pltpu.MemorySpace.VMEM)] * len(inputs),
        out_specs=pl.BlockSpec(memory_space=pltpu.MemorySpace.VMEM),
        scratch_shapes=scratch_shapes,
        compiler_params=pltpu.CompilerParams(vmem_limit_bytes=vmem_limit),
    )(*inputs)
    return out[:B]


def lstm_reference(x, params, *, hidden_dim, num_layers, output_dim):
    """Pure-JAX f32 reference (PyTorch nn.LSTM semantics)."""
    B, T, D = x.shape
    H = hidden_dim
    seq = x.astype(jnp.float32)
    for (w_ih, w_hh, b_ih, b_hh) in params["layers"]:
        h = jnp.zeros((B, H), jnp.float32)
        c = jnp.zeros((B, H), jnp.float32)
        outs = []
        for t in range(T):
            gates = seq[:, t, :] @ w_ih.T + h @ w_hh.T + b_ih + b_hh
            i_g = jax.nn.sigmoid(gates[:, 0 * H:1 * H])
            f_g = jax.nn.sigmoid(gates[:, 1 * H:2 * H])
            g_g = jnp.tanh(gates[:, 2 * H:3 * H])
            o_g = jax.nn.sigmoid(gates[:, 3 * H:4 * H])
            c = f_g * c + i_g * g_g
            h = o_g * jnp.tanh(c)
            outs.append(h)
        seq = jnp.stack(outs, axis=1)
    return seq[:, -1, :] @ params["fc_w"].T + params["fc_b"]


if __name__ == "__main__":
    B, T = 2, 8
    input_dim, hidden_dim, num_layers, output_dim = 16, 32, 2, 4

    key = jax.random.PRNGKey(0)
    key, kx = jax.random.split(key)
    x = jax.random.normal(kx, (B, T, input_dim), jnp.float32)
    params = init_lstm_params(key, input_dim, hidden_dim, num_layers, output_dim)
    prep = prepare_params(params, input_dim, hidden_dim, num_layers, output_dim)

    out = lstm_forward(x, prep, hidden_dim=hidden_dim,
                       num_layers=num_layers, output_dim=output_dim)
    out = jax.block_until_ready(out)

    ref = lstm_reference(x, params, hidden_dim=hidden_dim,
                         num_layers=num_layers, output_dim=output_dim)
    assert out.shape == (B, output_dim)
    # Kernel matmuls + gx/seq scratch use bf16 (f32 accumulation / f32 h,c
    # state); tolerance reflects bf16 rounding accumulated over the
    # T-step / 2-layer recurrence.
    assert jnp.allclose(out, ref, atol=5e-2, rtol=5e-2), (out, ref)

    print("KERNEL_OK")
</pallas_src>

<mosaic_0001>
module attributes {stable_mosaic.version = 11 : i64} {
  func.func @kernel(%arg0: memref<128x16xbf16, #tpu.memory_space<vmem>>, %arg1: memref<16x512xbf16, #tpu.memory_space<vmem>>, %arg2: memref<128x512xbf16, #tpu.memory_space<vmem>>, %arg3: memref<1x512xf32, #tpu.memory_space<vmem>>, %arg4: memref<128x512xbf16, #tpu.memory_space<vmem>>, %arg5: memref<128x512xbf16, #tpu.memory_space<vmem>>, %arg6: memref<1x512xf32, #tpu.memory_space<vmem>>, %arg7: memref<128x4xbf16, #tpu.memory_space<vmem>>, %arg8: memref<1x4xf32, #tpu.memory_space<vmem>>, %arg9: memref<16x4xf32, #tpu.memory_space<vmem>>, %arg10: memref<128x512xbf16, #tpu.memory_space<vmem>>, %arg11: memref<128x128xbf16, #tpu.memory_space<vmem>>) attributes {dimension_semantics = [], scalar_prefetch = 0 : i64, scratch_operands = 2 : i64, tpu.core_type = #tpu.core_type<tc>} {
    %cst = arith.constant 0.000000e+00 : f32
    %0 = vector.broadcast %cst : f32 to vector<16x128xf32>
    %cst_0 = arith.constant 0.000000e+00 : f32
    %1 = vector.broadcast %cst_0 : f32 to vector<16x128xf32>
    %c0 = arith.constant 0 : index
    %c0_1 = arith.constant 0 : index
    %2 = vector.load %arg0[%c0, %c0_1] : memref<128x16xbf16, #tpu.memory_space<vmem>>, vector<128x16xbf16>
    %c0_2 = arith.constant 0 : index
    %c0_3 = arith.constant 0 : index
    %3 = vector.load %arg1[%c0_2, %c0_3] : memref<16x512xbf16, #tpu.memory_space<vmem>>, vector<16x512xbf16>
    %cst_4 = arith.constant dense<0.000000e+00> : vector<128x512xf32>
    %4 = tpu.matmul %2, %3, %cst_4 {dimension_numbers = #tpu.dot_dimension_numbers<[1], [0], [0], [1], [0, 0, 1, 1], [], []>} : vector<128x16xbf16>, vector<16x512xbf16>, vector<128x512xf32> -> vector<128x512xf32>
    %5 = arith.truncf %4 : vector<128x512xf32> to vector<128x512xbf16>
    %c0_5 = arith.constant 0 : index
    %c0_6 = arith.constant 0 : index
    %6 = vector.load %arg10[%c0_5, %c0_6] : memref<128x512xbf16, #tpu.memory_space<vmem>>, vector<128x512xbf16>
    tpu.vector_store %arg10[%c0_5, %c0_6], %5 {strides = array<i32>} : memref<128x512xbf16, #tpu.memory_space<vmem>>, vector<128x512xbf16>,
    %c0_i32 = arith.constant 0 : i32
    %c16_i32 = arith.constant 16 : i32
    %7 = arith.muli %c0_i32, %c16_i32 : i32
    %8 = tpu.assume_multiple %7, 16 : i32
    %9 = arith.truncf %0 : vector<16x128xf32> to vector<16x128xbf16>
    %c0_7 = arith.constant 0 : index
    %c0_8 = arith.constant 0 : index
    %10 = vector.load %arg2[%c0_7, %c0_8] : memref<128x512xbf16, #tpu.memory_space<vmem>>, vector<128x512xbf16>
    %cst_9 = arith.constant dense<0.000000e+00> : vector<16x512xf32>
    %11 = tpu.matmul %9, %10, %cst_9 {dimension_numbers = #tpu.dot_dimension_numbers<[1], [0], [0], [1], [0, 0, 1, 1], [], []>} : vector<16x128xbf16>, vector<128x512xbf16>, vector<16x512xf32> -> vector<16x512xf32>
    %12 = arith.index_cast %8 : i32 to index
    %c0_10 = arith.constant 0 : index
    %13 = vector.load %arg10[%12, %c0_10] : memref<128x512xbf16, #tpu.memory_space<vmem>>, vector<16x512xbf16>
    %14 = arith.extf %13 : vector<16x512xbf16> to vector<16x512xf32>
    %15 = arith.addf %11, %14 : vector<16x512xf32>
    %c0_11 = arith.constant 0 : index
    %c0_12 = arith.constant 0 : index
    %16 = vector.load %arg3[%c0_11, %c0_12] : memref<1x512xf32, #tpu.memory_space<vmem>>, vector<1x512xf32>
    %17 = vector.broadcast %16 : vector<1x512xf32> to vector<16x512xf32>
    %18 = arith.addf %15, %17 : vector<16x512xf32>
    %19 = vector.extract_strided_slice %18 {offsets = [0, 0], sizes = [16, 128], strides = [1, 1]} : vector<16x512xf32> to vector<16x128xf32>
    %20 = arith.negf %19 : vector<16x128xf32>
    %21 = math.exp %20 : vector<16x128xf32>
    %cst_13 = arith.constant 1.000000e+00 : f32
    %22 = vector.broadcast %cst_13 : f32 to vector<16x128xf32>
    %23 = arith.addf %22, %21 : vector<16x128xf32>
    %24 = arith.divf %22, %23 : vector<16x128xf32>
    %25 = vector.extract_strided_slice %18 {offsets = [0, 128], sizes = [16, 128], strides = [1, 1]} : vector<16x512xf32> to vector<16x128xf32>
    %26 = arith.negf %25 : vector<16x128xf32>
    %27 = math.exp %26 : vector<16x128xf32>
    %cst_14 = arith.constant 1.000000e+00 : f32
    %28 = vector.broadcast %cst_14 : f32 to vector<16x128xf32>
    %29 = arith.addf %28, %27 : vector<16x128xf32>
    %30 = arith.divf %28, %29 : vector<16x128xf32>
    %31 = vector.extract_strided_slice %18 {offsets = [0, 256], sizes = [16, 128], strides = [1, 1]} : vector<16x512xf32> to vector<16x128xf32>
    %32 = math.tanh %31 : vector<16x128xf32>
    %33 = vector.extract_strided_slice %18 {offsets = [0, 384], sizes = [16, 128], strides = [1, 1]} : vector<16x512xf32> to vector<16x128xf32>
    %34 = arith.negf %33 : vector<16x128xf32>
    %35 = math.exp %34 : vector<16x128xf32>
    %cst_15 = arith.constant 1.000000e+00 : f32
    %36 = vector.broadcast %cst_15 : f32 to vector<16x128xf32>
    %37 = arith.addf %36, %35 : vector<16x128xf32>
    %38 = arith.divf %36, %37 : vector<16x128xf32>
    %39 = arith.mulf %30, %1 : vector<16x128xf32>
    %40 = arith.mulf %24, %32 : vector<16x128xf32>
    %41 = arith.addf %39, %40 : vector<16x128xf32>
    %42 = math.tanh %41 : vector<16x128xf32>
    %43 = arith.mulf %38, %42 : vector<16x128xf32>
    %c0_i32_16 = arith.constant 0 : i32
    %44 = arith.addi %c0_i32_16, %c0_i32 : i32
    %c16_i32_17 = arith.constant 16 : i32
    %45 = arith.muli %44, %c16_i32_17 : i32
    %46 = tpu.assume_multiple %45, 16 : i32
    %47 = arith.truncf %43 : vector<16x128xf32> to vector<16x128xbf16>
    %48 = arith.index_cast %46 : i32 to index
    %c0_18 = arith.constant 0 : index
    %49 = vector.load %arg11[%48, %c0_18] : memref<128x128xbf16, #tpu.memory_space<vmem>>, vector<16x128xbf16>
    tpu.vector_store %arg11[%48, %c0_18], %47 {strides = array<i32>} : memref<128x128xbf16, #tpu.memory_space<vmem>>, vector<16x128xbf16>,
    %c1_i32 = arith.constant 1 : i32
    %c16_i32_19 = arith.constant 16 : i32
    %50 = arith.muli %c1_i32, %c16_i32_19 : i32
    %51 = tpu.assume_multiple %50, 16 : i32
    %52 = arith.truncf %43 : vector<16x128xf32> to vector<16x128xbf16>
    %c0_20 = arith.constant 0 : index
    %c0_21 = arith.constant 0 : index
    %53 = vector.load %arg2[%c0_20, %c0_21] : memref<128x512xbf16, #tpu.memory_space<vmem>>, vector<128x512xbf16>
    %cst_22 = arith.constant dense<0.000000e+00> : vector<16x512xf32>
    %54 = tpu.matmul %52, %53, %cst_22 {dimension_numbers = #tpu.dot_dimension_numbers<[1], [0], [0], [1], [0, 0, 1, 1], [], []>} : vector<16x128xbf16>, vector<128x512xbf16>, vector<16x512xf32> -> vector<16x512xf32>
    %55 = arith.index_cast %51 : i32 to index
    %c0_23 = arith.constant 0 : index
    %56 = vector.load %arg10[%55, %c0_23] : memref<128x512xbf16, #tpu.memory_space<vmem>>, vector<16x512xbf16>
    %57 = arith.extf %56 : vector<16x512xbf16> to vector<16x512xf32>
    %58 = arith.addf %54, %57 : vector<16x512xf32>
    %c0_24 = arith.constant 0 : index
    %c0_25 = arith.constant 0 : index
    %59 = vector.load %arg3[%c0_24, %c0_25] : memref<1x512xf32, #tpu.memory_space<vmem>>, vector<1x512xf32>
    %60 = vector.broadcast %59 : vector<1x512xf32> to vector<16x512xf32>
    %61 = arith.addf %58, %60 : vector<16x512xf32>
    %62 = vector.extract_strided_slice %61 {offsets = [0, 0], sizes = [16, 128], strides = [1, 1]} : vector<16x512xf32> to vector<16x128xf32>
    %63 = arith.negf %62 : vector<16x128xf32>
    %64 = math.exp %63 : vector<16x128xf32>
    %cst_26 = arith.constant 1.000000e+00 : f32
    %65 = vector.broadcast %cst_26 : f32 to vector<16x128xf32>
    %66 = arith.addf %65, %64 : vector<16x128xf32>
    %67 = arith.divf %65, %66 : vector<16x128xf32>
    %68 = vector.extract_strided_slice %61 {offsets = [0, 128], sizes = [16, 128], strides = [1, 1]} : vector<16x512xf32> to vector<16x128xf32>
    %69 = arith.negf %68 : vector<16x128xf32>
    %70 = math.exp %69 : vector<16x128xf32>
    %cst_27 = arith.constant 1.000000e+00 : f32
    %71 = vector.broadcast %cst_27 : f32 to vector<16x128xf32>
    %72 = arith.addf %71, %70 : vector<16x128xf32>
    %73 = arith.divf %71, %72 : vector<16x128xf32>
    %74 = vector.extract_strided_slice %61 {offsets = [0, 256], sizes = [16, 128], strides = [1, 1]} : vector<16x512xf32> to vector<16x128xf32>
    %75 = math.tanh %74 : vector<16x128xf32>
    %76 = vector.extract_strided_slice %61 {offsets = [0, 384], sizes = [16, 128], strides = [1, 1]} : vector<16x512xf32> to vector<16x128xf32>
    %77 = arith.negf %76 : vector<16x128xf32>
    %78 = math.exp %77 : vector<16x128xf32>
    %cst_28 = arith.constant 1.000000e+00 : f32
    %79 = vector.broadcast %cst_28 : f32 to vector<16x128xf32>
    %80 = arith.addf %79, %78 : vector<16x128xf32>
    %81 = arith.divf %79, %80 : vector<16x128xf32>
    %82 = arith.mulf %73, %41 : vector<16x128xf32>
    %83 = arith.mulf %67, %75 : vector<16x128xf32>
    %84 = arith.addf %82, %83 : vector<16x128xf32>
    %85 = math.tanh %84 : vector<16x128xf32>
    %86 = arith.mulf %81, %85 : vector<16x128xf32>
    %c0_i32_29 = arith.constant 0 : i32
    %87 = arith.addi %c0_i32_29, %c1_i32 : i32
    %c16_i32_30 = arith.constant 16 : i32
    %88 = arith.muli %87, %c16_i32_30 : i32
    %89 = tpu.assume_multiple %88, 16 : i32
    %90 = arith.truncf %86 : vector<16x128xf32> to vector<16x128xbf16>
    %91 = arith.index_cast %89 : i32 to index
    %c0_31 = arith.constant 0 : index
    %92 = vector.load %arg11[%91, %c0_31] : memref<128x128xbf16, #tpu.memory_space<vmem>>, vector<16x128xbf16>
    tpu.vector_store %arg11[%91, %c0_31], %90 {strides = array<i32>} : memref<128x128xbf16, #tpu.memory_space<vmem>>, vector<16x128xbf16>,
    %c2_i32 = arith.constant 2 : i32
    %c16_i32_32 = arith.constant 16 : i32
    %93 = arith.muli %c2_i32, %c16_i32_32 : i32
    %94 = tpu.assume_multiple %93, 16 : i32
    %95 = arith.truncf %86 : vector<16x128xf32> to vector<16x128xbf16>
    %c0_33 = arith.constant 0 : index
    %c0_34 = arith.constant 0 : index
    %96 = vector.load %arg2[%c0_33, %c0_34] : memref<128x512xbf16, #tpu.memory_space<vmem>>, vector<128x512xbf16>
    %cst_35 = arith.constant dense<0.000000e+00> : vector<16x512xf32>
    %97 = tpu.matmul %95, %96, %cst_35 {dimension_numbers = #tpu.dot_dimension_numbers<[1], [0], [0], [1], [0, 0, 1, 1], [], []>} : vector<16x128xbf16>, vector<128x512xbf16>, vector<16x512xf32> -> vector<16x512xf32>
    %98 = arith.index_cast %94 : i32 to index
    %c0_36 = arith.constant 0 : index
    %99 = vector.load %arg10[%98, %c0_36] : memref<128x512xbf16, #tpu.memory_space<vmem>>, vector<16x512xbf16>
    %100 = arith.extf %99 : vector<16x512xbf16> to vector<16x512xf32>
    %101 = arith.addf %97, %100 : vector<16x512xf32>
    %c0_37 = arith.constant 0 : index
    %c0_38 = arith.constant 0 : index
    %102 = vector.load %arg3[%c0_37, %c0_38] : memref<1x512xf32, #tpu.memory_space<vmem>>, vector<1x512xf32>
    %103 = vector.broadcast %102 : vector<1x512xf32> to vector<16x512xf32>
    %104 = arith.addf %101, %103 : vector<16x512xf32>
    %105 = vector.extract_strided_slice %104 {offsets = [0, 0], sizes = [16, 128], strides = [1, 1]} : vector<16x512xf32> to vector<16x128xf32>
    %106 = arith.negf %105 : vector<16x128xf32>
    %107 = math.exp %106 : vector<16x128xf32>
    %cst_39 = arith.constant 1.000000e+00 : f32
    %108 = vector.broadcast %cst_39 : f32 to vector<16x128xf32>
    %109 = arith.addf %108, %107 : vector<16x128xf32>
    %110 = arith.divf %108, %109 : vector<16x128xf32>
    %111 = vector.extract_strided_slice %104 {offsets = [0, 128], sizes = [16, 128], strides = [1, 1]} : vector<16x512xf32> to vector<16x128xf32>
    %112 = arith.negf %111 : vector<16x128xf32>
    %113 = math.exp %112 : vector<16x128xf32>
    %cst_40 = arith.constant 1.000000e+00 : f32
    %114 = vector.broadcast %cst_40 : f32 to vector<16x128xf32>
    %115 = arith.addf %114, %113 : vector<16x128xf32>
    %116 = arith.divf %114, %115 : vector<16x128xf32>
    %117 = vector.extract_strided_slice %104 {offsets = [0, 256], sizes = [16, 128], strides = [1, 1]} : vector<16x512xf32> to vector<16x128xf32>
    %118 = math.tanh %117 : vector<16x128xf32>
    %119 = vector.extract_strided_slice %104 {offsets = [0, 384], sizes = [16, 128], strides = [1, 1]} : vector<16x512xf32> to vector<16x128xf32>
    %120 = arith.negf %119 : vector<16x128xf32>
    %121 = math.exp %120 : vector<16x128xf32>
    %cst_41 = arith.constant 1.000000e+00 : f32
    %122 = vector.broadcast %cst_41 : f32 to vector<16x128xf32>
    %123 = arith.addf %122, %121 : vector<16x128xf32>
    %124 = arith.divf %122, %123 : vector<16x128xf32>
    %125 = arith.mulf %116, %84 : vector<16x128xf32>
    %126 = arith.mulf %110, %118 : vector<16x128xf32>
    %127 = arith.addf %125, %126 : vector<16x128xf32>
    %128 = math.tanh %127 : vector<16x128xf32>
    %129 = arith.mulf %124, %128 : vector<16x128xf32>
    %c0_i32_42 = arith.constant 0 : i32
    %130 = arith.addi %c0_i32_42, %c2_i32 : i32
    %c16_i32_43 = arith.constant 16 : i32
    %131 = arith.muli %130, %c16_i32_43 : i32
    %132 = tpu.assume_multiple %131, 16 : i32
    %133 = arith.truncf %129 : vector<16x128xf32> to vector<16x128xbf16>
    %134 = arith.index_cast %132 : i32 to index
    %c0_44 = arith.constant 0 : index
    %135 = vector.load %arg11[%134, %c0_44] : memref<128x128xbf16, #tpu.memory_space<vmem>>, vector<16x128xbf16>
    tpu.vector_store %arg11[%134, %c0_44], %133 {strides = array<i32>} : memref<128x128xbf16, #tpu.memory_space<vmem>>, vector<16x128xbf16>,
    %c3_i32 = arith.constant 3 : i32
    %c16_i32_45 = arith.constant 16 : i32
    %136 = arith.muli %c3_i32, %c16_i32_45 : i32
    %137 = tpu.assume_multiple %136, 16 : i32
    %138 = arith.truncf %129 : vector<16x128xf32> to vector<16x128xbf16>
    %c0_46 = arith.constant 0 : index
    %c0_47 = arith.constant 0 : index
    %139 = vector.load %arg2[%c0_46, %c0_47] : memref<128x512xbf16, #tpu.memory_space<vmem>>, vector<128x512xbf16>
    %cst_48 = arith.constant dense<0.000000e+00> : vector<16x512xf32>
    %140 = tpu.matmul %138, %139, %cst_48 {dimension_numbers = #tpu.dot_dimension_numbers<[1], [0], [0], [1], [0, 0, 1, 1], [], []>} : vector<16x128xbf16>, vector<128x512xbf16>, vector<16x512xf32> -> vector<16x512xf32>
    %141 = arith.index_cast %137 : i32 to index
    %c0_49 = arith.constant 0 : index
    %142 = vector.load %arg10[%141, %c0_49] : memref<128x512xbf16, #tpu.memory_space<vmem>>, vector<16x512xbf16>
    %143 = arith.extf %142 : vector<16x512xbf16> to vector<16x512xf32>
    %144 = arith.addf %140, %143 : vector<16x512xf32>
    %c0_50 = arith.constant 0 : index
    %c0_51 = arith.constant 0 : index
    %145 = vector.load %arg3[%c0_50, %c0_51] : memref<1x512xf32, #tpu.memory_space<vmem>>, vector<1x512xf32>
    %146 = vector.broadcast %145 : vector<1x512xf32> to vector<16x512xf32>
    %147 = arith.addf %144, %146 : vector<16x512xf32>
    %148 = vector.extract_strided_slice %147 {offsets = [0, 0], sizes = [16, 128], strides = [1, 1]} : vector<16x512xf32> to vector<16x128xf32>
    %149 = arith.negf %148 : vector<16x128xf32>
    %150 = math.exp %149 : vector<16x128xf32>
    %cst_52 = arith.constant 1.000000e+00 : f32
    %151 = vector.broadcast %cst_52 : f32 to vector<16x128xf32>
    %152 = arith.addf %151, %150 : vector<16x128xf32>
    %153 = arith.divf %151, %152 : vector<16x128xf32>
    %154 = vector.extract_strided_slice %147 {offsets = [0, 128], sizes = [16, 128], strides = [1, 1]} : vector<16x512xf32> to vector<16x128xf32>
    %155 = arith.negf %154 : vector<16x128xf32>
    %156 = math.exp %155 : vector<16x128xf32>
    %cst_53 = arith.constant 1.000000e+00 : f32
    %157 = vector.broadcast %cst_53 : f32 to vector<16x128xf32>
    %158 = arith.addf %157, %156 : vector<16x128xf32>
    %159 = arith.divf %157, %158 : vector<16x128xf32>
    %160 = vector.extract_strided_slice %147 {offsets = [0, 256], sizes = [16, 128], strides = [1, 1]} : vector<16x512xf32> to vector<16x128xf32>
    %161 = math.tanh %160 : vector<16x128xf32>
    %162 = vector.extract_strided_slice %147 {offsets = [0, 384], sizes = [16, 128], strides = [1, 1]} : vector<16x512xf32> to vector<16x128xf32>
    %163 = arith.negf %162 : vector<16x128xf32>
    %164 = math.exp %163 : vector<16x128xf32>
    %cst_54 = arith.constant 1.000000e+00 : f32
    %165 = vector.broadcast %cst_54 : f32 to vector<16x128xf32>
    %166 = arith.addf %165, %164 : vector<16x128xf32>
    %167 = arith.divf %165, %166 : vector<16x128xf32>
    %168 = arith.mulf %159, %127 : vector<16x128xf32>
    %169 = arith.mulf %153, %161 : vector<16x128xf32>
    %170 = arith.addf %168, %169 : vector<16x128xf32>
    %171 = math.tanh %170 : vector<16x128xf32>
    %172 = arith.mulf %167, %171 : vector<16x128xf32>
    %c0_i32_55 = arith.constant 0 : i32
    %173 = arith.addi %c0_i32_55, %c3_i32 : i32
    %c16_i32_56 = arith.constant 16 : i32
    %174 = arith.muli %173, %c16_i32_56 : i32
    %175 = tpu.assume_multiple %174, 16 : i32
    %176 = arith.truncf %172 : vector<16x128xf32> to vector<16x128xbf16>
    %177 = arith.index_cast %175 : i32 to index
    %c0_57 = arith.constant 0 : index
    %178 = vector.load %arg11[%177, %c0_57] : memref<128x128xbf16, #tpu.memory_space<vmem>>, vector<16x128xbf16>
    tpu.vector_store %arg11[%177, %c0_57], %176 {strides = array<i32>} : memref<128x128xbf16, #tpu.memory_space<vmem>>, vector<16x128xbf16>,
    %c4_i32 = arith.constant 4 : i32
    %c16_i32_58 = arith.constant 16 : i32
    %179 = arith.muli %c4_i32, %c16_i32_58 : i32
    %180 = tpu.assume_multiple %179, 16 : i32
    %181 = arith.truncf %172 : vector<16x128xf32> to vector<16x128xbf16>
    %c0_59 = arith.constant 0 : index
    %c0_60 = arith.constant 0 : index
    %182 = vector.load %arg2[%c0_59, %c0_60] : memref<128x512xbf16, #tpu.memory_space<vmem>>, vector<128x512xbf16>
    %cst_61 = arith.constant dense<0.000000e+00> : vector<16x512xf32>
    %183 = tpu.matmul %181, %182, %cst_61 {dimension_numbers = #tpu.dot_dimension_numbers<[1], [0], [0], [1], [0, 0, 1, 1], [], []>} : vector<16x128xbf16>, vector<128x512xbf16>, vector<16x512xf32> -> vector<16x512xf32>
    %184 = arith.index_cast %180 : i32 to index
    %c0_62 = arith.constant 0 : index
    %185 = vector.load %arg10[%184, %c0_62] : memref<128x512xbf16, #tpu.memory_space<vmem>>, vector<16x512xbf16>
    %186 = arith.extf %185 : vector<16x512xbf16> to vector<16x512xf32>
    %187 = arith.addf %183, %186 : vector<16x512xf32>
    %c0_63 = arith.constant 0 : index
    %c0_64 = arith.constant 0 : index
    %188 = vector.load %arg3[%c0_63, %c0_64] : memref<1x512xf32, #tpu.memory_space<vmem>>, vector<1x512xf32>
    %189 = vector.broadcast %188 : vector<1x512xf32> to vector<16x512xf32>
    %190 = arith.addf %187, %189 : vector<16x512xf32>
    %191 = vector.extract_strided_slice %190 {offsets = [0, 0], sizes = [16, 128], strides = [1, 1]} : vector<16x512xf32> to vector<16x128xf32>
    %192 = arith.negf %191 : vector<16x128xf32>
    %193 = math.exp %192 : vector<16x128xf32>
    %cst_65 = arith.constant 1.000000e+00 : f32
    %194 = vector.broadcast %cst_65 : f32 to vector<16x128xf32>
    %195 = arith.addf %194, %193 : vector<16x128xf32>
    %196 = arith.divf %194, %195 : vector<16x128xf32>
    %197 = vector.extract_strided_slice %190 {offsets = [0, 128], sizes = [16, 128], strides = [1, 1]} : vector<16x512xf32> to vector<16x128xf32>
    %198 = arith.negf %197 : vector<16x128xf32>
    %199 = math.exp %198 : vector<16x128xf32>
    %cst_66 = arith.constant 1.000000e+00 : f32
    %200 = vector.broadcast %cst_66 : f32 to vector<16x128xf32>
    %201 = arith.addf %200, %199 : vector<16x128xf32>
    %202 = arith.divf %200, %201 : vector<16x128xf32>
    %203 = vector.extract_strided_slice %190 {offsets = [0, 256], sizes = [16, 128], strides = [1, 1]} : vector<16x512xf32> to vector<16x128xf32>
    %204 = math.tanh %203 : vector<16x128xf32>
    %205 = vector.extract_strided_slice %190 {offsets = [0, 384], sizes = [16, 128], strides = [1, 1]} : vector<16x512xf32> to vector<16x128xf32>
    %206 = arith.negf %205 : vector<16x128xf32>
    %207 = math.exp %206 : vector<16x128xf32>
    %cst_67 = arith.constant 1.000000e+00 : f32
    %208 = vector.broadcast %cst_67 : f32 to vector<16x128xf32>
    %209 = arith.addf %208, %207 : vector<16x128xf32>
    %210 = arith.divf %208, %209 : vector<16x128xf32>
    %211 = arith.mulf %202, %170 : vector<16x128xf32>
    %212 = arith.mulf %196, %204 : vector<16x128xf32>
    %213 = arith.addf %211, %212 : vector<16x128xf32>
    %214 = math.tanh %213 : vector<16x128xf32>
    %215 = arith.mulf %210, %214 : vector<16x128xf32>
    %c0_i32_68 = arith.constant 0 : i32
    %216 = arith.addi %c0_i32_68, %c4_i32 : i32
    %c16_i32_69 = arith.constant 16 : i32
    %217 = arith.muli %216, %c16_i32_69 : i32
    %218 = tpu.assume_multiple %217, 16 : i32
    %219 = arith.truncf %215 : vector<16x128xf32> to vector<16x128xbf16>
    %220 = arith.index_cast %218 : i32 to index
    %c0_70 = arith.constant 0 : index
    %221 = vector.load %arg11[%220, %c0_70] : memref<128x128xbf16, #tpu.memory_space<vmem>>, vector<16x128xbf16>
    tpu.vector_store %arg11[%220, %c0_70], %219 {strides = array<i32>} : memref<128x128xbf16, #tpu.memory_space<vmem>>, vector<16x128xbf16>,
    %c5_i32 = arith.constant 5 : i32
    %c16_i32_71 = arith.constant 16 : i32
    %222 = arith.muli %c5_i32, %c16_i32_71 : i32
    %223 = tpu.assume_multiple %222, 16 : i32
    %224 = arith.truncf %215 : vector<16x128xf32> to vector<16x128xbf16>
    %c0_72 = arith.constant 0 : index
    %c0_73 = arith.constant 0 : index
    %225 = vector.load %arg2[%c0_72, %c0_73] : memref<128x512xbf16, #tpu.memory_space<vmem>>, vector<128x512xbf16>
    %cst_74 = arith.constant dense<0.000000e+00> : vector<16x512xf32>
    %226 = tpu.matmul %224, %225, %cst_74 {dimension_numbers = #tpu.dot_dimension_numbers<[1], [0], [0], [1], [0, 0, 1, 1], [], []>} : vector<16x128xbf16>, vector<128x512xbf16>, vector<16x512xf32> -> vector<16x512xf32>
    %227 = arith.index_cast %223 : i32 to index
    %c0_75 = arith.constant 0 : index
    %228 = vector.load %arg10[%227, %c0_75] : memref<128x512xbf16, #tpu.memory_space<vmem>>, vector<16x512xbf16>
    %229 = arith.extf %228 : vector<16x512xbf16> to vector<16x512xf32>
    %230 = arith.addf %226, %229 : vector<16x512xf32>
    %c0_76 = arith.constant 0 : index
    %c0_77 = arith.constant 0 : index
    %231 = vector.load %arg3[%c0_76, %c0_77] : memref<1x512xf32, #tpu.memory_space<vmem>>, vector<1x512xf32>
    %232 = vector.broadcast %231 : vector<1x512xf32> to vector<16x512xf32>
    %233 = arith.addf %230, %232 : vector<16x512xf32>
    %234 = vector.extract_strided_slice %233 {offsets = [0, 0], sizes = [16, 128], strides = [1, 1]} : vector<16x512xf32> to vector<16x128xf32>
    %235 = arith.negf %234 : vector<16x128xf32>
    %236 = math.exp %235 : vector<16x128xf32>
    %cst_78 = arith.constant 1.000000e+00 : f32
    %237 = vector.broadcast %cst_78 : f32 to vector<16x128xf32>
    %238 = arith.addf %237, %236 : vector<16x128xf32>
    %239 = arith.divf %237, %238 : vector<16x128xf32>
    %240 = vector.extract_strided_slice %233 {offsets = [0, 128], sizes = [16, 128], strides = [1, 1]} : vector<16x512xf32> to vector<16x128xf32>
    %241 = arith.negf %240 : vector<16x128xf32>
    %242 = math.exp %241 : vector<16x128xf32>
    %cst_79 = arith.constant 1.000000e+00 : f32
    %243 = vector.broadcast %cst_79 : f32 to vector<16x128xf32>
    %244 = arith.addf %243, %242 : vector<16x128xf32>
    %245 = arith.divf %243, %244 : vector<16x128xf32>
    %246 = vector.extract_strided_slice %233 {offsets = [0, 256], sizes = [16, 128], strides = [1, 1]} : vector<16x512xf32> to vector<16x128xf32>
    %247 = math.tanh %246 : vector<16x128xf32>
    %248 = vector.extract_strided_slice %233 {offsets = [0, 384], sizes = [16, 128], strides = [1, 1]} : vector<16x512xf32> to vector<16x128xf32>
    %249 = arith.negf %248 : vector<16x128xf32>
    %250 = math.exp %249 : vector<16x128xf32>
    %cst_80 = arith.constant 1.000000e+00 : f32
    %251 = vector.broadcast %cst_80 : f32 to vector<16x128xf32>
    %252 = arith.addf %251, %250 : vector<16x128xf32>
    %253 = arith.divf %251, %252 : vector<16x128xf32>
    %254 = arith.mulf %245, %213 : vector<16x128xf32>
    %255 = arith.mulf %239, %247 : vector<16x128xf32>
    %256 = arith.addf %254, %255 : vector<16x128xf32>
    %257 = math.tanh %256 : vector<16x128xf32>
    %258 = arith.mulf %253, %257 : vector<16x128xf32>
    %c0_i32_81 = arith.constant 0 : i32
    %259 = arith.addi %c0_i32_81, %c5_i32 : i32
    %c16_i32_82 = arith.constant 16 : i32
    %260 = arith.muli %259, %c16_i32_82 : i32
    %261 = tpu.assume_multiple %260, 16 : i32
    %262 = arith.truncf %258 : vector<16x128xf32> to vector<16x128xbf16>
    %263 = arith.index_cast %261 : i32 to index
    %c0_83 = arith.constant 0 : index
    %264 = vector.load %arg11[%263, %c0_83] : memref<128x128xbf16, #tpu.memory_space<vmem>>, vector<16x128xbf16>
    tpu.vector_store %arg11[%263, %c0_83], %262 {strides = array<i32>} : memref<128x128xbf16, #tpu.memory_space<vmem>>, vector<16x128xbf16>,
    %c6_i32 = arith.constant 6 : i32
    %c16_i32_84 = arith.constant 16 : i32
    %265 = arith.muli %c6_i32, %c16_i32_84 : i32
    %266 = tpu.assume_multiple %265, 16 : i32
    %267 = arith.truncf %258 : vector<16x128xf32> to vector<16x128xbf16>
    %c0_85 = arith.constant 0 : index
    %c0_86 = arith.constant 0 : index
    %268 = vector.load %arg2[%c0_85, %c0_86] : memref<128x512xbf16, #tpu.memory_space<vmem>>, vector<128x512xbf16>
    %cst_87 = arith.constant dense<0.000000e+00> : vector<16x512xf32>
    %269 = tpu.matmul %267, %268, %cst_87 {dimension_numbers = #tpu.dot_dimension_numbers<[1], [0], [0], [1], [0, 0, 1, 1], [], []>} : vector<16x128xbf16>, vector<128x512xbf16>, vector<16x512xf32> -> vector<16x512xf32>
    %270 = arith.index_cast %266 : i32 to index
    %c0_88 = arith.constant 0 : index
    %271 = vector.load %arg10[%270, %c0_88] : memref<128x512xbf16, #tpu.memory_space<vmem>>, vector<16x512xbf16>
    %272 = arith.extf %271 : vector<16x512xbf16> to vector<16x512xf32>
    %273 = arith.addf %269, %272 : vector<16x512xf32>
    %c0_89 = arith.constant 0 : index
    %c0_90 = arith.constant 0 : index
    %274 = vector.load %arg3[%c0_89, %c0_90] : memref<1x512xf32, #tpu.memory_space<vmem>>, vector<1x512xf32>
    %275 = vector.broadcast %274 : vector<1x512xf32> to vector<16x512xf32>
    %276 = arith.addf %273, %275 : vector<16x512xf32>
    %277 = vector.extract_strided_slice %276 {offsets = [0, 0], sizes = [16, 128], strides = [1, 1]} : vector<16x512xf32> to vector<16x128xf32>
    %278 = arith.negf %277 : vector<16x128xf32>
    %279 = math.exp %278 : vector<16x128xf32>
    %cst_91 = arith.constant 1.000000e+00 : f32
    %280 = vector.broadcast %cst_91 : f32 to vector<16x128xf32>
    %281 = arith.addf %280, %279 : vector<16x128xf32>
    %282 = arith.divf %280, %281 : vector<16x128xf32>
    %283 = vector.extract_strided_slice %276 {offsets = [0, 128], sizes = [16, 128], strides = [1, 1]} : vector<16x512xf32> to vector<16x128xf32>
    %284 = arith.negf %283 : vector<16x128xf32>
    %285 = math.exp %284 : vector<16x128xf32>
    %cst_92 = arith.constant 1.000000e+00 : f32
    %286 = vector.broadcast %cst_92 : f32 to vector<16x128xf32>
    %287 = arith.addf %286, %285 : vector<16x128xf32>
    %288 = arith.divf %286, %287 : vector<16x128xf32>
    %289 = vector.extract_strided_slice %276 {offsets = [0, 256], sizes = [16, 128], strides = [1, 1]} : vector<16x512xf32> to vector<16x128xf32>
    %290 = math.tanh %289 : vector<16x128xf32>
    %291 = vector.extract_strided_slice %276 {offsets = [0, 384], sizes = [16, 128], strides = [1, 1]} : vector<16x512xf32> to vector<16x128xf32>
    %292 = arith.negf %291 : vector<16x128xf32>
    %293 = math.exp %292 : vector<16x128xf32>
    %cst_93 = arith.constant 1.000000e+00 : f32
    %294 = vector.broadcast %cst_93 : f32 to vector<16x128xf32>
    %295 = arith.addf %294, %293 : vector<16x128xf32>
    %296 = arith.divf %294, %295 : vector<16x128xf32>
    %297 = arith.mulf %288, %256 : vector<16x128xf32>
    %298 = arith.mulf %282, %290 : vector<16x128xf32>
    %299 = arith.addf %297, %298 : vector<16x128xf32>
    %300 = math.tanh %299 : vector<16x128xf32>
    %301 = arith.mulf %296, %300 : vector<16x128xf32>
    %c0_i32_94 = arith.constant 0 : i32
    %302 = arith.addi %c0_i32_94, %c6_i32 : i32
    %c16_i32_95 = arith.constant 16 : i32
    %303 = arith.muli %302, %c16_i32_95 : i32
    %304 = tpu.assume_multiple %303, 16 : i32
    %305 = arith.truncf %301 : vector<16x128xf32> to vector<16x128xbf16>
    %306 = arith.index_cast %304 : i32 to index
    %c0_96 = arith.constant 0 : index
    %307 = vector.load %arg11[%306, %c0_96] : memref<128x128xbf16, #tpu.memory_space<vmem>>, vector<16x128xbf16>
    tpu.vector_store %arg11[%306, %c0_96], %305 {strides = array<i32>} : memref<128x128xbf16, #tpu.memory_space<vmem>>, vector<16x128xbf16>,
    %c7_i32 = arith.constant 7 : i32
    %c16_i32_97 = arith.constant 16 : i32
    %308 = arith.muli %c7_i32, %c16_i32_97 : i32
    %309 = tpu.assume_multiple %308, 16 : i32
    %310 = arith.truncf %301 : vector<16x128xf32> to vector<16x128xbf16>
    %c0_98 = arith.constant 0 : index
    %c0_99 = arith.constant 0 : index
    %311 = vector.load %arg2[%c0_98, %c0_99] : memref<128x512xbf16, #tpu.memory_space<vmem>>, vector<128x512xbf16>
    %cst_100 = arith.constant dense<0.000000e+00> : vector<16x512xf32>
    %312 = tpu.matmul %310, %311, %cst_100 {dimension_numbers = #tpu.dot_dimension_numbers<[1], [0], [0], [1], [0, 0, 1, 1], [], []>} : vector<16x128xbf16>, vector<128x512xbf16>, vector<16x512xf32> -> vector<16x512xf32>
    %313 = arith.index_cast %309 : i32 to index
    %c0_101 = arith.constant 0 : index
    %314 = vector.load %arg10[%313, %c0_101] : memref<128x512xbf16, #tpu.memory_space<vmem>>, vector<16x512xbf16>
    %315 = arith.extf %314 : vector<16x512xbf16> to vector<16x512xf32>
    %316 = arith.addf %312, %315 : vector<16x512xf32>
    %c0_102 = arith.constant 0 : index
    %c0_103 = arith.constant 0 : index
    %317 = vector.load %arg3[%c0_102, %c0_103] : memref<1x512xf32, #tpu.memory_space<vmem>>, vector<1x512xf32>
    %318 = vector.broadcast %317 : vector<1x512xf32> to vector<16x512xf32>
    %319 = arith.addf %316, %318 : vector<16x512xf32>
    %320 = vector.extract_strided_slice %319 {offsets = [0, 0], sizes = [16, 128], strides = [1, 1]} : vector<16x512xf32> to vector<16x128xf32>
    %321 = arith.negf %320 : vector<16x128xf32>
    %322 = math.exp %321 : vector<16x128xf32>
    %cst_104 = arith.constant 1.000000e+00 : f32
    %323 = vector.broadcast %cst_104 : f32 to vector<16x128xf32>
    %324 = arith.addf %323, %322 : vector<16x128xf32>
    %325 = arith.divf %323, %324 : vector<16x128xf32>
    %326 = vector.extract_strided_slice %319 {offsets = [0, 128], sizes = [16, 128], strides = [1, 1]} : vector<16x512xf32> to vector<16x128xf32>
    %327 = arith.negf %326 : vector<16x128xf32>
    %328 = math.exp %327 : vector<16x128xf32>
    %cst_105 = arith.constant 1.000000e+00 : f32
    %329 = vector.broadcast %cst_105 : f32 to vector<16x128xf32>
    %330 = arith.addf %329, %328 : vector<16x128xf32>
    %331 = arith.divf %329, %330 : vector<16x128xf32>
    %332 = vector.extract_strided_slice %319 {offsets = [0, 256], sizes = [16, 128], strides = [1, 1]} : vector<16x512xf32> to vector<16x128xf32>
    %333 = math.tanh %332 : vector<16x128xf32>
    %334 = vector.extract_strided_slice %319 {offsets = [0, 384], sizes = [16, 128], strides = [1, 1]} : vector<16x512xf32> to vector<16x128xf32>
    %335 = arith.negf %334 : vector<16x128xf32>
    %336 = math.exp %335 : vector<16x128xf32>
    %cst_106 = arith.constant 1.000000e+00 : f32
    %337 = vector.broadcast %cst_106 : f32 to vector<16x128xf32>
    %338 = arith.addf %337, %336 : vector<16x128xf32>
    %339 = arith.divf %337, %338 : vector<16x128xf32>
    %340 = arith.mulf %331, %299 : vector<16x128xf32>
    %341 = arith.mulf %325, %333 : vector<16x128xf32>
    %342 = arith.addf %340, %341 : vector<16x128xf32>
    %343 = math.tanh %342 : vector<16x128xf32>
    %344 = arith.mulf %339, %343 : vector<16x128xf32>
    %c0_i32_107 = arith.constant 0 : i32
    %345 = arith.addi %c0_i32_107, %c7_i32 : i32
    %c16_i32_108 = arith.constant 16 : i32
    %346 = arith.muli %345, %c16_i32_108 : i32
    %347 = tpu.assume_multiple %346, 16 : i32
    %348 = arith.truncf %344 : vector<16x128xf32> to vector<16x128xbf16>
    %349 = arith.index_cast %347 : i32 to index
    %c0_109 = arith.constant 0 : index
    %350 = vector.load %arg11[%349, %c0_109] : memref<128x128xbf16, #tpu.memory_space<vmem>>, vector<16x128xbf16>
    tpu.vector_store %arg11[%349, %c0_109], %348 {strides = array<i32>} : memref<128x128xbf16, #tpu.memory_space<vmem>>, vector<16x128xbf16>,
    %c8_i32 = arith.constant 8 : i32
    %cst_110 = arith.constant 0.000000e+00 : f32
    %351 = vector.broadcast %cst_110 : f32 to vector<16x128xf32>
    %cst_111 = arith.constant 0.000000e+00 : f32
    %352 = vector.broadcast %cst_111 : f32 to vector<16x128xf32>
    %c0_112 = arith.constant 0 : index
    %c0_113 = arith.constant 0 : index
    %353 = vector.load %arg11[%c0_112, %c0_113] : memref<128x128xbf16, #tpu.memory_space<vmem>>, vector<128x128xbf16>
    %c0_114 = arith.constant 0 : index
    %c0_115 = arith.constant 0 : index
    %354 = vector.load %arg4[%c0_114, %c0_115] : memref<128x512xbf16, #tpu.memory_space<vmem>>, vector<128x512xbf16>
    %cst_116 = arith.constant dense<0.000000e+00> : vector<128x512xf32>
    %355 = tpu.matmul %353, %354, %cst_116 {dimension_numbers = #tpu.dot_dimension_numbers<[1], [0], [0], [1], [0, 0, 1, 1], [], []>} : vector<128x128xbf16>, vector<128x512xbf16>, vector<128x512xf32> -> vector<128x512xf32>
    %356 = arith.truncf %355 : vector<128x512xf32> to vector<128x512xbf16>
    %c0_117 = arith.constant 0 : index
    %c0_118 = arith.constant 0 : index
    %357 = vector.load %arg10[%c0_117, %c0_118] : memref<128x512xbf16, #tpu.memory_space<vmem>>, vector<128x512xbf16>
    tpu.vector_store %arg10[%c0_117, %c0_118], %356 {strides = array<i32>} : memref<128x512xbf16, #tpu.memory_space<vmem>>, vector<128x512xbf16>,
    %c0_i32_119 = arith.constant 0 : i32
    %c16_i32_120 = arith.constant 16 : i32
    %358 = arith.muli %c0_i32_119, %c16_i32_120 : i32
    %359 = tpu.assume_multiple %358, 16 : i32
    %360 = arith.truncf %351 : vector<16x128xf32> to vector<16x128xbf16>
    %c0_121 = arith.constant 0 : index
    %c0_122 = arith.constant 0 : index
    %361 = vector.load %arg5[%c0_121, %c0_122] : memref<128x512xbf16, #tpu.memory_space<vmem>>, vector<128x512xbf16>
    %cst_123 = arith.constant dense<0.000000e+00> : vector<16x512xf32>
    %362 = tpu.matmul %360, %361, %cst_123 {dimension_numbers = #tpu.dot_dimension_numbers<[1], [0], [0], [1], [0, 0, 1, 1], [], []>} : vector<16x128xbf16>, vector<128x512xbf16>, vector<16x512xf32> -> vector<16x512xf32>
    %363 = arith.index_cast %359 : i32 to index
    %c0_124 = arith.constant 0 : index
    %364 = vector.load %arg10[%363, %c0_124] : memref<128x512xbf16, #tpu.memory_space<vmem>>, vector<16x512xbf16>
    %365 = arith.extf %364 : vector<16x512xbf16> to vector<16x512xf32>
    %366 = arith.addf %362, %365 : vector<16x512xf32>
    %c0_125 = arith.constant 0 : index
    %c0_126 = arith.constant 0 : index
    %367 = vector.load %arg6[%c0_125, %c0_126] : memref<1x512xf32, #tpu.memory_space<vmem>>, vector<1x512xf32>
    %368 = vector.broadcast %367 : vector<1x512xf32> to vector<16x512xf32>
    %369 = arith.addf %366, %368 : vector<16x512xf32>
    %370 = vector.extract_strided_slice %369 {offsets = [0, 0], sizes = [16, 128], strides = [1, 1]} : vector<16x512xf32> to vector<16x128xf32>
    %371 = arith.negf %370 : vector<16x128xf32>
    %372 = math.exp %371 : vector<16x128xf32>
    %cst_127 = arith.constant 1.000000e+00 : f32
    %373 = vector.broadcast %cst_127 : f32 to vector<16x128xf32>
    %374 = arith.addf %373, %372 : vector<16x128xf32>
    %375 = arith.divf %373, %374 : vector<16x128xf32>
    %376 = vector.extract_strided_slice %369 {offsets = [0, 128], sizes = [16, 128], strides = [1, 1]} : vector<16x512xf32> to vector<16x128xf32>
    %377 = arith.negf %376 : vector<16x128xf32>
    %378 = math.exp %377 : vector<16x128xf32>
    %cst_128 = arith.constant 1.000000e+00 : f32
    %379 = vector.broadcast %cst_128 : f32 to vector<16x128xf32>
    %380 = arith.addf %379, %378 : vector<16x128xf32>
    %381 = arith.divf %379, %380 : vector<16x128xf32>
    %382 = vector.extract_strided_slice %369 {offsets = [0, 256], sizes = [16, 128], strides = [1, 1]} : vector<16x512xf32> to vector<16x128xf32>
    %383 = math.tanh %382 : vector<16x128xf32>
    %384 = vector.extract_strided_slice %369 {offsets = [0, 384], sizes = [16, 128], strides = [1, 1]} : vector<16x512xf32> to vector<16x128xf32>
    %385 = arith.negf %384 : vector<16x128xf32>
    %386 = math.exp %385 : vector<16x128xf32>
    %cst_129 = arith.constant 1.000000e+00 : f32
    %387 = vector.broadcast %cst_129 : f32 to vector<16x128xf32>
    %388 = arith.addf %387, %386 : vector<16x128xf32>
    %389 = arith.divf %387, %388 : vector<16x128xf32>
    %390 = arith.mulf %381, %352 : vector<16x128xf32>
    %391 = arith.mulf %375, %383 : vector<16x128xf32>
    %392 = arith.addf %390, %391 : vector<16x128xf32>
    %393 = math.tanh %392 : vector<16x128xf32>
    %394 = arith.mulf %389, %393 : vector<16x128xf32>
    %c1_i32_130 = arith.constant 1 : i32
    %c16_i32_131 = arith.constant 16 : i32
    %395 = arith.muli %c1_i32_130, %c16_i32_131 : i32
    %396 = tpu.assume_multiple %395, 16 : i32
    %397 = arith.truncf %394 : vector<16x128xf32> to vector<16x128xbf16>
    %c0_132 = arith.constant 0 : index
    %c0_133 = arith.constant 0 : index
    %398 = vector.load %arg5[%c0_132, %c0_133] : memref<128x512xbf16, #tpu.memory_space<vmem>>, vector<128x512xbf16>
    %cst_134 = arith.constant dense<0.000000e+00> : vector<16x512xf32>
    %399 = tpu.matmul %397, %398, %cst_134 {dimension_numbers = #tpu.dot_dimension_numbers<[1], [0], [0], [1], [0, 0, 1, 1], [], []>} : vector<16x128xbf16>, vector<128x512xbf16>, vector<16x512xf32> -> vector<16x512xf32>
    %400 = arith.index_cast %396 : i32 to index
    %c0_135 = arith.constant 0 : index
    %401 = vector.load %arg10[%400, %c0_135] : memref<128x512xbf16, #tpu.memory_space<vmem>>, vector<16x512xbf16>
    %402 = arith.extf %401 : vector<16x512xbf16> to vector<16x512xf32>
    %403 = arith.addf %399, %402 : vector<16x512xf32>
    %c0_136 = arith.constant 0 : index
    %c0_137 = arith.constant 0 : index
    %404 = vector.load %arg6[%c0_136, %c0_137] : memref<1x512xf32, #tpu.memory_space<vmem>>, vector<1x512xf32>
    %405 = vector.broadcast %404 : vector<1x512xf32> to vector<16x512xf32>
    %406 = arith.addf %403, %405 : vector<16x512xf32>
    %407 = vector.extract_strided_slice %406 {offsets = [0, 0], sizes = [16, 128], strides = [1, 1]} : vector<16x512xf32> to vector<16x128xf32>
    %408 = arith.negf %407 : vector<16x128xf32>
    %409 = math.exp %408 : vector<16x128xf32>
    %cst_138 = arith.constant 1.000000e+00 : f32
    %410 = vector.broadcast %cst_138 : f32 to vector<16x128xf32>
    %411 = arith.addf %410, %409 : vector<16x128xf32>
    %412 = arith.divf %410, %411 : vector<16x128xf32>
    %413 = vector.extract_strided_slice %406 {offsets = [0, 128], sizes = [16, 128], strides = [1, 1]} : vector<16x512xf32> to vector<16x128xf32>
    %414 = arith.negf %413 : vector<16x128xf32>
    %415 = math.exp %414 : vector<16x128xf32>
    %cst_139 = arith.constant 1.000000e+00 : f32
    %416 = vector.broadcast %cst_139 : f32 to vector<16x128xf32>
    %417 = arith.addf %416, %415 : vector<16x128xf32>
    %418 = arith.divf %416, %417 : vector<16x128xf32>
    %419 = vector.extract_strided_slice %406 {offsets = [0, 256], sizes = [16, 128], strides = [1, 1]} : vector<16x512xf32> to vector<16x128xf32>
    %420 = math.tanh %419 : vector<16x128xf32>
    %421 = vector.extract_strided_slice %406 {offsets = [0, 384], sizes = [16, 128], strides = [1, 1]} : vector<16x512xf32> to vector<16x128xf32>
    %422 = arith.negf %421 : vector<16x128xf32>
    %423 = math.exp %422 : vector<16x128xf32>
    %cst_140 = arith.constant 1.000000e+00 : f32
    %424 = vector.broadcast %cst_140 : f32 to vector<16x128xf32>
    %425 = arith.addf %424, %423 : vector<16x128xf32>
    %426 = arith.divf %424, %425 : vector<16x128xf32>
    %427 = arith.mulf %418, %392 : vector<16x128xf32>
    %428 = arith.mulf %412, %420 : vector<16x128xf32>
    %429 = arith.addf %427, %428 : vector<16x128xf32>
    %430 = math.tanh %429 : vector<16x128xf32>
    %431 = arith.mulf %426, %430 : vector<16x128xf32>
    %c2_i32_141 = arith.constant 2 : i32
    %c16_i32_142 = arith.constant 16 : i32
    %432 = arith.muli %c2_i32_141, %c16_i32_142 : i32
    %433 = tpu.assume_multiple %432, 16 : i32
    %434 = arith.truncf %431 : vector<16x128xf32> to vector<16x128xbf16>
    %c0_143 = arith.constant 0 : index
    %c0_144 = arith.constant 0 : index
    %435 = vector.load %arg5[%c0_143, %c0_144] : memref<128x512xbf16, #tpu.memory_space<vmem>>, vector<128x512xbf16>
    %cst_145 = arith.constant dense<0.000000e+00> : vector<16x512xf32>
    %436 = tpu.matmul %434, %435, %cst_145 {dimension_numbers = #tpu.dot_dimension_numbers<[1], [0], [0], [1], [0, 0, 1, 1], [], []>} : vector<16x128xbf16>, vector<128x512xbf16>, vector<16x512xf32> -> vector<16x512xf32>
    %437 = arith.index_cast %433 : i32 to index
    %c0_146 = arith.constant 0 : index
    %438 = vector.load %arg10[%437, %c0_146] : memref<128x512xbf16, #tpu.memory_space<vmem>>, vector<16x512xbf16>
    %439 = arith.extf %438 : vector<16x512xbf16> to vector<16x512xf32>
    %440 = arith.addf %436, %439 : vector<16x512xf32>
    %c0_147 = arith.constant 0 : index
    %c0_148 = arith.constant 0 : index
    %441 = vector.load %arg6[%c0_147, %c0_148] : memref<1x512xf32, #tpu.memory_space<vmem>>, vector<1x512xf32>
    %442 = vector.broadcast %441 : vector<1x512xf32> to vector<16x512xf32>
    %443 = arith.addf %440, %442 : vector<16x512xf32>
    %444 = vector.extract_strided_slice %443 {offsets = [0, 0], sizes = [16, 128], strides = [1, 1]} : vector<16x512xf32> to vector<16x128xf32>
    %445 = arith.negf %444 : vector<16x128xf32>
    %446 = math.exp %445 : vector<16x128xf32>
    %cst_149 = arith.constant 1.000000e+00 : f32
    %447 = vector.broadcast %cst_149 : f32 to vector<16x128xf32>
    %448 = arith.addf %447, %446 : vector<16x128xf32>
    %449 = arith.divf %447, %448 : vector<16x128xf32>
    %450 = vector.extract_strided_slice %443 {offsets = [0, 128], sizes = [16, 128], strides = [1, 1]} : vector<16x512xf32> to vector<16x128xf32>
    %451 = arith.negf %450 : vector<16x128xf32>
    %452 = math.exp %451 : vector<16x128xf32>
    %cst_150 = arith.constant 1.000000e+00 : f32
    %453 = vector.broadcast %cst_150 : f32 to vector<16x128xf32>
    %454 = arith.addf %453, %452 : vector<16x128xf32>
    %455 = arith.divf %453, %454 : vector<16x128xf32>
    %456 = vector.extract_strided_slice %443 {offsets = [0, 256], sizes = [16, 128], strides = [1, 1]} : vector<16x512xf32> to vector<16x128xf32>
    %457 = math.tanh %456 : vector<16x128xf32>
    %458 = vector.extract_strided_slice %443 {offsets = [0, 384], sizes = [16, 128], strides = [1, 1]} : vector<16x512xf32> to vector<16x128xf32>
    %459 = arith.negf %458 : vector<16x128xf32>
    %460 = math.exp %459 : vector<16x128xf32>
    %cst_151 = arith.constant 1.000000e+00 : f32
    %461 = vector.broadcast %cst_151 : f32 to vector<16x128xf32>
    %462 = arith.addf %461, %460 : vector<16x128xf32>
    %463 = arith.divf %461, %462 : vector<16x128xf32>
    %464 = arith.mulf %455, %429 : vector<16x128xf32>
    %465 = arith.mulf %449, %457 : vector<16x128xf32>
    %466 = arith.addf %464, %465 : vector<16x128xf32>
    %467 = math.tanh %466 : vector<16x128xf32>
    %468 = arith.mulf %463, %467 : vector<16x128xf32>
    %c3_i32_152 = arith.constant 3 : i32
    %c16_i32_153 = arith.constant 16 : i32
    %469 = arith.muli %c3_i32_152, %c16_i32_153 : i32
    %470 = tpu.assume_multiple %469, 16 : i32
    %471 = arith.truncf %468 : vector<16x128xf32> to vector<16x128xbf16>
    %c0_154 = arith.constant 0 : index
    %c0_155 = arith.constant 0 : index
    %472 = vector.load %arg5[%c0_154, %c0_155] : memref<128x512xbf16, #tpu.memory_space<vmem>>, vector<128x512xbf16>
    %cst_156 = arith.constant dense<0.000000e+00> : vector<16x512xf32>
    %473 = tpu.matmul %471, %472, %cst_156 {dimension_numbers = #tpu.dot_dimension_numbers<[1], [0], [0], [1], [0, 0, 1, 1], [], []>} : vector<16x128xbf16>, vector<128x512xbf16>, vector<16x512xf32> -> vector<16x512xf32>
    %474 = arith.index_cast %470 : i32 to index
    %c0_157 = arith.constant 0 : index
    %475 = vector.load %arg10[%474, %c0_157] : memref<128x512xbf16, #tpu.memory_space<vmem>>, vector<16x512xbf16>
    %476 = arith.extf %475 : vector<16x512xbf16> to vector<16x512xf32>
    %477 = arith.addf %473, %476 : vector<16x512xf32>
    %c0_158 = arith.constant 0 : index
    %c0_159 = arith.constant 0 : index
    %478 = vector.load %arg6[%c0_158, %c0_159] : memref<1x512xf32, #tpu.memory_space<vmem>>, vector<1x512xf32>
    %479 = vector.broadcast %478 : vector<1x512xf32> to vector<16x512xf32>
    %480 = arith.addf %477, %479 : vector<16x512xf32>
    %481 = vector.extract_strided_slice %480 {offsets = [0, 0], sizes = [16, 128], strides = [1, 1]} : vector<16x512xf32> to vector<16x128xf32>
    %482 = arith.negf %481 : vector<16x128xf32>
    %483 = math.exp %482 : vector<16x128xf32>
    %cst_160 = arith.constant 1.000000e+00 : f32
    %484 = vector.broadcast %cst_160 : f32 to vector<16x128xf32>
    %485 = arith.addf %484, %483 : vector<16x128xf32>
    %486 = arith.divf %484, %485 : vector<16x128xf32>
    %487 = vector.extract_strided_slice %480 {offsets = [0, 128], sizes = [16, 128], strides = [1, 1]} : vector<16x512xf32> to vector<16x128xf32>
    %488 = arith.negf %487 : vector<16x128xf32>
    %489 = math.exp %488 : vector<16x128xf32>
    %cst_161 = arith.constant 1.000000e+00 : f32
    %490 = vector.broadcast %cst_161 : f32 to vector<16x128xf32>
    %491 = arith.addf %490, %489 : vector<16x128xf32>
    %492 = arith.divf %490, %491 : vector<16x128xf32>
    %493 = vector.extract_strided_slice %480 {offsets = [0, 256], sizes = [16, 128], strides = [1, 1]} : vector<16x512xf32> to vector<16x128xf32>
    %494 = math.tanh %493 : vector<16x128xf32>
    %495 = vector.extract_strided_slice %480 {offsets = [0, 384], sizes = [16, 128], strides = [1, 1]} : vector<16x512xf32> to vector<16x128xf32>
    %496 = arith.negf %495 : vector<16x128xf32>
    %497 = math.exp %496 : vector<16x128xf32>
    %cst_162 = arith.constant 1.000000e+00 : f32
    %498 = vector.broadcast %cst_162 : f32 to vector<16x128xf32>
    %499 = arith.addf %498, %497 : vector<16x128xf32>
    %500 = arith.divf %498, %499 : vector<16x128xf32>
    %501 = arith.mulf %492, %466 : vector<16x128xf32>
    %502 = arith.mulf %486, %494 : vector<16x128xf32>
    %503 = arith.addf %501, %502 : vector<16x128xf32>
    %504 = math.tanh %503 : vector<16x128xf32>
    %505 = arith.mulf %500, %504 : vector<16x128xf32>
    %c4_i32_163 = arith.constant 4 : i32
    %c16_i32_164 = arith.constant 16 : i32
    %506 = arith.muli %c4_i32_163, %c16_i32_164 : i32
    %507 = tpu.assume_multiple %506, 16 : i32
    %508 = arith.truncf %505 : vector<16x128xf32> to vector<16x128xbf16>
    %c0_165 = arith.constant 0 : index
    %c0_166 = arith.constant 0 : index
    %509 = vector.load %arg5[%c0_165, %c0_166] : memref<128x512xbf16, #tpu.memory_space<vmem>>, vector<128x512xbf16>
    %cst_167 = arith.constant dense<0.000000e+00> : vector<16x512xf32>
    %510 = tpu.matmul %508, %509, %cst_167 {dimension_numbers = #tpu.dot_dimension_numbers<[1], [0], [0], [1], [0, 0, 1, 1], [], []>} : vector<16x128xbf16>, vector<128x512xbf16>, vector<16x512xf32> -> vector<16x512xf32>
    %511 = arith.index_cast %507 : i32 to index
    %c0_168 = arith.constant 0 : index
    %512 = vector.load %arg10[%511, %c0_168] : memref<128x512xbf16, #tpu.memory_space<vmem>>, vector<16x512xbf16>
    %513 = arith.extf %512 : vector<16x512xbf16> to vector<16x512xf32>
    %514 = arith.addf %510, %513 : vector<16x512xf32>
    %c0_169 = arith.constant 0 : index
    %c0_170 = arith.constant 0 : index
    %515 = vector.load %arg6[%c0_169, %c0_170] : memref<1x512xf32, #tpu.memory_space<vmem>>, vector<1x512xf32>
    %516 = vector.broadcast %515 : vector<1x512xf32> to vector<16x512xf32>
    %517 = arith.addf %514, %516 : vector<16x512xf32>
    %518 = vector.extract_strided_slice %517 {offsets = [0, 0], sizes = [16, 128], strides = [1, 1]} : vector<16x512xf32> to vector<16x128xf32>
    %519 = arith.negf %518 : vector<16x128xf32>
    %520 = math.exp %519 : vector<16x128xf32>
    %cst_171 = arith.constant 1.000000e+00 : f32
    %521 = vector.broadcast %cst_171 : f32 to vector<16x128xf32>
    %522 = arith.addf %521, %520 : vector<16x128xf32>
    %523 = arith.divf %521, %522 : vector<16x128xf32>
    %524 = vector.extract_strided_slice %517 {offsets = [0, 128], sizes = [16, 128], strides = [1, 1]} : vector<16x512xf32> to vector<16x128xf32>
    %525 = arith.negf %524 : vector<16x128xf32>
    %526 = math.exp %525 : vector<16x128xf32>
    %cst_172 = arith.constant 1.000000e+00 : f32
    %527 = vector.broadcast %cst_172 : f32 to vector<16x128xf32>
    %528 = arith.addf %527, %526 : vector<16x128xf32>
    %529 = arith.divf %527, %528 : vector<16x128xf32>
    %530 = vector.extract_strided_slice %517 {offsets = [0, 256], sizes = [16, 128], strides = [1, 1]} : vector<16x512xf32> to vector<16x128xf32>
    %531 = math.tanh %530 : vector<16x128xf32>
    %532 = vector.extract_strided_slice %517 {offsets = [0, 384], sizes = [16, 128], strides = [1, 1]} : vector<16x512xf32> to vector<16x128xf32>
    %533 = arith.negf %532 : vector<16x128xf32>
    %534 = math.exp %533 : vector<16x128xf32>
    %cst_173 = arith.constant 1.000000e+00 : f32
    %535 = vector.broadcast %cst_173 : f32 to vector<16x128xf32>
    %536 = arith.addf %535, %534 : vector<16x128xf32>
    %537 = arith.divf %535, %536 : vector<16x128xf32>
    %538 = arith.mulf %529, %503 : vector<16x128xf32>
    %539 = arith.mulf %523, %531 : vector<16x128xf32>
    %540 = arith.addf %538, %539 : vector<16x128xf32>
    %541 = math.tanh %540 : vector<16x128xf32>
    %542 = arith.mulf %537, %541 : vector<16x128xf32>
    %c5_i32_174 = arith.constant 5 : i32
    %c16_i32_175 = arith.constant 16 : i32
    %543 = arith.muli %c5_i32_174, %c16_i32_175 : i32
    %544 = tpu.assume_multiple %543, 16 : i32
    %545 = arith.truncf %542 : vector<16x128xf32> to vector<16x128xbf16>
    %c0_176 = arith.constant 0 : index
    %c0_177 = arith.constant 0 : index
    %546 = vector.load %arg5[%c0_176, %c0_177] : memref<128x512xbf16, #tpu.memory_space<vmem>>, vector<128x512xbf16>
    %cst_178 = arith.constant dense<0.000000e+00> : vector<16x512xf32>
    %547 = tpu.matmul %545, %546, %cst_178 {dimension_numbers = #tpu.dot_dimension_numbers<[1], [0], [0], [1], [0, 0, 1, 1], [], []>} : vector<16x128xbf16>, vector<128x512xbf16>, vector<16x512xf32> -> vector<16x512xf32>
    %548 = arith.index_cast %544 : i32 to index
    %c0_179 = arith.constant 0 : index
    %549 = vector.load %arg10[%548, %c0_179] : memref<128x512xbf16, #tpu.memory_space<vmem>>, vector<16x512xbf16>
    %550 = arith.extf %549 : vector<16x512xbf16> to vector<16x512xf32>
    %551 = arith.addf %547, %550 : vector<16x512xf32>
    %c0_180 = arith.constant 0 : index
    %c0_181 = arith.constant 0 : index
    %552 = vector.load %arg6[%c0_180, %c0_181] : memref<1x512xf32, #tpu.memory_space<vmem>>, vector<1x512xf32>
    %553 = vector.broadcast %552 : vector<1x512xf32> to vector<16x512xf32>
    %554 = arith.addf %551, %553 : vector<16x512xf32>
    %555 = vector.extract_strided_slice %554 {offsets = [0, 0], sizes = [16, 128], strides = [1, 1]} : vector<16x512xf32> to vector<16x128xf32>
    %556 = arith.negf %555 : vector<16x128xf32>
    %557 = math.exp %556 : vector<16x128xf32>
    %cst_182 = arith.constant 1.000000e+00 : f32
    %558 = vector.broadcast %cst_182 : f32 to vector<16x128xf32>
    %559 = arith.addf %558, %557 : vector<16x128xf32>
    %560 = arith.divf %558, %559 : vector<16x128xf32>
    %561 = vector.extract_strided_slice %554 {offsets = [0, 128], sizes = [16, 128], strides = [1, 1]} : vector<16x512xf32> to vector<16x128xf32>
    %562 = arith.negf %561 : vector<16x128xf32>
    %563 = math.exp %562 : vector<16x128xf32>
    %cst_183 = arith.constant 1.000000e+00 : f32
    %564 = vector.broadcast %cst_183 : f32 to vector<16x128xf32>
    %565 = arith.addf %564, %563 : vector<16x128xf32>
    %566 = arith.divf %564, %565 : vector<16x128xf32>
    %567 = vector.extract_strided_slice %554 {offsets = [0, 256], sizes = [16, 128], strides = [1, 1]} : vector<16x512xf32> to vector<16x128xf32>
    %568 = math.tanh %567 : vector<16x128xf32>
    %569 = vector.extract_strided_slice %554 {offsets = [0, 384], sizes = [16, 128], strides = [1, 1]} : vector<16x512xf32> to vector<16x128xf32>
    %570 = arith.negf %569 : vector<16x128xf32>
    %571 = math.exp %570 : vector<16x128xf32>
    %cst_184 = arith.constant 1.000000e+00 : f32
    %572 = vector.broadcast %cst_184 : f32 to vector<16x128xf32>
    %573 = arith.addf %572, %571 : vector<16x128xf32>
    %574 = arith.divf %572, %573 : vector<16x128xf32>
    %575 = arith.mulf %566, %540 : vector<16x128xf32>
    %576 = arith.mulf %560, %568 : vector<16x128xf32>
    %577 = arith.addf %575, %576 : vector<16x128xf32>
    %578 = math.tanh %577 : vector<16x128xf32>
    %579 = arith.mulf %574, %578 : vector<16x128xf32>
    %c6_i32_185 = arith.constant 6 : i32
    %c16_i32_186 = arith.constant 16 : i32
    %580 = arith.muli %c6_i32_185, %c16_i32_186 : i32
    %581 = tpu.assume_multiple %580, 16 : i32
    %582 = arith.truncf %579 : vector<16x128xf32> to vector<16x128xbf16>
    %c0_187 = arith.constant 0 : index
    %c0_188 = arith.constant 0 : index
    %583 = vector.load %arg5[%c0_187, %c0_188] : memref<128x512xbf16, #tpu.memory_space<vmem>>, vector<128x512xbf16>
    %cst_189 = arith.constant dense<0.000000e+00> : vector<16x512xf32>
    %584 = tpu.matmul %582, %583, %cst_189 {dimension_numbers = #tpu.dot_dimension_numbers<[1], [0], [0], [1], [0, 0, 1, 1], [], []>} : vector<16x128xbf16>, vector<128x512xbf16>, vector<16x512xf32> -> vector<16x512xf32>
    %585 = arith.index_cast %581 : i32 to index
    %c0_190 = arith.constant 0 : index
    %586 = vector.load %arg10[%585, %c0_190] : memref<128x512xbf16, #tpu.memory_space<vmem>>, vector<16x512xbf16>
    %587 = arith.extf %586 : vector<16x512xbf16> to vector<16x512xf32>
    %588 = arith.addf %584, %587 : vector<16x512xf32>
    %c0_191 = arith.constant 0 : index
    %c0_192 = arith.constant 0 : index
    %589 = vector.load %arg6[%c0_191, %c0_192] : memref<1x512xf32, #tpu.memory_space<vmem>>, vector<1x512xf32>
    %590 = vector.broadcast %589 : vector<1x512xf32> to vector<16x512xf32>
    %591 = arith.addf %588, %590 : vector<16x512xf32>
    %592 = vector.extract_strided_slice %591 {offsets = [0, 0], sizes = [16, 128], strides = [1, 1]} : vector<16x512xf32> to vector<16x128xf32>
    %593 = arith.negf %592 : vector<16x128xf32>
    %594 = math.exp %593 : vector<16x128xf32>
    %cst_193 = arith.constant 1.000000e+00 : f32
    %595 = vector.broadcast %cst_193 : f32 to vector<16x128xf32>
    %596 = arith.addf %595, %594 : vector<16x128xf32>
    %597 = arith.divf %595, %596 : vector<16x128xf32>
    %598 = vector.extract_strided_slice %591 {offsets = [0, 128], sizes = [16, 128], strides = [1, 1]} : vector<16x512xf32> to vector<16x128xf32>
    %599 = arith.negf %598 : vector<16x128xf32>
    %600 = math.exp %599 : vector<16x128xf32>
    %cst_194 = arith.constant 1.000000e+00 : f32
    %601 = vector.broadcast %cst_194 : f32 to vector<16x128xf32>
    %602 = arith.addf %601, %600 : vector<16x128xf32>
    %603 = arith.divf %601, %602 : vector<16x128xf32>
    %604 = vector.extract_strided_slice %591 {offsets = [0, 256], sizes = [16, 128], strides = [1, 1]} : vector<16x512xf32> to vector<16x128xf32>
    %605 = math.tanh %604 : vector<16x128xf32>
    %606 = vector.extract_strided_slice %591 {offsets = [0, 384], sizes = [16, 128], strides = [1, 1]} : vector<16x512xf32> to vector<16x128xf32>
    %607 = arith.negf %606 : vector<16x128xf32>
    %608 = math.exp %607 : vector<16x128xf32>
    %cst_195 = arith.constant 1.000000e+00 : f32
    %609 = vector.broadcast %cst_195 : f32 to vector<16x128xf32>
    %610 = arith.addf %609, %608 : vector<16x128xf32>
    %611 = arith.divf %609, %610 : vector<16x128xf32>
    %612 = arith.mulf %603, %577 : vector<16x128xf32>
    %613 = arith.mulf %597, %605 : vector<16x128xf32>
    %614 = arith.addf %612, %613 : vector<16x128xf32>
    %615 = math.tanh %614 : vector<16x128xf32>
    %616 = arith.mulf %611, %615 : vector<16x128xf32>
    %c7_i32_196 = arith.constant 7 : i32
    %c16_i32_197 = arith.constant 16 : i32
    %617 = arith.muli %c7_i32_196, %c16_i32_197 : i32
    %618 = tpu.assume_multiple %617, 16 : i32
    %619 = arith.truncf %616 : vector<16x128xf32> to vector<16x128xbf16>
    %c0_198 = arith.constant 0 : index
    %c0_199 = arith.constant 0 : index
    %620 = vector.load %arg5[%c0_198, %c0_199] : memref<128x512xbf16, #tpu.memory_space<vmem>>, vector<128x512xbf16>
    %cst_200 = arith.constant dense<0.000000e+00> : vector<16x512xf32>
    %621 = tpu.matmul %619, %620, %cst_200 {dimension_numbers = #tpu.dot_dimension_numbers<[1], [0], [0], [1], [0, 0, 1, 1], [], []>} : vector<16x128xbf16>, vector<128x512xbf16>, vector<16x512xf32> -> vector<16x512xf32>
    %622 = arith.index_cast %618 : i32 to index
    %c0_201 = arith.constant 0 : index
    %623 = vector.load %arg10[%622, %c0_201] : memref<128x512xbf16, #tpu.memory_space<vmem>>, vector<16x512xbf16>
    %624 = arith.extf %623 : vector<16x512xbf16> to vector<16x512xf32>
    %625 = arith.addf %621, %624 : vector<16x512xf32>
    %c0_202 = arith.constant 0 : index
    %c0_203 = arith.constant 0 : index
    %626 = vector.load %arg6[%c0_202, %c0_203] : memref<1x512xf32, #tpu.memory_space<vmem>>, vector<1x512xf32>
    %627 = vector.broadcast %626 : vector<1x512xf32> to vector<16x512xf32>
    %628 = arith.addf %625, %627 : vector<16x512xf32>
    %629 = vector.extract_strided_slice %628 {offsets = [0, 0], sizes = [16, 128], strides = [1, 1]} : vector<16x512xf32> to vector<16x128xf32>
    %630 = arith.negf %629 : vector<16x128xf32>
    %631 = math.exp %630 : vector<16x128xf32>
    %cst_204 = arith.constant 1.000000e+00 : f32
    %632 = vector.broadcast %cst_204 : f32 to vector<16x128xf32>
    %633 = arith.addf %632, %631 : vector<16x128xf32>
    %634 = arith.divf %632, %633 : vector<16x128xf32>
    %635 = vector.extract_strided_slice %628 {offsets = [0, 128], sizes = [16, 128], strides = [1, 1]} : vector<16x512xf32> to vector<16x128xf32>
    %636 = arith.negf %635 : vector<16x128xf32>
    %637 = math.exp %636 : vector<16x128xf32>
    %cst_205 = arith.constant 1.000000e+00 : f32
    %638 = vector.broadcast %cst_205 : f32 to vector<16x128xf32>
    %639 = arith.addf %638, %637 : vector<16x128xf32>
    %640 = arith.divf %638, %639 : vector<16x128xf32>
    %641 = vector.extract_strided_slice %628 {offsets = [0, 256], sizes = [16, 128], strides = [1, 1]} : vector<16x512xf32> to vector<16x128xf32>
    %642 = math.tanh %641 : vector<16x128xf32>
    %643 = vector.extract_strided_slice %628 {offsets = [0, 384], sizes = [16, 128], strides = [1, 1]} : vector<16x512xf32> to vector<16x128xf32>
    %644 = arith.negf %643 : vector<16x128xf32>
    %645 = math.exp %644 : vector<16x128xf32>
    %cst_206 = arith.constant 1.000000e+00 : f32
    %646 = vector.broadcast %cst_206 : f32 to vector<16x128xf32>
    %647 = arith.addf %646, %645 : vector<16x128xf32>
    %648 = arith.divf %646, %647 : vector<16x128xf32>
    %649 = arith.mulf %640, %614 : vector<16x128xf32>
    %650 = arith.mulf %634, %642 : vector<16x128xf32>
    %651 = arith.addf %649, %650 : vector<16x128xf32>
    %652 = math.tanh %651 : vector<16x128xf32>
    %653 = arith.mulf %648, %652 : vector<16x128xf32>
    %c8_i32_207 = arith.constant 8 : i32
    %654 = arith.truncf %653 : vector<16x128xf32> to vector<16x128xbf16>
    %c0_208 = arith.constant 0 : index
    %c0_209 = arith.constant 0 : index
    %655 = vector.load %arg7[%c0_208, %c0_209] : memref<128x4xbf16, #tpu.memory_space<vmem>>, vector<128x4xbf16>
    %cst_210 = arith.constant dense<0.000000e+00> : vector<16x4xf32>
    %656 = tpu.matmul %654, %655, %cst_210 {dimension_numbers = #tpu.dot_dimension_numbers<[1], [0], [0], [1], [0, 0, 1, 1], [], []>} : vector<16x128xbf16>, vector<128x4xbf16>, vector<16x4xf32> -> vector<16x4xf32>
    %c0_211 = arith.constant 0 : index
    %c0_212 = arith.constant 0 : index
    %657 = vector.load %arg8[%c0_211, %c0_212] : memref<1x4xf32, #tpu.memory_space<vmem>>, vector<1x4xf32>
    %658 = vector.broadcast %657 : vector<1x4xf32> to vector<16x4xf32>
    %659 = arith.addf %656, %658 : vector<16x4xf32>
    %c0_213 = arith.constant 0 : index
    %c0_214 = arith.constant 0 : index
    %660 = vector.load %arg9[%c0_213, %c0_214] : memref<16x4xf32, #tpu.memory_space<vmem>>, vector<16x4xf32>
    tpu.vector_store %arg9[%c0_213, %c0_214], %659 {strides = array<i32>} : memref<16x4xf32, #tpu.memory_space<vmem>>, vector<16x4xf32>,
    return
  }
}

</mosaic_0001>

<bundles_post_ra>
// kernel: lstm_forward.1
= control target key start
LH: loop header
LB: loop body
LE: loop exit
PB: predicated region body
PF: predicated region fallthrough
CT: control target
= control target key end

     0   :  { %14 = vsyncpa [#allocation5], 0  ;;  %s8779_s0 = inlined_call_operand.vmem [shape: bf16[128,16], index: 0, kind: input, shape index: {}]   ;;  %s8780_s1 = inlined_call_operand.vmem [shape: bf16[16,512], index: 1, kind: input, shape index: {}]   ;;  %s8781_s2 = inlined_call_operand.vmem [shape: bf16[128,512], index: 2, kind: input, shape index: {}]   ;;  %s8782_s3 = inlined_call_operand.vmem [shape: f32[1,512], index: 3, kind: input, shape index: {}]   ;;  %s8783_s4 = inlined_call_operand.hbm [shape: bf16[128,512], index: 4, kind: input, shape index: {}]   ;;  %s8784_s5 = inlined_call_operand.hbm [shape: bf16[128,512], index: 5, kind: input, shape index: {}]   ;;  %s8785_s6 = inlined_call_operand.vmem [shape: f32[1,512], index: 6, kind: input, shape index: {}]   ;;  %s8786_s7 = inlined_call_operand.vmem [shape: bf16[128,4], index: 7, kind: input, shape index: {}]   ;;  %s8787_s8 = inlined_call_operand.vmem [shape: f32[1,4], index: 8, kind: input, shape index: {}]   ;;  %s8788_s9 = inlined_call_operand.vmem [shape: f32[16,4], index: 9, kind: output, shape index: {}]  }
   0x1   :  { %15 = vsyncpa [#allocation7], 0  ;;  %s6864_s30 = smov [#allocation4]   ;;  %s6816_s13 = scalar_lea.hbm %s8783_s4, 4096 }
   0x2   :  { %s29_s10 = sshll.u32 %s6864_s30, 4  ;;  %p6817_p0 = scmp.ne.s32.totalorder %s8783_s4, %s6816_s13  ;;  %s30_s10 = int_to_ptr.vmem [resolvable:$true] %s29_s10 }
   0x3   :  { %p6820_p1 = scmp.lt.u32.totalorder %s6816_s13, %s8783_s4 }
   0x5   :  { %p6822_p2 = pnand %p6820_p1, %p6817_p0 }
   0x7   :  { %6825 = shalt.err (!%p6822_p2)
}
   0x8   :  { %s6826_s18 = scalar_lea.vmem %s30_s10, 4096  ;;  %p6831_p4 = scmp.lt.s32.totalorder %s30_s10, %s30_s10 }
   0x9   :  { %p6827_p3 = scmp.ne.s32.totalorder %s30_s10, %s6826_s18  ;;  %p6832_p5 = scmp.lt.s32.totalorder %s6826_s18, %s6826_s18 }
   0xb   :  { %p6833_p6 = por %p6832_p5, %p6831_p4 }
   0xd   :  { %p6834_p7 = pnand %p6833_p6, %p6827_p3 }
   0xf   :  { %6837 = shalt.err (!%p6834_p7)
}
  0x10   :  { %s6865_s19 = smov 256   ;;  %s6866_s20 = smov 16  }
  0x11   :  { %35 = dma.hbm_to_vmem [thread:$0]  %s8783_s4, 4096, %s30_s10, [#allocation5], %s6865_s19, %s6865_s19, %s6866_s20  }
  0x12   :  { %s6867_s23 = smov [#allocation6]   ;;  %s6838_s27 = scalar_lea.hbm %s8784_s5, 4096 }
  0x13   :  { %s41_s24 = sshll.u32 %s6867_s23, 4  ;;  %p6839_p8 = scmp.ne.s32.totalorder %s8784_s5, %s6838_s27  ;;  %s42_s24 = int_to_ptr.vmem [resolvable:$true] %s41_s24 }
  0x14   :  { %p6842_p9 = scmp.lt.u32.totalorder %s6838_s27, %s8784_s5 }
  0x16   :  { %p6844_p10 = pnand %p6842_p9, %p6839_p8 }
  0x18   :  { %6847 = shalt.err (!%p6844_p10)
}
  0x19   :  { %s6848_s12 = scalar_lea.vmem %s42_s24, 4096  ;;  %p6853_p12 = scmp.lt.s32.totalorder %s42_s24, %s42_s24 }
  0x1a   :  { %p6849_p11 = scmp.ne.s32.totalorder %s42_s24, %s6848_s12  ;;  %p6854_p13 = scmp.lt.s32.totalorder %s6848_s12, %s6848_s12 }
  0x1c   :  { %p6855_p0 = por %p6854_p13, %p6853_p12 }
  0x1e   :  { %p6856_p1 = pnand %p6855_p0, %p6849_p11 }
  0x20   :  { %6859 = shalt.err (!%p6856_p1)
}
  0x21   :  { %47 = dma.hbm_to_vmem [thread:$0]  %s8784_s5, 4096, %s42_s24, [#allocation7], %s6865_s19, %s6865_s19, %s6866_s20  }
  0x22   :  { %6860 = dma.done.wait [#allocation5], 4096  }
  0x23   :  { %6861 = vsyncadd [#allocation5], 4294963200 }
  0x24   :  { %6862 = dma.done.wait [#allocation7], 4096  }
  0x25   :  { %6863 = vsyncadd [#allocation7], 4294963200  ;;  %v8789_v0 = vmov 0   ;;  %v6010_v1 = vld [vmem:[%s8780_s1 + $0x4] ss:$16 sps:$4 sm:$0xff]   ;;  %vm141_vm0 = vcmask 130048  }
  0x26   :  { %198 = vmatprep.mubr.bf16.mxu0 %v8789_v0  ;;  %258 = vmatprep.mubr.bf16.mxu1 %v8789_v0  ;;  %v6012_v2 = vld [vmem:[%s8780_s1] ss:$16 sps:$4 sm:$0xff]   ;;  %v6015_v5 = vld [vmem:[%s8780_s1 + $0x8] ss:$16 sps:$4 sm:$0xff]   ;;  %v6017_v6 = vld [vmem:[%s8780_s1 + $0xc] ss:$16 sps:$4 sm:$0xff]  }
  0x27   :  { %166 = vmatprep.subr.bf16.mxu0 %v6010_v1  ;;  %6001 = vmatprep.subr.bf16.mxu1 %v6010_v1  ;;  %v6013_v3 = vld [vmem:[%s8779_s0] sm:$0xff]   ;;  %v6959_v4 = vld [vmem:[%s8779_s0 + $0x30] sm:$0xff]   ;;  %v6018_v7 = vld [vmem:[%s8779_s0 + $0x8] sm:$0xff]   ;;  %vm6870_vm1 = vmmov 0   ;;  %vm5503_vm2 = vcmask 31744  }
  0x28   :  { %167 = vmatpush1.bf16.msra.mxu0 %v6012_v2  ;;  %6002 = vmatpush1.bf16.msra.mxu1 %v6012_v2  ;;  %v6978_v8 = vld [vmem:[%s8781_s2] ss:$16 sps:$4 sm:$0xff]   ;;  %v6983_v9 = vld [vmem:[%s8781_s2 + $0x4] ss:$16 sps:$4 sm:$0xff]   ;;  %v6988_v10 = vld [vmem:[%s8779_s0 + $0x38] sm:$0xff]  }
  0x29   :  { %279 = vmatprep.subr.bf16.mxu1 %v6017_v6  ;;  %663 = vmatprep.subr.bf16.mxu0 %v6983_v9  ;;  %v6994_v11 = vld [vmem:[%s8781_s2 + $0xc] ss:$16 sps:$4 sm:$0xff]   ;;  %v7000_v12 = vld [vmem:[%s8781_s2 + $0x24] ss:$16 sps:$4 sm:$0xff]   ;;  %v7006_v13 = vld [vmem:[%s8781_s2 + $0x20] ss:$16 sps:$4 sm:$0xff]  }
  0x2a   :  { %v7012_v14 = vld [vmem:[%s8781_s2 + $0x44] ss:$16 sps:$4 sm:$0xff]   ;;  %v7023_v15 = vld [vmem:[%s8781_s2 + $0x40] ss:$16 sps:$4 sm:$0xff]   ;;  %v7037_v18 = vld [vmem:[%s8781_s2 + $0x8] ss:$16 sps:$4 sm:$0xff]  }
  0x2b   :  { %5531 = vmatmul.mubr.msk.bf16.vlgmr.msra.gmra.mrb[0].mxu0 %vm141_vm0, %v6013_v3  ;;  %5537 = vmatmul.mubr.msk.bf16.vlgmr.msra.gmra.mrb[0].mxu1 %vm141_vm0, %v6959_v4  ;;  %v7029_v16 = vld [vmem:[%s8781_s2 + $0x64] ss:$16 sps:$4 sm:$0xff]   ;;  %v7042_v19 = vld [vmem:[%s8781_s2 + $0x2c] ss:$16 sps:$4 sm:$0xff]   ;;  %v7048_v20 = vld [vmem:[%s8781_s2 + $0x60] ss:$16 sps:$4 sm:$0xff]  }
  0x2c   :  { %208 = vmatprep.mubr.bf16.mxu0 %v8789_v0  ;;  %280 = vmatpush1.bf16.msra.mxu1 %v6015_v5  ;;  %v6020_v17 = vld [vmem:[%s8779_s0 + $0x10] sm:$0xff]   ;;  %v7063_v22 = vld [vmem:[%s8781_s2 + $0x28] ss:$16 sps:$4 sm:$0xff]   ;;  %v7070_v23 = vld [vmem:[%s8781_s2 + $0x4c] ss:$16 sps:$4 sm:$0xff]  }
  0x2d   :  { %268 = vmatprep.mubr.bf16.mxu1 %v8789_v0  ;;  %664 = vmatpush1.bf16.msra.mxu0 %v6978_v8  ;;  %v7056_v21 = vld [vmem:[%s8781_s2 + $0x84] ss:$16 sps:$4 sm:$0xff]   ;;  %v7076_v24 = vld [vmem:[%s8781_s2 + $0x80] ss:$16 sps:$4 sm:$0xff]   ;;  %v6030_v25 = vld [vmem:[%s8779_s0 + $0x18] sm:$0xff]  }
  0x2e   :  { %706 = vmatprep.subr.bf16.mxu1 %v6994_v11  ;;  %665 = vmatprep.subr.bf16.mxu0 %v7000_v12  ;;  %v7086_v26 = vld [vmem:[%s8781_s2 + $0x48] ss:$16 sps:$4 sm:$0xff]   ;;  %v7091_v27 = vld [vmem:[%s8781_s2 + $0xa0] ss:$16 sps:$4 sm:$0xff]   ;;  %v7097_v28 = vld [vmem:[%s8781_s2 + $0xa4] ss:$16 sps:$4 sm:$0xff]  }
  0x2f   :  { %v7103_v29 = vld [vmem:[%s8781_s2 + $0x6c] ss:$16 sps:$4 sm:$0xff]   ;;  %v7110_v30 = vld [vmem:[%s8781_s2 + $0xc4] ss:$16 sps:$4 sm:$0xff]   ;;  %v7117_v31 = vld [vmem:[%s8781_s2 + $0xc0] ss:$16 sps:$4 sm:$0xff]  }
  0x30   :  { %v7122_v32 = vld [vmem:[%s8781_s2 + $0x68] ss:$16 sps:$4 sm:$0xff]   ;;  %v7127_v33 = vld [vmem:[%s8781_s2 + $0x8c] ss:$16 sps:$4 sm:$0xff]   ;;  %v6040_v34 = vld [vmem:[%s8779_s0 + $0x20] sm:$0xff]  }
  0x31   :  { %666 = vmatpush1.bf16.msra.mxu0 %v7006_v13  ;;  %v7140_v35 = vld [vmem:[%s8781_s2 + $0xe4] ss:$16 sps:$4 sm:$0xff]   ;;  %v7145_v36 = vld [vmem:[%s8781_s2 + $0x88] ss:$16 sps:$4 sm:$0xff]   ;;  %v7150_v37 = vld [vmem:[%s8781_s2 + $0xe0] ss:$16 sps:$4 sm:$0xff]  }
  0x32   :  { %667 = vmatprep.subr.bf16.mxu0 %v7012_v14  ;;  %v7155_v38 = vld [vmem:[%s8781_s2 + $0xac] ss:$16 sps:$4 sm:$0xff]   ;;  %v7165_v39 = vld [vmem:[%s8781_s2 + $0xa8] ss:$16 sps:$4 sm:$0xff]  }
  0x33   :  { %5532 = vmatmul.mubr.msk.bf16.gmra.mrb[4].mxu0 %vm141_vm0, %v6018_v7  ;;  %5538 = vmatmul.mubr.msk.bf16.gmra.mrb[4].mxu1 %vm141_vm0, %v6988_v10  ;;  %v7172_v40 = vld [vmem:[%s8781_s2 + $0xcc] ss:$16 sps:$4 sm:$0xff]   ;;  %v7184_v42 = vld [vmem:[%s8781_s2 + $0xc8] ss:$16 sps:$4 sm:$0xff]  }
  0x34   :  { %218 = vmatprep.mubr.bf16.mxu0 %v8789_v0  ;;  %311 = vmatprep.mubr.bf16.mxu1 %v8789_v0  ;;  %v6050_v41 = vld [vmem:[%s8779_s0 + $0x28] sm:$0xff]  }
  0x35   :  { %668 = vmatpush1.bf16.msra.mxu0 %v7023_v15  ;;  %v7190_v43 = vld [vmem:[%s8781_s2 + $0xec] ss:$16 sps:$4 sm:$0xff]   ;;  %v7199_v44 = vld [vmem:[%s8781_s2 + $0xe8] ss:$16 sps:$4 sm:$0xff]  }
  0x36   :  { %669 = vmatprep.subr.bf16.mxu0 %v7029_v16 }
  0x39   :  { %670 = vmatpush1.bf16.msra.mxu0 %v7048_v20 }
  0x3a   :  { %671 = vmatprep.subr.bf16.mxu0 %v7056_v21 }
  0x3b   :  { %5533 = vmatmul.mubr.msk.bf16.gmra.mrb[8].mxu0 %vm141_vm0, %v6020_v17  ;;  %5539 = vmatmul.mubr.msk.bf16.vlgmr.msra.gmra.mrb[8].mxu1 %vm141_vm0, %v6013_v3 }
  0x3c   :  { %707 = vmatpush1.bf16.msra.mxu1 %v7037_v18  ;;  %228 = vmatprep.mubr.bf16.mxu0 %v8789_v0 }
  0x3d   :  { %321 = vmatprep.mubr.bf16.mxu1 %v8789_v0  ;;  %708 = vmatprep.subr.bf16.mxu1 %v7042_v19 }
  0x3e   :  { %672 = vmatpush1.bf16.msra.mxu0 %v7076_v24 }
  0x3f   :  { %673 = vmatprep.subr.bf16.mxu0 %v7097_v28 }
  0x40   :  { %709 = vmatpush1.bf16.msra.mxu1 %v7063_v22 }
  0x41   :  { %710 = vmatprep.subr.bf16.mxu1 %v7070_v23 }
  0x42   :  { %674 = vmatpush1.bf16.msra.mxu0 %v7091_v27 }
  0x43   :  { %5534 = vmatmul.mubr.msk.bf16.gmra.mrb[12].mxu0 %vm141_vm0, %v6030_v25  ;;  %5540 = vmatmul.mubr.msk.bf16.gmra.mrb[12].mxu1 %vm141_vm0, %v6018_v7 }
  0x44   :  { %238 = vmatprep.mubr.bf16.mxu0 %v8789_v0  ;;  %331 = vmatprep.mubr.bf16.mxu1 %v8789_v0 }
  0x45   :  { %711 = vmatpush1.bf16.msra.mxu1 %v7086_v26  ;;  %675 = vmatprep.subr.bf16.mxu0 %v7110_v30 }
  0x46   :  { %712 = vmatprep.subr.bf16.mxu1 %v7103_v29  ;;  %676 = vmatpush1.bf16.msra.mxu0 %v7117_v31 }
  0x47   :  { %677 = vmatprep.subr.bf16.mxu0 %v7140_v35 }
  0x49   :  { %713 = vmatpush1.bf16.msra.mxu1 %v7122_v32 }
  0x4a   :  { %714 = vmatprep.subr.bf16.mxu1 %v7127_v33  ;;  %678 = vmatpush1.bf16.msra.mxu0 %v7150_v37 }
  0x4b   :  { %5535 = vmatmul.mubr.msk.bf16.gmra.mrb[16].mxu0 %vm141_vm0, %v6040_v34  ;;  %5541 = vmatmul.mubr.msk.bf16.gmra.mrb[16].mxu1 %vm141_vm0, %v6020_v17 }
  0x4c   :  { %248 = vmatprep.mubr.bf16.mxu0 %v8789_v0  ;;  %341 = vmatprep.mubr.bf16.mxu1 %v8789_v0 }
  0x4d   :  { %715 = vmatpush1.bf16.msra.mxu1 %v7145_v36  ;;  %1036 = vmatprep.subr.bf16.mxu0 %v6983_v9 }
  0x4e   :  { %716 = vmatprep.subr.bf16.mxu1 %v7155_v38 }
  0x51   :  { %717 = vmatpush1.bf16.msra.mxu1 %v7165_v39 }
  0x52   :  { %718 = vmatprep.subr.bf16.mxu1 %v7172_v40 }
  0x53   :  { %5536 = vmatmul.mubr.msk.bf16.gmra.mrb[20].mxu0 %vm141_vm0, %v6050_v41  ;;  %5542 = vmatmul.mubr.msk.bf16.gmra.mrb[20].mxu1 %vm141_vm0, %v6030_v25 }
  0x54   :  { %351 = vmatprep.mubr.bf16.mxu1 %v8789_v0  ;;  %695 = vmatprep.mubr.bf16.mxu0 %v8789_v0 }
  0x55   :  { %719 = vmatpush1.bf16.msra.mxu1 %v7184_v42 }
  0x56   :  { %720 = vmatprep.subr.bf16.mxu1 %v7190_v43 }
  0x59   :  { %721 = vmatpush1.bf16.msra.mxu1 %v7199_v44 }
  0x5a   :  { %1079 = vmatprep.subr.bf16.mxu1 %v6994_v11 }
  0x5b   :  { %5543 = vmatmul.mubr.msk.bf16.gmra.mrb[24].mxu1 %vm141_vm0, %v6040_v34  ;;  %696 = vmatmul.mubr.bf16.vlgmr.msra.gmra.mrb[24].mxu0 %v8789_v0 }
  0x5c   :  { %361 = vmatprep.mubr.bf16.mxu1 %v8789_v0  ;;  %1037 = vmatpush1.bf16.msra.mxu0 %v6978_v8 }
  0x5d   :  { %1038 = vmatprep.subr.bf16.mxu0 %v7000_v12  ;;  %1068 = vmatprep.mubr.bf16.mxu0 %v8789_v0 }
  0x60   :  { %1039 = vmatpush1.bf16.msra.mxu0 %v7006_v13 }
  0x61   :  { %1040 = vmatprep.subr.bf16.mxu0 %v7012_v14 }
  0x63   :  { %5544 = vmatmul.mubr.msk.bf16.gmra.mrb[28].mxu1 %vm141_vm0, %v6050_v41 }
  0x64   :  { %371 = vmatprep.mubr.bf16.mxu1 %v8789_v0  ;;  %1041 = vmatpush1.bf16.msra.mxu0 %v7023_v15 }
  0x65   :  { %1042 = vmatprep.subr.bf16.mxu0 %v7029_v16 }
  0x68   :  { %1043 = vmatpush1.bf16.msra.mxu0 %v7048_v20 }
  0x69   :  { %1044 = vmatprep.subr.bf16.mxu0 %v7056_v21 }
  0x6b   :  { %5545 = vmatmul.mubr.msk.bf16.gmra.mrb[32].mxu1 %vm141_vm0, %v6959_v4 }
  0x6c   :  { %381 = vmatprep.mubr.bf16.mxu1 %v8789_v0  ;;  %1045 = vmatpush1.bf16.msra.mxu0 %v7076_v24 }
  0x6d   :  { %1046 = vmatprep.subr.bf16.mxu0 %v7097_v28 }
  0x70   :  { %1047 = vmatpush1.bf16.msra.mxu0 %v7091_v27 }
  0x71   :  { %1048 = vmatprep.subr.bf16.mxu0 %v7110_v30 }
  0x73   :  { %5546 = vmatmul.mubr.msk.bf16.gmra.mrb[36].mxu1 %vm141_vm0, %v6988_v10 }
  0x74   :  { %738 = vmatprep.mubr.bf16.mxu1 %v8789_v0  ;;  %1049 = vmatpush1.bf16.msra.mxu0 %v7117_v31 }
  0x75   :  { %1050 = vmatprep.subr.bf16.mxu0 %v7140_v35 }
  0x78   :  { %1051 = vmatpush1.bf16.msra.mxu0 %v7150_v37 }
  0x79   :  { %1410 = vmatprep.subr.bf16.mxu0 %v6983_v9 }
  0x7b   :  { %739 = vmatmul.mubr.bf16.vlgmr.msra.gmra.mrb[40].mxu1 %v8789_v0 }
  0x7c   :  { %1080 = vmatpush1.bf16.msra.mxu1 %v7037_v18  ;;  %1111 = vmatprep.mubr.bf16.mxu1 %v8789_v0 }
  0x7d   :  { %1081 = vmatprep.subr.bf16.mxu1 %v7042_v19 }
  0x80   :  { %1082 = vmatpush1.bf16.msra.mxu1 %v7063_v22 }
  0x81   :  { %1083 = vmatprep.subr.bf16.mxu1 %v7070_v23 }
  0x84   :  { %1084 = vmatpush1.bf16.msra.mxu1 %v7086_v26 }
  0x85   :  { %1085 = vmatprep.subr.bf16.mxu1 %v7103_v29 }
  0x88   :  { %1086 = vmatpush1.bf16.msra.mxu1 %v7122_v32 }
  0x89   :  { %1087 = vmatprep.subr.bf16.mxu1 %v7127_v33 }
  0x8c   :  { %1088 = vmatpush1.bf16.msra.mxu1 %v7145_v36 }
  0x8d   :  { %1089 = vmatprep.subr.bf16.mxu1 %v7155_v38 }
  0x90   :  { %1090 = vmatpush1.bf16.msra.mxu1 %v7165_v39 }
  0x91   :  { %1091 = vmatprep.subr.bf16.mxu1 %v7172_v40 }
  0x94   :  { %1092 = vmatpush1.bf16.msra.mxu1 %v7184_v42 }
  0x95   :  { %1093 = vmatprep.subr.bf16.mxu1 %v7190_v43 }
  0x98   :  { %1094 = vmatpush1.bf16.msra.mxu1 %v7199_v44 }
  0x99   :  { %1453 = vmatprep.subr.bf16.mxu1 %v6994_v11 }
  0xfe   :  { %v260_v45 = vpop.f32.mrb[0].mxu1  ;;  %v200_v46 = vpop.f32.mrb[0].mxu0 }
  0xff   :  { %v262_v47 = vpop.f32.mrb[1].mxu1  ;;  %v202_v48 = vpop.f32.mrb[1].mxu0 }
 0x100   :  { %v264_v49 = vpop.f32.mrb[2].mxu1  ;;  %v204_v50 = vpop.f32.mrb[2].mxu0 }
 0x101   :  { %v7253_v51 = vpack.c.bf16 %v264_v49, %v260_v45  ;;  %v266_v52 = vpop.f32.mrb[3].mxu1  ;;  %v7255_v53 = vpack.c.bf16 %v204_v50, %v200_v46  ;;  %v206_v54 = vpop.f32.mrb[3].mxu0 }
 0x102   :  { %v7257_v55 = vpack.c.bf16 %v266_v52, %v262_v47  ;;  %v7259_v56 = vpack.c.bf16 %v206_v54, %v202_v48 }
 0x103   :  { %8879 = vst [vmem:[#allocation10_spill] sm:$0xff] %v7253_v51 }
 0x104   :  { %8880 = vst [vmem:[#allocation11_spill] sm:$0xff] %v7257_v55  ;;  %v496_v51 = vunpack.c.l.bf16 %v7259_v56 }
 0x106   :  { %v270_v57 = vpop.f32.mrb[4].mxu1  ;;  %v210_v58 = vpop.f32.mrb[4].mxu0 }
 0x107   :  { %v272_v59 = vpop.f32.mrb[5].mxu1  ;;  %v212_v60 = vpop.f32.mrb[5].mxu0 }
 0x108   :  { %v274_v61 = vpop.f32.mrb[6].mxu1  ;;  %v214_v62 = vpop.f32.mrb[6].mxu0 }
 0x109   :  { %v7261_v63 = vpack.c.bf16 %v274_v61, %v270_v57  ;;  %v276_v1 = vpop.f32.mrb[7].mxu1  ;;  %v7263_v2 = vpack.c.bf16 %v214_v62, %v210_v58  ;;  %v216_v3 = vpop.f32.mrb[7].mxu0 }
 0x10a   :  { %v7265_v4 = vpack.c.bf16 %v276_v1, %v272_v59  ;;  %v7267_v5 = vpack.c.bf16 %v216_v3, %v212_v60 }
 0x10b   :  { %8881 = vst [vmem:[#allocation12_spill] sm:$0xff] %v7261_v63 }
 0x10c   :  { %8882 = vst [vmem:[#allocation13_spill] sm:$0xff] %v7265_v4 }
 0x10e   :  { %v313_v6 = vpop.f32.mrb[8].mxu1  ;;  %v220_v7 = vpop.f32.mrb[8].mxu0 }
 0x10f   :  { %v315_v9 = vpop.f32.mrb[9].mxu1  ;;  %v222_v10 = vpop.f32.mrb[9].mxu0 }
 0x110   :  { %v317_v11 = vpop.f32.mrb[10].mxu1  ;;  %v224_v17 = vpop.f32.mrb[10].mxu0 }
 0x111   :  { %v7269_v25 = vpack.c.bf16 %v317_v11, %v313_v6  ;;  %v319_v34 = vpop.f32.mrb[11].mxu1  ;;  %v7271_v41 = vpack.c.bf16 %v224_v17, %v220_v7  ;;  %v226_v45 = vpop.f32.mrb[11].mxu0 }
 0x112   :  { %v7273_v46 = vpack.c.bf16 %v319_v34, %v315_v9  ;;  %v7275_v47 = vpack.c.bf16 %v226_v45, %v222_v10 }
 0x113   :  { %8883 = vst [vmem:[#allocation14_spill] sm:$0xff] %v7271_v41 }
 0x114   :  { %8884 = vst [vmem:[#allocation15_spill] sm:$0xff] %v7275_v47 }
 0x116   :  { %v323_v48 = vpop.f32.mrb[12].mxu1  ;;  %v230_v49 = vpop.f32.mrb[12].mxu0 }
 0x117   :  { %v325_v50 = vpop.f32.mrb[13].mxu1  ;;  %v232_v52 = vpop.f32.mrb[13].mxu0 }
 0x118   :  { %v327_v54 = vpop.f32.mrb[14].mxu1  ;;  %v234_v57 = vpop.f32.mrb[14].mxu0 }
 0x119   :  { %v7277_v58 = vpack.c.bf16 %v327_v54, %v323_v48  ;;  %v329_v59 = vpop.f32.mrb[15].mxu1  ;;  %v7279_v60 = vpack.c.bf16 %v234_v57, %v230_v49  ;;  %v236_v61 = vpop.f32.mrb[15].mxu0 }
 0x11a   :  { %v7281_v62 = vpack.c.bf16 %v329_v59, %v325_v50  ;;  %v7283_v1 = vpack.c.bf16 %v236_v61, %v232_v52  ;;  %v751_v61 = vlaneseq }
 0x11b   :  { %8885 = vst [vmem:[#allocation16_spill] sm:$0xff] %v7279_v60 }
 0x11c   :  { %8886 = vst [vmem:[#allocation17_spill] sm:$0xff] %v7283_v1 }
 0x11e   :  { %v333_v3 = vpop.f32.mrb[16].mxu1  ;;  %v240_v6 = vpop.f32.mrb[16].mxu0 }
 0x11f   :  { %v335_v7 = vpop.f32.mrb[17].mxu1  ;;  %v242_v9 = vpop.f32.mrb[17].mxu0 }
 0x120   :  { %v337_v10 = vpop.f32.mrb[18].mxu1  ;;  %v244_v11 = vpop.f32.mrb[18].mxu0 }
 0x121   :  { %v7285_v17 = vpack.c.bf16 %v337_v10, %v333_v3  ;;  %v339_v34 = vpop.f32.mrb[19].mxu1  ;;  %v7287_v45 = vpack.c.bf16 %v244_v11, %v240_v6  ;;  %v246_v48 = vpop.f32.mrb[19].mxu0 }
 0x122   :  { %v7289_v54 = vpack.c.bf16 %v339_v34, %v335_v7  ;;  %v7291_v49 = vpack.c.bf16 %v246_v48, %v242_v9  ;;  %v752_v7 = vshrl.u32 %v751_v61, 7  ;;  %v495_v9 = vunpack.c.l.bf16 %v7255_v53 }
 0x123   :  { %8887 = vst [vmem:[#allocation18_spill] sm:$0xff] %v7285_v17  ;;  %8888 = vst [vmem:[#allocation19_spill] sm:$0xff] %v7287_v45 }
 0x124   :  { %8889 = vst [vmem:[#allocation20_spill] sm:$0xff] %v7289_v54  ;;  %8890 = vst [vmem:[#allocation21_spill] sm:$0xff] %v7291_v49  ;;  %v7303_v45 = vsub.s32 0, %v752_v7 }
 0x126   :  { %v343_v50 = vpop.f32.mrb[20].mxu1  ;;  %v250_v57 = vpop.f32.mrb[20].mxu0  ;;  %8895 = vst [vmem:[#allocation26_spill] sm:$0xff] %v7303_v45 }
 0x127   :  { %v345_v52 = vpop.f32.mrb[21].mxu1  ;;  %v252_v59 = vpop.f32.mrb[21].mxu0 }
 0x128   :  { %v347_v0 = vpop.f32.mrb[22].mxu1  ;;  %v254_v4 = vpop.f32.mrb[22].mxu0 }
 0x129   :  { %v7293_v63 = vpack.c.bf16 %v347_v0, %v343_v50  ;;  %v349_v55 = vpop.f32.mrb[23].mxu1  ;;  %v7295_v3 = vpack.c.bf16 %v254_v4, %v250_v57  ;;  %v256_v10 = vpop.f32.mrb[23].mxu0  ;;  %v499_v4 = vunpack.c.h.bf16 %v7255_v53 }
 0x12a   :  { %v7297_v6 = vpack.c.bf16 %v349_v55, %v345_v52  ;;  %v7299_v11 = vpack.c.bf16 %v256_v10, %v252_v59  ;;  %v749_v55 = vld [vmem:[%s8782_s3] sm:$0xf]  ;;  %v7309_v52 = vsub.s32 1, %v752_v7  ;;  %v500_v10 = vunpack.c.h.bf16 %v7259_v56 }
 0x12b   :  { %8891 = vst [vmem:[#allocation22_spill] sm:$0xff] %v7293_v63  ;;  %8892 = vst [vmem:[#allocation23_spill] sm:$0xff] %v7295_v3  ;;  %v754_v53 = vrot.slane %v749_v55, %v7303_v45 }
 0x12c   :  { %8893 = vst [vmem:[#allocation24_spill] sm:$0xff] %v7297_v6  ;;  %8894 = vst [vmem:[#allocation25_spill] sm:$0xff] %v7299_v11  ;;  %v758_v63 = vrot.slane %v749_v55, %v7309_v52 }
 0x12d   :  { %8896 = vst [vmem:[#allocation27_spill] sm:$0xff] %v7309_v52 }
 0x12e   :  { %v353_v34 = vpop.f32.mrb[24].mxu1  ;;  %v697_v48 = vpop.f32.mrb[24].mxu0 }
 0x12f   :  { %v698_v49 = vadd.f32 %v697_v48, %v495_v9  ;;  %v355_v0 = vpop.f32.mrb[25].mxu1  ;;  %v699_v50 = vpop.f32.mrb[25].mxu0 }
 0x130   :  { %v700_v57 = vadd.f32 %v699_v50, %v496_v51  ;;  %v357_v59 = vpop.f32.mrb[26].mxu1  ;;  %v701_v61 = vpop.f32.mrb[26].mxu0 }
 0x131   :  { %v7312_v11 = vpack.c.bf16 %v357_v59, %v353_v34  ;;  %v702_v9 = vadd.f32 %v701_v61, %v499_v4  ;;  %v359_v48 = vpop.f32.mrb[27].mxu1  ;;  %v703_v3 = vpop.f32.mrb[27].mxu0  ;;  %v771_v51 = vadd.f32 %v754_v53, %v698_v49 }
 0x132   :  { %v7314_v6 = vpack.c.bf16 %v359_v48, %v355_v0  ;;  %v704_v1 = vadd.f32 %v703_v3, %v500_v10  ;;  %v772_v54 = vadd.f32 %v758_v63, %v700_v57 }
 0x133   :  { %8897 = vst [vmem:[#allocation28_spill] sm:$0xff] %v7312_v11  ;;  %v5579_v4 = vmul.f32 -1.442695, %v771_v51  ;;  %v775_v59 = vadd.f32 %v754_v53, %v702_v9 }
 0x134   :  { %8898 = vst [vmem:[#allocation29_spill] sm:$0xff] %v7314_v6  ;;  %v776_v17 = vadd.f32 %v758_v63, %v704_v1  ;;  %v5581_v0 = vmul.f32 -1.442695, %v772_v54  ;;  %v7328_v54 = vsub.s32 2, %v752_v7 }
 0x135   :  { %6272 = vpow2.f32 %v5579_v4  ;;  %v5580_v10 = vmul.f32 -1.442695, %v775_v59 }
 0x136   :  { %v363_v60 = vpop.f32.mrb[28].mxu1  ;;  %v5582_v61 = vmul.f32 -1.442695, %v776_v17  ;;  %6274 = vpow2.f32 %v5581_v0 }
 0x137   :  { %v365_v50 = vpop.f32.mrb[29].mxu1 }
 0x138   :  { %v367_v47 = vpop.f32.mrb[30].mxu1  ;;  %6276 = vpow2.f32 %v5582_v61  ;;  %v497_v61 = vunpack.c.l.bf16 %v7269_v25 }
 0x139   :  { %v7318_v41 = vpack.c.bf16 %v367_v47, %v363_v60  ;;  %v369_v56 = vpop.f32.mrb[31].mxu1  ;;  %6278 = vpow2.f32 %v5580_v10 }
 0x13a   :  { %v7320_v34 = vpack.c.bf16 %v369_v56, %v365_v50  ;;  %v7332_v56 = vsub.s32 3, %v752_v7 }
 0x13b   :  { %8899 = vst [vmem:[#allocation30_spill] sm:$0xff] %v7318_v41 }
 0x13c   :  { %8900 = vst [vmem:[#allocation31_spill] sm:$0xff] %v7320_v34 }
 0x13e   :  { %v373_v3 = vpop.f32.mrb[32].mxu1 }
 0x13f   :  { %v375_v48 = vpop.f32.mrb[33].mxu1  ;;  %v6273_v51 = vpop.eup %6272 }
 0x140   :  { %v377_v6 = vpop.f32.mrb[34].mxu1  ;;  %v6275_v53 = vpop.eup %6274  ;;  %v785_v4 = vadd.f32 1.0, %v6273_v51 }
 0x141   :  { %v7322_v49 = vpack.c.bf16 %v377_v6, %v373_v3  ;;  %v379_v57 = vpop.f32.mrb[35].mxu1  ;;  %v797_v0 = vadd.f32 1.0, %v6275_v53  ;;  %v762_v3 = vrot.slane %v749_v55, %v7328_v54  ;;  %v502_v53 = vunpack.c.h.bf16 %v7273_v46 }
 0x142   :  { %v7324_v63 = vpack.c.bf16 %v379_v57, %v375_v48  ;;  %v6277_v6 = vpop.eup %6276  ;;  %v498_v57 = vunpack.c.l.bf16 %v7273_v46  ;;  %6280 = vrcp.f32 %v785_v4 }
 0x143   :  { %8901 = vst [vmem:[#allocation32_spill] sm:$0xff] %v7322_v49  ;;  %v6279_v59 = vpop.eup %6278  ;;  %v798_v10 = vadd.f32 1.0, %v6277_v6  ;;  %6282 = vrcp.f32 %v797_v0 }
 0x144   :  { %8902 = vst [vmem:[#allocation33_spill] sm:$0xff] %v7324_v63  ;;  %v786_v7 = vadd.f32 1.0, %v6279_v59 }
 0x145   :  { %6284 = vrcp.f32 %v798_v10 }
 0x146   :  { %v383_v47 = vpop.f32.mrb[36].mxu1 }
 0x147   :  { %v385_v60 = vpop.f32.mrb[37].mxu1 }
 0x148   :  { %v387_v1 = vpop.f32.mrb[38].mxu1 }
 0x149   :  { %v7326_v9 = vpack.c.bf16 %v387_v1, %v383_v47  ;;  %v389_v17 = vpop.f32.mrb[39].mxu1  ;;  %v766_v47 = vrot.slane %v749_v55, %v7332_v56 }
 0x14a   :  { %v7330_v50 = vpack.c.bf16 %v389_v17, %v385_v60  ;;  %v501_v60 = vunpack.c.h.bf16 %v7269_v25 }
 0x14b   :  { %8903 = vst [vmem:[#allocation34_spill] sm:$0xff] %v7326_v9 }
 0x14c   :  { %8904 = vst [vmem:[#allocation35_spill] sm:$0xff] %v7330_v50 }
 0x14e   :  { %v740_v48 = vpop.f32.mrb[40].mxu1 }
 0x14f   :  { %v741_v1 = vadd.f32 %v740_v48, %v497_v61  ;;  %v742_v9 = vpop.f32.mrb[41].mxu1 }
 0x150   :  { %v743_v17 = vadd.f32 %v742_v9, %v498_v57  ;;  %v744_v51 = vpop.f32.mrb[42].mxu1  ;;  %v6281_v9 = vpop.eup %6280 }
 0x151   :  { %v773_v50 = vadd.f32 %v762_v3, %v741_v1  ;;  %v745_v63 = vadd.f32 %v744_v51, %v501_v60  ;;  %v746_v49 = vpop.f32.mrb[43].mxu1  ;;  %v6283_v4 = vpop.eup %6282 }
 0x152   :  { %v774_v6 = vadd.f32 %v766_v47, %v743_v17  ;;  %v747_v34 = vadd.f32 %v746_v49, %v502_v53  ;;  %v6285_v59 = vpop.eup %6284  ;;  %v817_v48 = vmul.f32 0.0, %v6283_v4 }
 0x153   :  { %6286 = vtanh.f32 %v773_v50  ;;  %v777_v41 = vadd.f32 %v762_v3, %v745_v63  ;;  %v818_v60 = vmul.f32 0.0, %v6285_v59 }
 0x154   :  { %6288 = vrcp.f32 %v786_v7  ;;  %v5583_v55 = vmul.f32 -1.442695, %v774_v6  ;;  %v778_v61 = vadd.f32 %v766_v47, %v747_v34 }
 0x155   :  { %6290 = vtanh.f32 %v777_v41 }
 0x156   :  { %6292 = vpow2.f32 %v5583_v55  ;;  %v5584_v25 = vmul.f32 -1.442695, %v778_v61  ;;  %v8906_v61 = vmov 0  }
 0x158   :  { %6294 = vpow2.f32 %v5584_v25 }
 0x15d   :  { %v6287_v46 = vpop.eup %6286 }
 0x15e   :  { %v6289_v0 = vpop.eup %6288  ;;  %v819_v57 = vmul.f32 %v6287_v46, %v6281_v9 }
 0x15f   :  { %v6291_v1 = vpop.eup %6290 }
 0x160   :  { %v6293_v10 = vpop.eup %6292  ;;  %v7340_v49 = vadd.f32 %v819_v57, %v817_v48  ;;  %v820_v63 = vmul.f32 %v6291_v1, %v6289_v0 }
 0x161   :  { %v811_v50 = vadd.f32 1.0, %v6293_v10 }
 0x162   :  { %v6295_v3 = vpop.eup %6294  ;;  %6296 = vtanh.f32 %v7340_v49  ;;  %v7343_v41 = vadd.f32 %v820_v63, %v818_v60 }
 0x163   :  { %6298 = vrcp.f32 %v811_v50  ;;  %v812_v34 = vadd.f32 1.0, %v6295_v3 }
 0x164   :  { %6300 = vtanh.f32 %v7343_v41 }
 0x165   :  { %6302 = vrcp.f32 %v812_v34 }
 0x16c   :  { %v6297_v47 = vpop.eup %6296 }
 0x16d   :  { %v6299_v7 = vpop.eup %6298 }
 0x16e   :  { %v6301_v17 = vpop.eup %6300  ;;  %v825_v53 = vmul.f32 %v6299_v7, %v6297_v47 }
 0x16f   :  { %v6303_v51 = vpop.eup %6302 }
 0x170   :  { %v826_v6 = vmul.f32 %v6303_v51, %v6301_v17 }
 0x172   :  { %v7346_v55 = vpack.c.bf16 %v826_v6, %v825_v53 }
 0x174   :  { %8905 = vst [vmem:[#allocation36_spill] sm:$0xff] %v7346_v55  ;;  %1069 = vmatmul.mubr.bf16.vlgmr.msra.gmra.mrb[28].mxu0 %v7346_v55  ;;  %1112 = vmatmul.mubr.bf16.vlgmr.msra.gmra.mrb[44].mxu1 %v7346_v55 }
 0x175   :  { %1411 = vmatpush1.bf16.msra.mxu0 %v6978_v8  ;;  %1454 = vmatpush1.bf16.msra.mxu1 %v7037_v18  ;;  %v1122_v8 = vld [vmem:[%s8782_s3] sm:$0xf]  ;;  %v869_v18 = vunpack.c.l.bf16 %v7267_v5 }
 0x176   :  { %1412 = vmatprep.subr.bf16.mxu0 %v7000_v12  ;;  %1455 = vmatprep.subr.bf16.mxu1 %v7042_v19  ;;  %v868_v12 = vunpack.c.l.bf16 %v7263_v2  ;;  %v1131_v19 = vrot.slane %v1122_v8, %v7309_v52 }
 0x177   :  { %1442 = vmatprep.mubr.bf16.mxu0 %v8906_v61  ;;  %1485 = vmatprep.mubr.bf16.mxu1 %v8906_v61 }
 0x179   :  { %1413 = vmatpush1.bf16.msra.mxu0 %v7006_v13  ;;  %1456 = vmatpush1.bf16.msra.mxu1 %v7063_v22  ;;  %v1127_v13 = vrot.slane %v1122_v8, %v7303_v45 }
 0x17a   :  { %1414 = vmatprep.subr.bf16.mxu0 %v7012_v14  ;;  %1457 = vmatprep.subr.bf16.mxu1 %v7070_v23  ;;  %v870_v14 = vunpack.c.l.bf16 %v7277_v58 }
 0x17d   :  { %1415 = vmatpush1.bf16.msra.mxu0 %v7023_v15  ;;  %1458 = vmatpush1.bf16.msra.mxu1 %v7086_v26  ;;  %v872_v26 = vunpack.c.h.bf16 %v7263_v2 }
 0x17e   :  { %1416 = vmatprep.subr.bf16.mxu0 %v7029_v16  ;;  %1459 = vmatprep.subr.bf16.mxu1 %v7103_v29 }
 0x181   :  { %1417 = vmatpush1.bf16.msra.mxu0 %v7048_v20  ;;  %1460 = vmatpush1.bf16.msra.mxu1 %v7122_v32  ;;  %v871_v20 = vunpack.c.l.bf16 %v7281_v62  ;;  %v873_v32 = vunpack.c.h.bf16 %v7267_v5 }
 0x182   :  { %1418 = vmatprep.subr.bf16.mxu0 %v7056_v21  ;;  %1461 = vmatprep.subr.bf16.mxu1 %v7127_v33  ;;  %v875_v33 = vunpack.c.h.bf16 %v7281_v62  ;;  %v1135_v62 = vrot.slane %v1122_v8, %v7328_v54 }
 0x185   :  { %1419 = vmatpush1.bf16.msra.mxu0 %v7076_v24  ;;  %1462 = vmatpush1.bf16.msra.mxu1 %v7145_v36 }
 0x186   :  { %1420 = vmatprep.subr.bf16.mxu0 %v7097_v28  ;;  %1463 = vmatprep.subr.bf16.mxu1 %v7155_v38 }
 0x189   :  { %1421 = vmatpush1.bf16.msra.mxu0 %v7091_v27  ;;  %1464 = vmatpush1.bf16.msra.mxu1 %v7165_v39  ;;  %v874_v27 = vunpack.c.h.bf16 %v7277_v58  ;;  %v1139_v58 = vrot.slane %v1122_v8, %v7332_v56 }
 0x18a   :  { %1422 = vmatprep.subr.bf16.mxu0 %v7110_v30  ;;  %1465 = vmatprep.subr.bf16.mxu1 %v7172_v40 }
 0x18d   :  { %1423 = vmatpush1.bf16.msra.mxu0 %v7117_v31  ;;  %1466 = vmatpush1.bf16.msra.mxu1 %v7184_v42 }
 0x18e   :  { %1424 = vmatprep.subr.bf16.mxu0 %v7140_v35  ;;  %1467 = vmatprep.subr.bf16.mxu1 %v7190_v43 }
 0x191   :  { %1425 = vmatpush1.bf16.msra.mxu0 %v7150_v37  ;;  %1468 = vmatpush1.bf16.msra.mxu1 %v7199_v44 }
 0x247   :  { %v1070_v15 = vpop.f32.mrb[28].mxu0  ;;  %v1113_v16 = vpop.f32.mrb[44].mxu1 }
 0x248   :  { %v1071_v21 = vadd.f32 %v1070_v15, %v868_v12  ;;  %v1114_v22 = vadd.f32 %v1113_v16, %v870_v14  ;;  %v1072_v23 = vpop.f32.mrb[29].mxu0  ;;  %v1115_v24 = vpop.f32.mrb[45].mxu1 }
 0x249   :  { %v1073_v28 = vadd.f32 %v1072_v23, %v869_v18  ;;  %v1116_v29 = vadd.f32 %v1115_v24, %v871_v20  ;;  %v1074_v30 = vpop.f32.mrb[30].mxu0  ;;  %v1117_v31 = vpop.f32.mrb[46].mxu1 }
 0x24a   :  { %v1144_v35 = vadd.f32 %v1127_v13, %v1071_v21  ;;  %v1075_v36 = vadd.f32 %v1074_v30, %v872_v26  ;;  %v1118_v37 = vadd.f32 %v1117_v31, %v874_v27  ;;  %v1076_v38 = vpop.f32.mrb[31].mxu0  ;;  %v1119_v39 = vpop.f32.mrb[47].mxu1  ;;  %v1146_v46 = vadd.f32 %v1135_v62, %v1114_v22  ;;  %v7419_v31 = vld [vmem:[%s8781_s2 + $0xc] ss:$16 sps:$4 sm:$0xff]  }
 0x24b   :  { %v1145_v40 = vadd.f32 %v1131_v19, %v1073_v28  ;;  %v1077_v42 = vadd.f32 %v1076_v38, %v873_v32  ;;  %v1120_v43 = vadd.f32 %v1119_v39, %v875_v33  ;;  %v1147_v59 = vadd.f32 %v1139_v58, %v1116_v29  ;;  %8909 = vst [vmem:[#allocation39_spill] sm:$0xff] %v7419_v31  ;;  %v7424_v32 = vld [vmem:[%s8781_s2] ss:$16 sps:$4 sm:$0xff]   ;;  %v7429_v33 = vld [vmem:[%s8781_s2 + $0x8] ss:$16 sps:$4 sm:$0xff]  }
 0x24c   :  { %v5617_v44 = vmul.f32 -1.442695, %v1144_v35  ;;  %v1148_v2 = vadd.f32 %v1127_v13, %v1075_v36  ;;  %v1150_v57 = vadd.f32 %v1135_v62, %v1118_v37  ;;  %1827 = vmatprep.subr.bf16.mxu1 %v7419_v31  ;;  %v7438_v35 = vld [vmem:[%s8781_s2 + $0x24] ss:$16 sps:$4 sm:$0xff]   ;;  %v7443_v36 = vld [vmem:[%s8781_s2 + $0x2c] ss:$16 sps:$4 sm:$0xff]  }
 0x24d   :  { %v5619_v25 = vmul.f32 -1.442695, %v1145_v40  ;;  %v1149_v9 = vadd.f32 %v1131_v19, %v1077_v42  ;;  %v5621_v0 = vmul.f32 -1.442695, %v1147_v59  ;;  %v1151_v48 = vadd.f32 %v1139_v58, %v1120_v43  ;;  %v7448_v37 = vld [vmem:[%s8781_s2 + $0x20] ss:$16 sps:$4 sm:$0xff]  }
 0x24e   :  { %6304 = vpow2.f32 %v5617_v44  ;;  %v5618_v4 = vmul.f32 -1.442695, %v1148_v2  ;;  %v7453_v38 = vld [vmem:[%s8781_s2 + $0x28] ss:$16 sps:$4 sm:$0xff]   ;;  %v7462_v39 = vld [vmem:[%s8781_s2 + $0x44] ss:$16 sps:$4 sm:$0xff]  }
 0x24f   :  { %6306 = vpow2.f32 %v5619_v25  ;;  %v5620_v5 = vmul.f32 -1.442695, %v1149_v9  ;;  %v5622_v63 = vmul.f32 -1.442695, %v1151_v48  ;;  %v7467_v40 = vld [vmem:[%s8781_s2 + $0x4c] ss:$16 sps:$4 sm:$0xff]  }
 0x250   :  { %6308 = vpow2.f32 %v5618_v4  ;;  %v7472_v42 = vld [vmem:[%s8781_s2 + $0x40] ss:$16 sps:$4 sm:$0xff]   ;;  %v7477_v43 = vld [vmem:[%s8781_s2 + $0x48] ss:$16 sps:$4 sm:$0xff]   ;;  %v7486_v44 = vld [vmem:[%s8781_s2 + $0x64] ss:$16 sps:$4 sm:$0xff]  }
 0x251   :  { %6310 = vpow2.f32 %v5620_v5  ;;  %v7491_v2 = vld [vmem:[%s8781_s2 + $0x6c] ss:$16 sps:$4 sm:$0xff]   ;;  %v7496_v25 = vld [vmem:[%s8781_s2 + $0x60] ss:$16 sps:$4 sm:$0xff]   ;;  %v7501_v58 = vld [vmem:[%s8781_s2 + $0x68] ss:$16 sps:$4 sm:$0xff]  }
 0x252   :  { %6312 = vtanh.f32 %v1146_v46  ;;  %v7510_v9 = vld [vmem:[%s8781_s2 + $0x80] ss:$16 sps:$4 sm:$0xff]   ;;  %v7515_v4 = vld [vmem:[%s8781_s2 + $0x84] ss:$16 sps:$4 sm:$0xff]   ;;  %v7520_v5 = vld [vmem:[%s8781_s2 + $0x88] ss:$16 sps:$4 sm:$0xff]  }
 0x253   :  { %6314 = vpow2.f32 %v5621_v0  ;;  %v7525_v62 = vld [vmem:[%s8781_s2 + $0x8c] ss:$16 sps:$4 sm:$0xff]   ;;  %v7530_v59 = vld [vmem:[%s8781_s2 + $0xa4] ss:$16 sps:$4 sm:$0xff]   ;;  %v7544_v0 = vld [vmem:[%s8781_s2 + $0xa0] ss:$16 sps:$4 sm:$0xff]  }
 0x254   :  { %6316 = vtanh.f32 %v1150_v57  ;;  %v7536_v46 = vld [vmem:[%s8781_s2 + $0xac] ss:$16 sps:$4 sm:$0xff]   ;;  %v7549_v48 = vld [vmem:[%s8781_s2 + $0xa8] ss:$16 sps:$4 sm:$0xff]   ;;  %v7556_v57 = vld [vmem:[%s8781_s2 + $0xc4] ss:$16 sps:$4 sm:$0xff]  }
 0x258   :  { %v6305_v1 = vpop.eup %6304 }
 0x259   :  { %v6307_v10 = vpop.eup %6306  ;;  %v1158_v60 = vadd.f32 1.0, %v6305_v1  ;;  %v7561_v1 = vld [vmem:[%s8781_s2 + $0xcc] ss:$16 sps:$4 sm:$0xff]  }
 0x25a   :  { %v1170_v50 = vadd.f32 1.0, %v6307_v10  ;;  %v6309_v3 = vpop.eup %6308  ;;  %v7568_v10 = vld [vmem:[%s8781_s2 + $0xc0] ss:$16 sps:$4 sm:$0xff]  }
 0x25b   :  { %6318 = vrcp.f32 %v1158_v60  ;;  %v1159_v34 = vadd.f32 1.0, %v6309_v3  ;;  %v6311_v47 = vpop.eup %6310  ;;  %v7573_v60 = vld [vmem:[%s8781_s2 + $0xc8] ss:$16 sps:$4 sm:$0xff]   ;;  %v7592_v3 = vld [vmem:[%s8781_s2 + $0xe0] ss:$16 sps:$4 sm:$0xff]  }
 0x25c   :  { %6320 = vrcp.f32 %v1170_v50  ;;  %v1171_v7 = vadd.f32 1.0, %v6311_v47  ;;  %v6313_v17 = vpop.eup %6312  ;;  %v7585_v50 = vld [vmem:[%s8781_s2 + $0xec] ss:$16 sps:$4 sm:$0xff]   ;;  %8910 = vst [vmem:[#allocation40_spill] sm:$0xff] %v7592_v3  ;;  %v1496_v47 = vld [vmem:[%s8782_s3] sm:$0xf] }
 0x25d   :  { %6322 = vpow2.f32 %v5622_v63  ;;  %v6315_v51 = vpop.eup %6314  ;;  %v7580_v63 = vld [vmem:[%s8781_s2 + $0xe4] ss:$16 sps:$4 sm:$0xff]  }
 0x25e   :  { %6324 = vrcp.f32 %v1159_v34  ;;  %v6317_v53 = vpop.eup %6316  ;;  %v1184_v16 = vadd.f32 1.0, %v6315_v51  ;;  %v7597_v34 = vld [vmem:[%s8781_s2 + $0xe8] ss:$16 sps:$4 sm:$0xff]   ;;  %v1501_v51 = vrot.slane %v1496_v47, %v7303_v45 }
 0x25f   :  { %6326 = vrcp.f32 %v1171_v7  ;;  %8911 = vst [vmem:[#allocation41_spill] sm:$0xff] %v7597_v34  ;;  %v8912_v7 = vld [vmem:[#allocation14_spill] sm:$0xff] }
 0x260   :  { %6328 = vrcp.f32 %v1184_v16  ;;  %v8915_v16 = vld [vmem:[#allocation20_spill] sm:$0xff] }
 0x261   :  { %v1249_v11 = vunpack.c.h.bf16 %v8915_v16 }
 0x265   :  { %v6319_v6 = vpop.eup %6318 }
 0x266   :  { %v6321_v8 = vpop.eup %6320  ;;  %v1192_v12 = vmul.f32 %v6319_v6, %v6313_v17  ;;  %v1242_v17 = vunpack.c.l.bf16 %v8912_v7 }
 0x267   :  { %v6323_v13 = vpop.eup %6322  ;;  %v1190_v14 = vmul.f32 %v6321_v8, %v7340_v49 }
 0x268   :  { %v6325_v15 = vpop.eup %6324  ;;  %v1185_v21 = vadd.f32 1.0, %v6323_v13  ;;  %v8914_v13 = vld [vmem:[#allocation15_spill] sm:$0xff] }
 0x269   :  { %v7398_v18 = vadd.f32 %v1192_v12, %v1190_v14  ;;  %v1193_v19 = vmul.f32 %v6325_v15, %v6317_v53  ;;  %v6327_v20 = vpop.eup %6326  ;;  %v8913_v53 = vld [vmem:[#allocation18_spill] sm:$0xff]  ;;  %v1243_v14 = vunpack.c.l.bf16 %v8914_v13  ;;  %v1505_v15 = vrot.slane %v1496_v47, %v7309_v52 }
 0x26a   :  { %v1191_v22 = vmul.f32 %v6327_v20, %v7343_v41  ;;  %v6329_v24 = vpop.eup %6328  ;;  %v7414_v41 = vld [vmem:[%s8781_s2 + $0x4] ss:$16 sps:$4 sm:$0xff]   ;;  %v1244_v6 = vunpack.c.l.bf16 %v8913_v53  ;;  %v1247_v55 = vunpack.c.h.bf16 %v8914_v13 }
 0x26b   :  { %6330 = vtanh.f32 %v7398_v18  ;;  %8908 = vst [vmem:[#allocation38_spill] sm:$0xff] %v7414_v41  ;;  %1784 = vmatprep.subr.bf16.mxu0 %v7414_v41 }
 0x26c   :  { %v7401_v23 = vadd.f32 %v1193_v19, %v1191_v22  ;;  %6332 = vrcp.f32 %v1185_v21  ;;  %v1245_v19 = vunpack.c.l.bf16 %v8915_v16  ;;  %v1509_v16 = vrot.slane %v1496_v47, %v7328_v54 }
 0x26e   :  { %6334 = vtanh.f32 %v7401_v23 }
 0x275   :  { %v6331_v26 = vpop.eup %6330 }
 0x276   :  { %v6333_v49 = vpop.eup %6332  ;;  %v1198_v28 = vmul.f32 %v6331_v26, %v6329_v24  ;;  %v1246_v26 = vunpack.c.h.bf16 %v8912_v7 }
 0x278   :  { %v6335_v27 = vpop.eup %6334 }
 0x279   :  { %v1199_v29 = vmul.f32 %v6335_v27, %v6333_v49  ;;  %v1248_v49 = vunpack.c.h.bf16 %v8913_v53  ;;  %v1513_v53 = vrot.slane %v1496_v47, %v7332_v56 }
 0x27b   :  { %v7405_v30 = vpack.c.bf16 %v1199_v29, %v1198_v28 }
 0x27d   :  { %8907 = vst [vmem:[#allocation37_spill] sm:$0xff] %v7405_v30  ;;  %1443 = vmatmul.mubr.bf16.vlgmr.msra.gmra.mrb[32].mxu0 %v7405_v30  ;;  %1486 = vmatmul.mubr.bf16.vlgmr.msra.gmra.mrb[48].mxu1 %v7405_v30 }
 0x27e   :  { %1816 = vmatprep.mubr.bf16.mxu0 %v8906_v61  ;;  %1859 = vmatprep.mubr.bf16.mxu1 %v8906_v61 }
 0x27f   :  { %1785 = vmatpush1.bf16.msra.mxu0 %v7424_v32  ;;  %1828 = vmatpush1.bf16.msra.mxu1 %v7429_v33 }
 0x280   :  { %1786 = vmatprep.subr.bf16.mxu0 %v7438_v35  ;;  %1829 = vmatprep.subr.bf16.mxu1 %v7443_v36 }
 0x283   :  { %1787 = vmatpush1.bf16.msra.mxu0 %v7448_v37  ;;  %1830 = vmatpush1.bf16.msra.mxu1 %v7453_v38 }
 0x284   :  { %1788 = vmatprep.subr.bf16.mxu0 %v7462_v39  ;;  %1831 = vmatprep.subr.bf16.mxu1 %v7467_v40 }
 0x287   :  { %1789 = vmatpush1.bf16.msra.mxu0 %v7472_v42  ;;  %1832 = vmatpush1.bf16.msra.mxu1 %v7477_v43 }
 0x288   :  { %1790 = vmatprep.subr.bf16.mxu0 %v7486_v44  ;;  %1833 = vmatprep.subr.bf16.mxu1 %v7491_v2 }
 0x28b   :  { %1791 = vmatpush1.bf16.msra.mxu0 %v7496_v25  ;;  %1834 = vmatpush1.bf16.msra.mxu1 %v7501_v58 }
 0x28c   :  { %1792 = vmatprep.subr.bf16.mxu0 %v7515_v4  ;;  %1835 = vmatprep.subr.bf16.mxu1 %v7525_v62 }
 0x28f   :  { %1793 = vmatpush1.bf16.msra.mxu0 %v7510_v9  ;;  %1836 = vmatpush1.bf16.msra.mxu1 %v7520_v5 }
 0x290   :  { %1794 = vmatprep.subr.bf16.mxu0 %v7530_v59  ;;  %1837 = vmatprep.subr.bf16.mxu1 %v7536_v46 }
 0x293   :  { %1795 = vmatpush1.bf16.msra.mxu0 %v7544_v0  ;;  %1838 = vmatpush1.bf16.msra.mxu1 %v7549_v48 }
 0x294   :  { %1796 = vmatprep.subr.bf16.mxu0 %v7556_v57  ;;  %1839 = vmatprep.subr.bf16.mxu1 %v7561_v1 }
 0x297   :  { %1797 = vmatpush1.bf16.msra.mxu0 %v7568_v10  ;;  %1840 = vmatpush1.bf16.msra.mxu1 %v7573_v60 }
 0x298   :  { %1798 = vmatprep.subr.bf16.mxu0 %v7580_v63  ;;  %1841 = vmatprep.subr.bf16.mxu1 %v7585_v50 }
 0x29b   :  { %1799 = vmatpush1.bf16.msra.mxu0 %v7592_v3  ;;  %1842 = vmatpush1.bf16.msra.mxu1 %v7597_v34 }
 0x29c   :  { %2158 = vmatprep.subr.bf16.mxu0 %v7414_v41  ;;  %2201 = vmatprep.subr.bf16.mxu1 %v7419_v31 }
 0x350   :  { %v1444_v8 = vpop.f32.mrb[32].mxu0  ;;  %v1487_v12 = vpop.f32.mrb[48].mxu1 }
 0x351   :  { %v1445_v20 = vadd.f32 %v1444_v8, %v1242_v17  ;;  %v1488_v21 = vadd.f32 %v1487_v12, %v1244_v6  ;;  %v1446_v22 = vpop.f32.mrb[33].mxu0  ;;  %v1489_v24 = vpop.f32.mrb[49].mxu1 }
 0x352   :  { %v1447_v27 = vadd.f32 %v1446_v22, %v1243_v14  ;;  %v1490_v28 = vadd.f32 %v1489_v24, %v1245_v19  ;;  %v1448_v29 = vpop.f32.mrb[34].mxu0  ;;  %v1491_v30 = vpop.f32.mrb[50].mxu1 }
 0x353   :  { %v1518_v45 = vadd.f32 %v1501_v51, %v1445_v20  ;;  %v1449_v52 = vadd.f32 %v1448_v29, %v1246_v26  ;;  %v1492_v31 = vadd.f32 %v1491_v30, %v1248_v49  ;;  %v1450_v41 = vpop.f32.mrb[35].mxu0  ;;  %v1493_v17 = vpop.f32.mrb[51].mxu1  ;;  %v1520_v30 = vadd.f32 %v1509_v16, %v1488_v21 }
 0x354   :  { %v1519_v6 = vadd.f32 %v1505_v15, %v1447_v27  ;;  %v1451_v8 = vadd.f32 %v1450_v41, %v1247_v55  ;;  %v1494_v12 = vadd.f32 %v1493_v17, %v1249_v11  ;;  %v1521_v20 = vadd.f32 %v1513_v53, %v1490_v28 }
 0x355   :  { %v5655_v34 = vmul.f32 -1.442695, %v1518_v45  ;;  %v1522_v7 = vadd.f32 %v1501_v51, %v1449_v52  ;;  %v1524_v55 = vadd.f32 %v1509_v16, %v1492_v31 }
 0x356   :  { %v5657_v3 = vmul.f32 -1.442695, %v1519_v6  ;;  %v1523_v14 = vadd.f32 %v1505_v15, %v1451_v8  ;;  %v5659_v22 = vmul.f32 -1.442695, %v1521_v20  ;;  %v1525_v24 = vadd.f32 %v1513_v53, %v1494_v12 }
 0x357   :  { %6336 = vpow2.f32 %v5655_v34  ;;  %v5656_v19 = vmul.f32 -1.442695, %v1522_v7 }
 0x358   :  { %6338 = vpow2.f32 %v5657_v3  ;;  %v5658_v13 = vmul.f32 -1.442695, %v1523_v14  ;;  %v5660_v41 = vmul.f32 -1.442695, %v1525_v24 }
 0x359   :  { %6340 = vpow2.f32 %v5656_v19 }
 0x35a   :  { %6342 = vpow2.f32 %v5658_v13 }
 0x35b   :  { %6344 = vtanh.f32 %v1520_v30 }
 0x35c   :  { %6346 = vpow2.f32 %v5659_v22 }
 0x35d   :  { %6348 = vtanh.f32 %v1524_v55 }
 0x361   :  { %v6337_v11 = vpop.eup %6336 }
 0x362   :  { %v6339_v45 = vpop.eup %6338  ;;  %v1532_v52 = vadd.f32 1.0, %v6337_v11  ;;  %v8918_v11 = vld [vmem:[#allocation41_spill] sm:$0xff] }
 0x363   :  { %v1544_v51 = vadd.f32 1.0, %v6339_v45  ;;  %v6341_v34 = vpop.eup %6340  ;;  %v8919_v45 = vld [vmem:[#allocation38_spill] sm:$0xff] }
 0x364   :  { %6350 = vrcp.f32 %v1532_v52  ;;  %v1533_v3 = vadd.f32 1.0, %v6341_v34  ;;  %v6343_v47 = vpop.eup %6342  ;;  %v8920_v52 = vld [vmem:[#allocation39_spill] sm:$0xff] }
 0x365   :  { %6352 = vrcp.f32 %v1544_v51  ;;  %v1545_v15 = vadd.f32 1.0, %v6343_v47  ;;  %v6345_v21 = vpop.eup %6344  ;;  %v8921_v51 = vld [vmem:[#allocation16_spill] sm:$0xff] }
 0x366   :  { %6354 = vpow2.f32 %v5660_v41  ;;  %v6347_v26 = vpop.eup %6346  ;;  %v1870_v41 = vld [vmem:[%s8782_s3] sm:$0xf]  ;;  %v1616_v34 = vunpack.c.l.bf16 %v8921_v51 }
 0x367   :  { %6356 = vrcp.f32 %v1533_v3  ;;  %v6349_v31 = vpop.eup %6348  ;;  %v1558_v8 = vadd.f32 1.0, %v6347_v26  ;;  %v8922_v3 = vld [vmem:[#allocation26_spill] sm:$0xff] }
 0x368   :  { %6358 = vrcp.f32 %v1545_v15  ;;  %v1875_v47 = vrot.slane %v1870_v41, %v8922_v3  ;;  %v8923_v15 = vld [vmem:[#allocation22_spill] sm:$0xff] }
 0x369   :  { %6360 = vrcp.f32 %v1558_v8 }
 0x36e   :  { %v6351_v49 = vpop.eup %6350 }
 0x36f   :  { %v6353_v27 = vpop.eup %6352  ;;  %v1566_v28 = vmul.f32 %v6351_v49, %v6345_v21  ;;  %v1618_v21 = vunpack.c.l.bf16 %v8923_v15  ;;  %v8924_v49 = vld [vmem:[#allocation17_spill] sm:$0xff] }
 0x370   :  { %v6355_v29 = vpop.eup %6354  ;;  %v1564_v17 = vmul.f32 %v6353_v27, %v7398_v18  ;;  %v1617_v27 = vunpack.c.l.bf16 %v8924_v49 }
 0x371   :  { %v6357_v6 = vpop.eup %6356  ;;  %v1559_v14 = vadd.f32 1.0, %v6355_v29 }
 0x372   :  { %v7621_v12 = vadd.f32 %v1566_v28, %v1564_v17  ;;  %v1567_v7 = vmul.f32 %v6357_v6, %v6349_v31  ;;  %v6359_v53 = vpop.eup %6358  ;;  %v8925_v28 = vld [vmem:[#allocation27_spill] sm:$0xff]  ;;  %v8926_v17 = vld [vmem:[#allocation24_spill] sm:$0xff] }
 0x373   :  { %v1565_v19 = vmul.f32 %v6359_v53, %v7401_v23  ;;  %v6361_v16 = vpop.eup %6360  ;;  %v8917_v23 = vld [vmem:[#allocation40_spill] sm:$0xff]  ;;  %v1879_v29 = vrot.slane %v1870_v41, %v8925_v28  ;;  %v1619_v6 = vunpack.c.l.bf16 %v8926_v17 }
 0x374   :  { %6362 = vtanh.f32 %v7621_v12 }
 0x375   :  { %v7624_v13 = vadd.f32 %v1567_v7, %v1565_v19  ;;  %6364 = vrcp.f32 %v1559_v14  ;;  %v1620_v19 = vunpack.c.h.bf16 %v8921_v51 }
 0x377   :  { %6366 = vtanh.f32 %v7624_v13 }
 0x37e   :  { %v6363_v20 = vpop.eup %6362 }
 0x37f   :  { %v6365_v18 = vpop.eup %6364  ;;  %v1572_v22 = vmul.f32 %v6363_v20, %v6361_v16  ;;  %v1622_v16 = vunpack.c.h.bf16 %v8923_v15  ;;  %v1887_v15 = vrot.slane %v1870_v41, %v7332_v56 }
 0x381   :  { %v6367_v30 = vpop.eup %6366 }
 0x382   :  { %v1573_v24 = vmul.f32 %v6367_v30, %v6365_v18 }
 0x384   :  { %v7628_v55 = vpack.c.bf16 %v1573_v24, %v1572_v22  ;;  %v1621_v24 = vunpack.c.h.bf16 %v8924_v49 }
 0x386   :  { %8916 = vst [vmem:[#allocation14_spill] sm:$0xff] %v7628_v55  ;;  %1817 = vmatmul.mubr.bf16.vlgmr.msra.gmra.mrb[36].mxu0 %v7628_v55  ;;  %1860 = vmatmul.mubr.bf16.vlgmr.msra.gmra.mrb[52].mxu1 %v7628_v55 }
 0x387   :  { %2159 = vmatpush1.bf16.msra.mxu0 %v7424_v32  ;;  %2202 = vmatpush1.bf16.msra.mxu1 %v7429_v33 }
 0x388   :  { %2160 = vmatprep.subr.bf16.mxu0 %v7438_v35  ;;  %2203 = vmatprep.subr.bf16.mxu1 %v7443_v36 }
 0x389   :  { %2190 = vmatprep.mubr.bf16.mxu0 %v8906_v61  ;;  %2233 = vmatprep.mubr.bf16.mxu1 %v8906_v61 }
 0x38b   :  { %2161 = vmatpush1.bf16.msra.mxu0 %v7448_v37  ;;  %2204 = vmatpush1.bf16.msra.mxu1 %v7453_v38 }
 0x38c   :  { %2162 = vmatprep.subr.bf16.mxu0 %v7462_v39  ;;  %2205 = vmatprep.subr.bf16.mxu1 %v7467_v40 }
 0x38f   :  { %2163 = vmatpush1.bf16.msra.mxu0 %v7472_v42  ;;  %2206 = vmatpush1.bf16.msra.mxu1 %v7477_v43 }
 0x390   :  { %2164 = vmatprep.subr.bf16.mxu0 %v7486_v44  ;;  %2207 = vmatprep.subr.bf16.mxu1 %v7491_v2 }
 0x393   :  { %2165 = vmatpush1.bf16.msra.mxu0 %v7496_v25  ;;  %2208 = vmatpush1.bf16.msra.mxu1 %v7501_v58 }
 0x394   :  { %2166 = vmatprep.subr.bf16.mxu0 %v7515_v4  ;;  %2209 = vmatprep.subr.bf16.mxu1 %v7525_v62 }
 0x397   :  { %2167 = vmatpush1.bf16.msra.mxu0 %v7510_v9  ;;  %2210 = vmatpush1.bf16.msra.mxu1 %v7520_v5 }
 0x398   :  { %2168 = vmatprep.subr.bf16.mxu0 %v7530_v59  ;;  %2211 = vmatprep.subr.bf16.mxu1 %v7536_v46 }
 0x39b   :  { %2169 = vmatpush1.bf16.msra.mxu0 %v7544_v0  ;;  %2212 = vmatpush1.bf16.msra.mxu1 %v7549_v48 }
 0x39c   :  { %2170 = vmatprep.subr.bf16.mxu0 %v7556_v57  ;;  %2213 = vmatprep.subr.bf16.mxu1 %v7561_v1 }
 0x39f   :  { %2171 = vmatpush1.bf16.msra.mxu0 %v7568_v10  ;;  %2214 = vmatpush1.bf16.msra.mxu1 %v7573_v60 }
 0x3a0   :  { %2172 = vmatprep.subr.bf16.mxu0 %v7580_v63  ;;  %2215 = vmatprep.subr.bf16.mxu1 %v7585_v50 }
 0x3a3   :  { %2173 = vmatpush1.bf16.msra.mxu0 %v8917_v23  ;;  %2216 = vmatpush1.bf16.msra.mxu1 %v8918_v11 }
 0x3a4   :  { %2532 = vmatprep.subr.bf16.mxu0 %v8919_v45  ;;  %2575 = vmatprep.subr.bf16.mxu1 %v8920_v52  ;;  %v1623_v45 = vunpack.c.h.bf16 %v8926_v17  ;;  %v1883_v17 = vrot.slane %v1870_v41, %v7328_v54 }
 0x459   :  { %v1818_v26 = vpop.f32.mrb[36].mxu0  ;;  %v1861_v31 = vpop.f32.mrb[52].mxu1 }
 0x45a   :  { %v1819_v8 = vadd.f32 %v1818_v26, %v1616_v34  ;;  %v1862_v7 = vadd.f32 %v1861_v31, %v1618_v21  ;;  %v1820_v53 = vpop.f32.mrb[37].mxu0  ;;  %v1863_v14 = vpop.f32.mrb[53].mxu1 }
 0x45b   :  { %v1821_v20 = vadd.f32 %v1820_v53, %v1617_v27  ;;  %v1864_v18 = vadd.f32 %v1863_v14, %v1619_v6  ;;  %v1822_v30 = vpop.f32.mrb[38].mxu0  ;;  %v1865_v22 = vpop.f32.mrb[54].mxu1 }
 0x45c   :  { %v1892_v52 = vadd.f32 %v1875_v47, %v1819_v8  ;;  %v1823_v55 = vadd.f32 %v1822_v30, %v1620_v19  ;;  %v1866_v28 = vadd.f32 %v1865_v22, %v1622_v16  ;;  %v1824_v3 = vpop.f32.mrb[39].mxu0  ;;  %v1867_v34 = vpop.f32.mrb[55].mxu1  ;;  %v1894_v53 = vadd.f32 %v1883_v17, %v1862_v7 }
 0x45d   :  { %v1893_v21 = vadd.f32 %v1879_v29, %v1821_v20  ;;  %v1825_v26 = vadd.f32 %v1824_v3, %v1621_v24  ;;  %v1868_v31 = vadd.f32 %v1867_v34, %v1623_v45  ;;  %v1895_v8 = vadd.f32 %v1887_v15, %v1864_v18 }
 0x45e   :  { %v5693_v11 = vmul.f32 -1.442695, %v1892_v52  ;;  %v1896_v51 = vadd.f32 %v1875_v47, %v1823_v55  ;;  %v1898_v3 = vadd.f32 %v1883_v17, %v1866_v28 }
 0x45f   :  { %v5695_v23 = vmul.f32 -1.442695, %v1893_v21  ;;  %v1897_v27 = vadd.f32 %v1879_v29, %v1825_v26  ;;  %v5697_v14 = vmul.f32 -1.442695, %v1895_v8  ;;  %v1899_v19 = vadd.f32 %v1887_v15, %v1868_v31 }
 0x460   :  { %6368 = vpow2.f32 %v5693_v11  ;;  %v5694_v6 = vmul.f32 -1.442695, %v1896_v51 }
 0x461   :  { %6370 = vpow2.f32 %v5695_v23  ;;  %v5696_v49 = vmul.f32 -1.442695, %v1897_v27  ;;  %v5698_v20 = vmul.f32 -1.442695, %v1899_v19 }
 0x462   :  { %6372 = vpow2.f32 %v5694_v6 }
 0x463   :  { %6374 = vpow2.f32 %v5696_v49 }
 0x464   :  { %6376 = vtanh.f32 %v1894_v53 }
 0x465   :  { %6378 = vpow2.f32 %v5697_v14 }
 0x466   :  { %6380 = vtanh.f32 %v1898_v3 }
 0x46a   :  { %v6369_v16 = vpop.eup %6368 }
 0x46b   :  { %v6371_v55 = vpop.eup %6370  ;;  %v1906_v47 = vadd.f32 1.0, %v6369_v16 }
 0x46c   :  { %v1918_v29 = vadd.f32 1.0, %v6371_v55  ;;  %v6373_v11 = vpop.eup %6372 }
 0x46d   :  { %6382 = vrcp.f32 %v1906_v47  ;;  %v1907_v23 = vadd.f32 1.0, %v6373_v11  ;;  %v6375_v41 = vpop.eup %6374 }
 0x46e   :  { %6384 = vrcp.f32 %v1918_v29  ;;  %v1919_v18 = vadd.f32 1.0, %v6375_v41  ;;  %v6377_v7 = vpop.eup %6376 }
 0x46f   :  { %6386 = vpow2.f32 %v5698_v20  ;;  %v6379_v30 = vpop.eup %6378 }
 0x470   :  { %6388 = vrcp.f32 %v1907_v23  ;;  %v6381_v28 = vpop.eup %6380  ;;  %v1932_v26 = vadd.f32 1.0, %v6379_v30 }
 0x471   :  { %6390 = vrcp.f32 %v1919_v18 }
 0x472   :  { %6392 = vrcp.f32 %v1932_v26 }
 0x477   :  { %v6383_v22 = vpop.eup %6382 }
 0x478   :  { %v6385_v24 = vpop.eup %6384  ;;  %v1940_v45 = vmul.f32 %v6383_v22, %v6377_v7 }
 0x479   :  { %v6387_v52 = vpop.eup %6386  ;;  %v1938_v34 = vmul.f32 %v6385_v24, %v7621_v12 }
 0x47a   :  { %v6389_v21 = vpop.eup %6388  ;;  %v1933_v27 = vadd.f32 1.0, %v6387_v52 }
 0x47b   :  { %v7682_v31 = vadd.f32 %v1940_v45, %v1938_v34  ;;  %v1941_v51 = vmul.f32 %v6389_v21, %v6381_v28  ;;  %v6391_v15 = vpop.eup %6390 }
 0x47c   :  { %v1939_v6 = vmul.f32 %v6391_v15, %v7624_v13  ;;  %v6393_v17 = vpop.eup %6392 }
 0x47d   :  { %6394 = vtanh.f32 %v7682_v31 }
 0x47e   :  { %v7685_v49 = vadd.f32 %v1941_v51, %v1939_v6  ;;  %6396 = vrcp.f32 %v1933_v27 }
 0x480   :  { %6398 = vtanh.f32 %v7685_v49 }
 0x487   :  { %v6395_v8 = vpop.eup %6394 }
 0x488   :  { %v6397_v12 = vpop.eup %6396  ;;  %v1946_v14 = vmul.f32 %v6395_v8, %v6393_v17 }
 0x48a   :  { %v6399_v53 = vpop.eup %6398 }
 0x48b   :  { %v1947_v19 = vmul.f32 %v6399_v53, %v6397_v12 }
 0x48d   :  { %v7689_v3 = vpack.c.bf16 %v1947_v19, %v1946_v14 }
 0x48f   :  { %8927 = vst [vmem:[#allocation18_spill] sm:$0xff] %v7689_v3  ;;  %2191 = vmatmul.mubr.bf16.vlgmr.msra.gmra.mrb[40].mxu0 %v7689_v3  ;;  %2234 = vmatmul.mubr.bf16.vlgmr.msra.gmra.mrb[56].mxu1 %v7689_v3 }
 0x490   :  { %2533 = vmatpush1.bf16.msra.mxu0 %v7424_v32  ;;  %2576 = vmatpush1.bf16.msra.mxu1 %v7429_v33  ;;  %v8928_v32 = vld [vmem:[#allocation40_spill] sm:$0xff]  ;;  %v8929_v33 = vld [vmem:[#allocation41_spill] sm:$0xff] }
 0x491   :  { %2534 = vmatprep.subr.bf16.mxu0 %v7438_v35  ;;  %2577 = vmatprep.subr.bf16.mxu1 %v7443_v36  ;;  %v2244_v35 = vld [vmem:[%s8782_s3] sm:$0xf]  ;;  %v8930_v36 = vld [vmem:[#allocation19_spill] sm:$0xff] }
 0x492   :  { %2564 = vmatprep.mubr.bf16.mxu0 %v8906_v61  ;;  %2607 = vmatprep.mubr.bf16.mxu1 %v8906_v61  ;;  %v2261_v28 = vrot.slane %v2244_v35, %v7332_v56  ;;  %v2257_v52 = vrot.slane %v2244_v35, %v7328_v54 }
 0x494   :  { %2535 = vmatpush1.bf16.msra.mxu0 %v7448_v37  ;;  %2578 = vmatpush1.bf16.msra.mxu1 %v7453_v38  ;;  %v1990_v37 = vunpack.c.l.bf16 %v8930_v36  ;;  %v8931_v38 = vld [vmem:[#allocation26_spill] sm:$0xff] }
 0x495   :  { %2536 = vmatprep.subr.bf16.mxu0 %v7462_v39  ;;  %2579 = vmatprep.subr.bf16.mxu1 %v7467_v40  ;;  %v2249_v39 = vrot.slane %v2244_v35, %v8931_v38  ;;  %v8932_v40 = vld [vmem:[#allocation28_spill] sm:$0xff] }
 0x498   :  { %2537 = vmatpush1.bf16.msra.mxu0 %v7472_v42  ;;  %2580 = vmatpush1.bf16.msra.mxu1 %v7477_v43  ;;  %v1992_v42 = vunpack.c.l.bf16 %v8932_v40 }
 0x499   :  { %2538 = vmatprep.subr.bf16.mxu0 %v7486_v44  ;;  %2581 = vmatprep.subr.bf16.mxu1 %v7491_v2  ;;  %v8933_v2 = vld [vmem:[#allocation21_spill] sm:$0xff] }
 0x49c   :  { %2539 = vmatpush1.bf16.msra.mxu0 %v7496_v25  ;;  %2582 = vmatpush1.bf16.msra.mxu1 %v7501_v58  ;;  %v1991_v25 = vunpack.c.l.bf16 %v8933_v2  ;;  %v8934_v58 = vld [vmem:[#allocation27_spill] sm:$0xff] }
 0x49d   :  { %2540 = vmatprep.subr.bf16.mxu0 %v7515_v4  ;;  %2583 = vmatprep.subr.bf16.mxu1 %v7525_v62  ;;  %v8935_v4 = vld [vmem:[#allocation29_spill] sm:$0xff] }
 0x49e   :  { %v1997_v13 = vunpack.c.h.bf16 %v8935_v4 }
 0x4a0   :  { %2541 = vmatpush1.bf16.msra.mxu0 %v7510_v9  ;;  %2584 = vmatpush1.bf16.msra.mxu1 %v7520_v5  ;;  %v2253_v9 = vrot.slane %v2244_v35, %v8934_v58  ;;  %v1993_v5 = vunpack.c.l.bf16 %v8935_v4 }
 0x4a1   :  { %2542 = vmatprep.subr.bf16.mxu0 %v7530_v59  ;;  %2585 = vmatprep.subr.bf16.mxu1 %v7536_v46 }
 0x4a4   :  { %2543 = vmatpush1.bf16.msra.mxu0 %v7544_v0  ;;  %2586 = vmatpush1.bf16.msra.mxu1 %v7549_v48  ;;  %v1994_v48 = vunpack.c.h.bf16 %v8930_v36 }
 0x4a5   :  { %2544 = vmatprep.subr.bf16.mxu0 %v7556_v57  ;;  %2587 = vmatprep.subr.bf16.mxu1 %v7561_v1  ;;  %v1996_v57 = vunpack.c.h.bf16 %v8932_v40 }
 0x4a8   :  { %2545 = vmatpush1.bf16.msra.mxu0 %v7568_v10  ;;  %2588 = vmatpush1.bf16.msra.mxu1 %v7573_v60 }
 0x4a9   :  { %2546 = vmatprep.subr.bf16.mxu0 %v7580_v63  ;;  %2589 = vmatprep.subr.bf16.mxu1 %v7585_v50  ;;  %v1995_v50 = vunpack.c.h.bf16 %v8933_v2 }
 0x4ac   :  { %2547 = vmatpush1.bf16.msra.mxu0 %v8928_v32  ;;  %2590 = vmatpush1.bf16.msra.mxu1 %v8929_v33 }
 0x562   :  { %v2192_v43 = vpop.f32.mrb[40].mxu0  ;;  %v2235_v44 = vpop.f32.mrb[56].mxu1 }
 0x563   :  { %v2193_v62 = vadd.f32 %v2192_v43, %v1990_v37  ;;  %v2236_v59 = vadd.f32 %v2235_v44, %v1992_v42  ;;  %v2194_v46 = vpop.f32.mrb[41].mxu0  ;;  %v2237_v0 = vpop.f32.mrb[57].mxu1 }
 0x564   :  { %v2195_v1 = vadd.f32 %v2194_v46, %v1991_v25  ;;  %v2238_v10 = vadd.f32 %v2237_v0, %v1993_v5  ;;  %v2196_v60 = vpop.f32.mrb[42].mxu0  ;;  %v2239_v63 = vpop.f32.mrb[58].mxu1 }
 0x565   :  { %v2266_v16 = vadd.f32 %v2249_v39, %v2193_v62  ;;  %v2197_v55 = vadd.f32 %v2196_v60, %v1994_v48  ;;  %v2240_v47 = vadd.f32 %v2239_v63, %v1996_v57  ;;  %v2198_v20 = vpop.f32.mrb[43].mxu0  ;;  %v2241_v29 = vpop.f32.mrb[59].mxu1  ;;  %v2268_v21 = vadd.f32 %v2257_v52, %v2236_v59  ;;  %v7762_v60 = vld [vmem:[%s8781_s2 + $0xc] ss:$16 sps:$4 sm:$0xff]   ;;  %v7767_v63 = vld [vmem:[%s8781_s2] ss:$16 sps:$4 sm:$0xff]  }
 0x566   :  { %v2267_v11 = vadd.f32 %v2253_v9, %v2195_v1  ;;  %v2199_v23 = vadd.f32 %v2198_v20, %v1995_v50  ;;  %v2242_v41 = vadd.f32 %v2241_v29, %v1997_v13  ;;  %v2269_v34 = vadd.f32 %v2261_v28, %v2238_v10  ;;  %v7772_v50 = vld [vmem:[%s8781_s2 + $0x8] ss:$16 sps:$4 sm:$0xff]   ;;  %2949 = vmatprep.subr.bf16.mxu1 %v7762_v60  ;;  %v7781_v13 = vld [vmem:[%s8781_s2 + $0x24] ss:$16 sps:$4 sm:$0xff]   ;;  %v7810_v29 = vld [vmem:[%s8781_s2 + $0x4c] ss:$16 sps:$4 sm:$0xff]  }
 0x567   :  { %v5731_v18 = vmul.f32 -1.442695, %v2266_v16  ;;  %v2270_v7 = vadd.f32 %v2249_v39, %v2197_v55  ;;  %v2272_v15 = vadd.f32 %v2257_v52, %v2240_v47  ;;  %v7786_v16 = vld [vmem:[%s8781_s2 + $0x2c] ss:$16 sps:$4 sm:$0xff]   ;;  %v7791_v55 = vld [vmem:[%s8781_s2 + $0x20] ss:$16 sps:$4 sm:$0xff]  }
 0x568   :  { %v5733_v30 = vmul.f32 -1.442695, %v2267_v11  ;;  %v2271_v22 = vadd.f32 %v2253_v9, %v2199_v23  ;;  %v5735_v26 = vmul.f32 -1.442695, %v2269_v34  ;;  %v2273_v51 = vadd.f32 %v2261_v28, %v2242_v41  ;;  %v7796_v47 = vld [vmem:[%s8781_s2 + $0x28] ss:$16 sps:$4 sm:$0xff]  }
 0x569   :  { %6400 = vpow2.f32 %v5731_v18  ;;  %v5732_v24 = vmul.f32 -1.442695, %v2270_v7  ;;  %v7805_v20 = vld [vmem:[%s8781_s2 + $0x44] ss:$16 sps:$4 sm:$0xff]   ;;  %v7815_v11 = vld [vmem:[%s8781_s2 + $0x40] ss:$16 sps:$4 sm:$0xff]  }
 0x56a   :  { %6402 = vpow2.f32 %v5733_v30  ;;  %v5734_v45 = vmul.f32 -1.442695, %v2271_v22  ;;  %v5736_v8 = vmul.f32 -1.442695, %v2273_v51  ;;  %v7820_v23 = vld [vmem:[%s8781_s2 + $0x48] ss:$16 sps:$4 sm:$0xff]  }
 0x56b   :  { %6404 = vpow2.f32 %v5732_v24  ;;  %v7829_v41 = vld [vmem:[%s8781_s2 + $0x64] ss:$16 sps:$4 sm:$0xff]   ;;  %v7834_v18 = vld [vmem:[%s8781_s2 + $0x6c] ss:$16 sps:$4 sm:$0xff]   ;;  %v7839_v7 = vld [vmem:[%s8781_s2 + $0x60] ss:$16 sps:$4 sm:$0xff]  }
 0x56c   :  { %6406 = vpow2.f32 %v5734_v45  ;;  %v7844_v30 = vld [vmem:[%s8781_s2 + $0x68] ss:$16 sps:$4 sm:$0xff]   ;;  %v7853_v28 = vld [vmem:[%s8781_s2 + $0x80] ss:$16 sps:$4 sm:$0xff]   ;;  %v7858_v22 = vld [vmem:[%s8781_s2 + $0x84] ss:$16 sps:$4 sm:$0xff]  }
 0x56d   :  { %6408 = vtanh.f32 %v2268_v21  ;;  %v7863_v24 = vld [vmem:[%s8781_s2 + $0x88] ss:$16 sps:$4 sm:$0xff]   ;;  %v7868_v45 = vld [vmem:[%s8781_s2 + $0x8c] ss:$16 sps:$4 sm:$0xff]   ;;  %v7873_v52 = vld [vmem:[%s8781_s2 + $0xa4] ss:$16 sps:$4 sm:$0xff]  }
 0x56e   :  { %6410 = vpow2.f32 %v5735_v26  ;;  %v7879_v34 = vld [vmem:[%s8781_s2 + $0xac] ss:$16 sps:$4 sm:$0xff]   ;;  %v7887_v21 = vld [vmem:[%s8781_s2 + $0xa0] ss:$16 sps:$4 sm:$0xff]   ;;  %v7892_v26 = vld [vmem:[%s8781_s2 + $0xa8] ss:$16 sps:$4 sm:$0xff]  }
 0x56f   :  { %6412 = vtanh.f32 %v2272_v15  ;;  %v7899_v51 = vld [vmem:[%s8781_s2 + $0xc4] ss:$16 sps:$4 sm:$0xff]   ;;  %v7904_v15 = vld [vmem:[%s8781_s2 + $0xcc] ss:$16 sps:$4 sm:$0xff]  }
 0x573   :  { %v6401_v27 = vpop.eup %6400 }
 0x574   :  { %v6403_v6 = vpop.eup %6402  ;;  %v2280_v17 = vadd.f32 1.0, %v6401_v27  ;;  %v7911_v27 = vld [vmem:[%s8781_s2 + $0xc0] ss:$16 sps:$4 sm:$0xff]  }
 0x575   :  { %v2292_v12 = vadd.f32 1.0, %v6403_v6  ;;  %v6405_v53 = vpop.eup %6404  ;;  %v7916_v6 = vld [vmem:[%s8781_s2 + $0xc8] ss:$16 sps:$4 sm:$0xff]  }
 0x576   :  { %6414 = vrcp.f32 %v2280_v17  ;;  %v2281_v14 = vadd.f32 1.0, %v6405_v53  ;;  %v6407_v19 = vpop.eup %6406  ;;  %v7923_v17 = vld [vmem:[%s8781_s2 + $0xe4] ss:$16 sps:$4 sm:$0xff]   ;;  %v7940_v53 = vld [vmem:[%s8781_s2 + $0xe8] ss:$16 sps:$4 sm:$0xff]  }
 0x577   :  { %6416 = vrcp.f32 %v2292_v12  ;;  %v2293_v32 = vadd.f32 1.0, %v6407_v19  ;;  %v6409_v33 = vpop.eup %6408  ;;  %v7935_v12 = vld [vmem:[%s8781_s2 + $0xe0] ss:$16 sps:$4 sm:$0xff]   ;;  %8938 = vst [vmem:[#allocation38_spill] sm:$0xff] %v7940_v53  ;;  %v8939_v19 = vld [vmem:[#allocation23_spill] sm:$0xff] }
 0x578   :  { %6418 = vpow2.f32 %v5736_v8  ;;  %v6411_v35 = vpop.eup %6410  ;;  %v7928_v8 = vld [vmem:[%s8781_s2 + $0xec] ss:$16 sps:$4 sm:$0xff]   ;;  %8937 = vst [vmem:[#allocation20_spill] sm:$0xff] %v7935_v12 }
 0x579   :  { %6420 = vrcp.f32 %v2281_v14  ;;  %v6413_v36 = vpop.eup %6412  ;;  %v2306_v2 = vadd.f32 1.0, %v6411_v35  ;;  %v2618_v14 = vld [vmem:[%s8782_s3] sm:$0xf] }
 0x57a   :  { %6422 = vrcp.f32 %v2293_v32  ;;  %v2364_v32 = vunpack.c.l.bf16 %v8939_v19  ;;  %v8940_v35 = vld [vmem:[#allocation30_spill] sm:$0xff] }
 0x57b   :  { %6424 = vrcp.f32 %v2306_v2 }
 0x580   :  { %v6415_v37 = vpop.eup %6414 }
 0x581   :  { %v6417_v39 = vpop.eup %6416  ;;  %v2314_v40 = vmul.f32 %v6415_v37, %v6409_v33  ;;  %v2623_v33 = vrot.slane %v2618_v14, %v8931_v38 }
 0x582   :  { %v6419_v42 = vpop.eup %6418  ;;  %v2312_v43 = vmul.f32 %v6417_v39, %v7682_v31 }
 0x583   :  { %v6421_v44 = vpop.eup %6420  ;;  %v2307_v5 = vadd.f32 1.0, %v6419_v42 }
 0x584   :  { %v7741_v25 = vadd.f32 %v2314_v40, %v2312_v43  ;;  %v2315_v9 = vmul.f32 %v6421_v44, %v6413_v36  ;;  %v6423_v4 = vpop.eup %6422  ;;  %v2366_v36 = vunpack.c.l.bf16 %v8940_v35  ;;  %v8941_v40 = vld [vmem:[#allocation25_spill] sm:$0xff]  ;;  %v2627_v43 = vrot.slane %v2618_v14, %v8934_v58  ;;  %v8942_v44 = vld [vmem:[#allocation31_spill] sm:$0xff] }
 0x585   :  { %v2313_v62 = vmul.f32 %v6423_v4, %v7685_v49  ;;  %v6425_v46 = vpop.eup %6424  ;;  %v7757_v49 = vld [vmem:[%s8781_s2 + $0x4] ss:$16 sps:$4 sm:$0xff]   ;;  %v2365_v42 = vunpack.c.l.bf16 %v8941_v40  ;;  %v2367_v2 = vunpack.c.l.bf16 %v8942_v44 }
 0x586   :  { %6426 = vtanh.f32 %v7741_v25  ;;  %2906 = vmatprep.subr.bf16.mxu0 %v7757_v49 }
 0x587   :  { %v7744_v59 = vadd.f32 %v2315_v9, %v2313_v62  ;;  %6428 = vrcp.f32 %v2307_v5 }
 0x589   :  { %6430 = vtanh.f32 %v7744_v59 }
 0x590   :  { %v6427_v0 = vpop.eup %6426 }
 0x591   :  { %v6429_v31 = vpop.eup %6428  ;;  %v2320_v57 = vmul.f32 %v6427_v0, %v6425_v46  ;;  %v2368_v46 = vunpack.c.h.bf16 %v8939_v19  ;;  %v2370_v0 = vunpack.c.h.bf16 %v8940_v35  ;;  %v2635_v35 = vrot.slane %v2618_v14, %v7332_v56 }
 0x593   :  { %v6431_v48 = vpop.eup %6430 }
 0x594   :  { %v2321_v1 = vmul.f32 %v6431_v48, %v6429_v31 }
 0x596   :  { %v7748_v10 = vpack.c.bf16 %v2321_v1, %v2320_v57 }
 0x598   :  { %8936 = vst [vmem:[#allocation15_spill] sm:$0xff] %v7748_v10  ;;  %2565 = vmatmul.mubr.bf16.vlgmr.msra.gmra.mrb[44].mxu0 %v7748_v10  ;;  %2608 = vmatmul.mubr.bf16.vlgmr.msra.gmra.mrb[60].mxu1 %v7748_v10 }
 0x599   :  { %2938 = vmatprep.mubr.bf16.mxu0 %v8906_v61  ;;  %2981 = vmatprep.mubr.bf16.mxu1 %v8906_v61 }
 0x59a   :  { %2907 = vmatpush1.bf16.msra.mxu0 %v7767_v63  ;;  %2950 = vmatpush1.bf16.msra.mxu1 %v7772_v50 }
 0x59b   :  { %2908 = vmatprep.subr.bf16.mxu0 %v7781_v13  ;;  %2951 = vmatprep.subr.bf16.mxu1 %v7786_v16 }
 0x59e   :  { %2909 = vmatpush1.bf16.msra.mxu0 %v7791_v55  ;;  %2952 = vmatpush1.bf16.msra.mxu1 %v7796_v47 }
 0x59f   :  { %2910 = vmatprep.subr.bf16.mxu0 %v7805_v20  ;;  %2953 = vmatprep.subr.bf16.mxu1 %v7810_v29 }
 0x5a2   :  { %2911 = vmatpush1.bf16.msra.mxu0 %v7815_v11  ;;  %2954 = vmatpush1.bf16.msra.mxu1 %v7820_v23 }
 0x5a3   :  { %2912 = vmatprep.subr.bf16.mxu0 %v7829_v41  ;;  %2955 = vmatprep.subr.bf16.mxu1 %v7834_v18 }
 0x5a6   :  { %2913 = vmatpush1.bf16.msra.mxu0 %v7839_v7  ;;  %2956 = vmatpush1.bf16.msra.mxu1 %v7844_v30 }
 0x5a7   :  { %2914 = vmatprep.subr.bf16.mxu0 %v7858_v22  ;;  %2957 = vmatprep.subr.bf16.mxu1 %v7868_v45 }
 0x5aa   :  { %2915 = vmatpush1.bf16.msra.mxu0 %v7853_v28  ;;  %2958 = vmatpush1.bf16.msra.mxu1 %v7863_v24 }
 0x5ab   :  { %2916 = vmatprep.subr.bf16.mxu0 %v7873_v52  ;;  %2959 = vmatprep.subr.bf16.mxu1 %v7879_v34 }
 0x5ae   :  { %2917 = vmatpush1.bf16.msra.mxu0 %v7887_v21  ;;  %2960 = vmatpush1.bf16.msra.mxu1 %v7892_v26 }
 0x5af   :  { %2918 = vmatprep.subr.bf16.mxu0 %v7899_v51  ;;  %2961 = vmatprep.subr.bf16.mxu1 %v7904_v15 }
 0x5b2   :  { %2919 = vmatpush1.bf16.msra.mxu0 %v7911_v27  ;;  %2962 = vmatpush1.bf16.msra.mxu1 %v7916_v6 }
 0x5b3   :  { %2920 = vmatprep.subr.bf16.mxu0 %v7923_v17  ;;  %2963 = vmatprep.subr.bf16.mxu1 %v7928_v8 }
 0x5b6   :  { %2921 = vmatpush1.bf16.msra.mxu0 %v7935_v12  ;;  %2964 = vmatpush1.bf16.msra.mxu1 %v7940_v53 }
 0x5b7   :  { %3280 = vmatprep.subr.bf16.mxu0 %v7757_v49  ;;  %3323 = vmatprep.subr.bf16.mxu1 %v7762_v60  ;;  %v2369_v49 = vunpack.c.h.bf16 %v8941_v40  ;;  %v2371_v60 = vunpack.c.h.bf16 %v8942_v44  ;;  %v2631_v44 = vrot.slane %v2618_v14, %v7328_v54 }
 0x66b   :  { %v2566_v37 = vpop.f32.mrb[44].mxu0  ;;  %v2609_v39 = vpop.f32.mrb[60].mxu1 }
 0x66c   :  { %v2567_v9 = vadd.f32 %v2566_v37, %v2364_v32  ;;  %v2610_v4 = vadd.f32 %v2609_v39, %v2366_v36  ;;  %v2568_v5 = vpop.f32.mrb[45].mxu0  ;;  %v2611_v62 = vpop.f32.mrb[61].mxu1 }
 0x66d   :  { %v2569_v31 = vadd.f32 %v2568_v5, %v2365_v42  ;;  %v2612_v48 = vadd.f32 %v2611_v62, %v2367_v2  ;;  %v2570_v57 = vpop.f32.mrb[46].mxu0  ;;  %v2613_v1 = vpop.f32.mrb[62].mxu1 }
 0x66e   :  { %v2640_v10 = vadd.f32 %v2623_v33, %v2567_v9  ;;  %v2571_v3 = vadd.f32 %v2570_v57, %v2368_v46  ;;  %v2614_v58 = vadd.f32 %v2613_v1, %v2370_v0  ;;  %v2572_v38 = vpop.f32.mrb[47].mxu0  ;;  %v2615_v32 = vpop.f32.mrb[63].mxu1  ;;  %v2642_v5 = vadd.f32 %v2631_v44, %v2610_v4 }
 0x66f   :  { %v2641_v36 = vadd.f32 %v2627_v43, %v2569_v31  ;;  %v2573_v37 = vadd.f32 %v2572_v38, %v2369_v49  ;;  %v2616_v39 = vadd.f32 %v2615_v32, %v2371_v60  ;;  %v2643_v9 = vadd.f32 %v2635_v35, %v2612_v48 }
 0x670   :  { %v5769_v53 = vmul.f32 -1.442695, %v2640_v10  ;;  %v2644_v19 = vadd.f32 %v2623_v33, %v2571_v3  ;;  %v2646_v38 = vadd.f32 %v2631_v44, %v2614_v58 }
 0x671   :  { %v5771_v12 = vmul.f32 -1.442695, %v2641_v36  ;;  %v2645_v42 = vadd.f32 %v2627_v43, %v2573_v37  ;;  %v5773_v62 = vmul.f32 -1.442695, %v2643_v9  ;;  %v2647_v46 = vadd.f32 %v2635_v35, %v2616_v39 }
 0x672   :  { %6432 = vpow2.f32 %v5769_v53  ;;  %v5770_v2 = vmul.f32 -1.442695, %v2644_v19 }
 0x673   :  { %6434 = vpow2.f32 %v5771_v12  ;;  %v5772_v40 = vmul.f32 -1.442695, %v2645_v42  ;;  %v5774_v33 = vmul.f32 -1.442695, %v2647_v46 }
 0x674   :  { %6436 = vpow2.f32 %v5770_v2 }
 0x675   :  { %6438 = vpow2.f32 %v5772_v40 }
 0x676   :  { %6440 = vtanh.f32 %v2642_v5 }
 0x677   :  { %6442 = vpow2.f32 %v5773_v62 }
 0x678   :  { %6444 = vtanh.f32 %v2646_v38 }
 0x67c   :  { %v6433_v0 = vpop.eup %6432 }
 0x67d   :  { %v6435_v3 = vpop.eup %6434  ;;  %v2654_v10 = vadd.f32 1.0, %v6433_v0 }
 0x67e   :  { %v2666_v43 = vadd.f32 1.0, %v6435_v3  ;;  %v6437_v53 = vpop.eup %6436 }
 0x67f   :  { %6446 = vrcp.f32 %v2654_v10  ;;  %v2655_v12 = vadd.f32 1.0, %v6437_v53  ;;  %v6439_v14 = vpop.eup %6438 }
 0x680   :  { %6448 = vrcp.f32 %v2666_v43  ;;  %v2667_v31 = vadd.f32 1.0, %v6439_v14  ;;  %v6441_v4 = vpop.eup %6440 }
 0x681   :  { %6450 = vpow2.f32 %v5774_v33  ;;  %v6443_v48 = vpop.eup %6442 }
 0x682   :  { %6452 = vrcp.f32 %v2655_v12  ;;  %v6445_v58 = vpop.eup %6444  ;;  %v2680_v37 = vadd.f32 1.0, %v6443_v48 }
 0x683   :  { %6454 = vrcp.f32 %v2667_v31 }
 0x684   :  { %6456 = vrcp.f32 %v2680_v37 }
 0x689   :  { %v6447_v57 = vpop.eup %6446 }
 0x68a   :  { %v6449_v1 = vpop.eup %6448  ;;  %v2688_v49 = vmul.f32 %v6447_v57, %v6441_v4 }
 0x68b   :  { %v6451_v60 = vpop.eup %6450  ;;  %v2686_v32 = vmul.f32 %v6449_v1, %v7741_v25 }
 0x68c   :  { %v6453_v36 = vpop.eup %6452  ;;  %v2681_v42 = vadd.f32 1.0, %v6451_v60 }
 0x68d   :  { %v7964_v39 = vadd.f32 %v2688_v49, %v2686_v32  ;;  %v2689_v19 = vmul.f32 %v6453_v36, %v6445_v58  ;;  %v6455_v35 = vpop.eup %6454 }
 0x68e   :  { %v2687_v2 = vmul.f32 %v6455_v35, %v7744_v59  ;;  %v6457_v44 = vpop.eup %6456  ;;  %v8943_v59 = vld [vmem:[#allocation20_spill] sm:$0xff] }
 0x68f   :  { %6458 = vtanh.f32 %v7964_v39 }
 0x690   :  { %v7967_v40 = vadd.f32 %v2689_v19, %v2687_v2  ;;  %6460 = vrcp.f32 %v2681_v42 }
 0x692   :  { %6462 = vtanh.f32 %v7967_v40 }
 0x699   :  { %v6459_v9 = vpop.eup %6458 }
 0x69a   :  { %v6461_v25 = vpop.eup %6460  ;;  %v2694_v62 = vmul.f32 %v6459_v9, %v6457_v44 }
 0x69c   :  { %v6463_v5 = vpop.eup %6462 }
 0x69d   :  { %v2695_v46 = vmul.f32 %v6463_v5, %v6461_v25 }
 0x69f   :  { %v7971_v38 = vpack.c.bf16 %v2695_v46, %v2694_v62 }
 0x6a1   :  { %2939 = vmatmul.mubr.bf16.vlgmr.msra.gmra.mrb[48].mxu0 %v7971_v38  ;;  %2982 = vmatmul.mubr.bf16.vlgmr.msra.gmra.mrb[64].mxu1 %v7971_v38 }
 0x6a2   :  { %3281 = vmatpush1.bf16.msra.mxu0 %v7767_v63  ;;  %3324 = vmatpush1.bf16.msra.mxu1 %v7772_v50  ;;  %v8944_v63 = vld [vmem:[#allocation38_spill] sm:$0xff] }
 0x6a3   :  { %3282 = vmatprep.subr.bf16.mxu0 %v7781_v13  ;;  %3325 = vmatprep.subr.bf16.mxu1 %v7786_v16  ;;  %v6170_v50 = vld [vmem:[#allocation4 + $0x4] ss:$16 sps:$4 sm:$0xff]   ;;  %v6173_v13 = vld [vmem:[#allocation4 + $0xc] ss:$16 sps:$4 sm:$0xff]   ;;  %v2992_v16 = vld [vmem:[%s8782_s3] sm:$0xf] }
 0x6a4   :  { %3312 = vmatprep.mubr.bf16.mxu0 %v8906_v61  ;;  %3355 = vmatprep.mubr.bf16.mxu1 %v8906_v61  ;;  %v3009_v1 = vrot.slane %v2992_v16, %v7332_v56  ;;  %v3005_v36 = vrot.slane %v2992_v16, %v7328_v54 }
 0x6a6   :  { %3283 = vmatpush1.bf16.msra.mxu0 %v7791_v55  ;;  %3326 = vmatpush1.bf16.msra.mxu1 %v7796_v47  ;;  %v8945_v55 = vld [vmem:[#allocation10_spill] sm:$0xff] }
 0x6a7   :  { %3284 = vmatprep.subr.bf16.mxu0 %v7805_v20  ;;  %3327 = vmatprep.subr.bf16.mxu1 %v7810_v29  ;;  %v2738_v47 = vunpack.c.l.bf16 %v8945_v55  ;;  %v8946_v20 = vld [vmem:[#allocation26_spill] sm:$0xff] }
 0x6a8   :  { %v2997_v29 = vrot.slane %v2992_v16, %v8946_v20 }
 0x6aa   :  { %3285 = vmatpush1.bf16.msra.mxu0 %v7815_v11  ;;  %3328 = vmatpush1.bf16.msra.mxu1 %v7820_v23  ;;  %v8947_v11 = vld [vmem:[#allocation32_spill] sm:$0xff] }
 0x6ab   :  { %3286 = vmatprep.subr.bf16.mxu0 %v7829_v41  ;;  %3329 = vmatprep.subr.bf16.mxu1 %v7834_v18  ;;  %v2740_v23 = vunpack.c.l.bf16 %v8947_v11 }
 0x6ae   :  { %3287 = vmatpush1.bf16.msra.mxu0 %v7839_v7  ;;  %3330 = vmatpush1.bf16.msra.mxu1 %v7844_v30  ;;  %v8948_v7 = vld [vmem:[#allocation11_spill] sm:$0xff] }
 0x6af   :  { %3288 = vmatprep.subr.bf16.mxu0 %v7858_v22  ;;  %3331 = vmatprep.subr.bf16.mxu1 %v7868_v45  ;;  %v2739_v30 = vunpack.c.l.bf16 %v8948_v7  ;;  %v2743_v0 = vunpack.c.h.bf16 %v8948_v7 }
 0x6b2   :  { %3289 = vmatpush1.bf16.msra.mxu0 %v7853_v28  ;;  %3332 = vmatpush1.bf16.msra.mxu1 %v7863_v24  ;;  %v8949_v28 = vld [vmem:[#allocation27_spill] sm:$0xff]  ;;  %v8950_v24 = vld [vmem:[#allocation33_spill] sm:$0xff] }
 0x6b3   :  { %3290 = vmatprep.subr.bf16.mxu0 %v7873_v52  ;;  %3333 = vmatprep.subr.bf16.mxu1 %v7879_v34  ;;  %v3001_v22 = vrot.slane %v2992_v16, %v8949_v28  ;;  %v2741_v45 = vunpack.c.l.bf16 %v8950_v24  ;;  %v2745_v3 = vunpack.c.h.bf16 %v8950_v24 }
 0x6b6   :  { %3291 = vmatpush1.bf16.msra.mxu0 %v7887_v21  ;;  %3334 = vmatpush1.bf16.msra.mxu1 %v7892_v26 }
 0x6b7   :  { %3292 = vmatprep.subr.bf16.mxu0 %v7899_v51  ;;  %3335 = vmatprep.subr.bf16.mxu1 %v7904_v15  ;;  %v2742_v51 = vunpack.c.h.bf16 %v8945_v55  ;;  %v2744_v15 = vunpack.c.h.bf16 %v8947_v11 }
 0x6ba   :  { %3293 = vmatpush1.bf16.msra.mxu0 %v7911_v27  ;;  %3336 = vmatpush1.bf16.msra.mxu1 %v7916_v6 }
 0x6bb   :  { %3294 = vmatprep.subr.bf16.mxu0 %v7923_v17  ;;  %3337 = vmatprep.subr.bf16.mxu1 %v7928_v8 }
 0x6be   :  { %3295 = vmatpush1.bf16.msra.mxu0 %v8943_v59  ;;  %3338 = vmatpush1.bf16.msra.mxu1 %v8944_v63 }
 0x6bf   :  { %3647 = vmatprep.subr.bf16.mxu0 %v6170_v50  ;;  %3760 = vmatprep.subr.bf16.mxu1 %v6173_v13 }
 0x774   :  { %v2940_v41 = vpop.f32.mrb[48].mxu0  ;;  %v2983_v18 = vpop.f32.mrb[64].mxu1 }
 0x775   :  { %v2941_v52 = vadd.f32 %v2940_v41, %v2738_v47  ;;  %v2984_v34 = vadd.f32 %v2983_v18, %v2740_v23  ;;  %v2942_v21 = vpop.f32.mrb[49].mxu0  ;;  %v2985_v26 = vpop.f32.mrb[65].mxu1 }
 0x776   :  { %v2943_v27 = vadd.f32 %v2942_v21, %v2739_v30  ;;  %v2986_v6 = vadd.f32 %v2985_v26, %v2741_v45  ;;  %v2944_v17 = vpop.f32.mrb[50].mxu0  ;;  %v2987_v8 = vpop.f32.mrb[66].mxu1 }
 0x777   :  { %v3014_v10 = vadd.f32 %v2997_v29, %v2941_v52  ;;  %v2945_v33 = vadd.f32 %v2944_v17, %v2742_v51  ;;  %v2988_v43 = vadd.f32 %v2987_v8, %v2744_v15  ;;  %v2946_v53 = vpop.f32.mrb[51].mxu0  ;;  %v2989_v12 = vpop.f32.mrb[67].mxu1  ;;  %v3016_v19 = vadd.f32 %v3005_v36, %v2984_v34  ;;  %v6171_v17 = vld [vmem:[#allocation4 + $0x8] ss:$16 sps:$4 sm:$0xff]  }
 0x778   :  { %v3015_v14 = vadd.f32 %v3001_v22, %v2943_v27  ;;  %v2947_v31 = vadd.f32 %v2946_v53, %v2743_v0  ;;  %v2990_v4 = vadd.f32 %v2989_v12, %v2745_v3  ;;  %v3017_v37 = vadd.f32 %v3009_v1, %v2986_v6  ;;  %v6168_v6 = vld [vmem:[#allocation4] ss:$16 sps:$4 sm:$0xff]   ;;  %v6176_v0 = vld [vmem:[#allocation4 + $0x24] ss:$16 sps:$4 sm:$0xff]   ;;  %v6183_v12 = vld [vmem:[#allocation4 + $0x48] ss:$16 sps:$4 sm:$0xff]  }
 0x779   :  { %v5807_v48 = vmul.f32 -1.442695, %v3014_v10  ;;  %v3018_v58 = vadd.f32 %v2997_v29, %v2945_v33  ;;  %v3020_v2 = vadd.f32 %v3005_v36, %v2988_v43  ;;  %v6174_v3 = vld [vmem:[#allocation4 + $0x20] ss:$16 sps:$4 sm:$0xff]   ;;  %v6177_v10 = vld [vmem:[#allocation4 + $0x28] ss:$16 sps:$4 sm:$0xff]  }
 0x77a   :  { %v5809_v57 = vmul.f32 -1.442695, %v3015_v14  ;;  %v3019_v49 = vadd.f32 %v3001_v22, %v2947_v31  ;;  %v5811_v35 = vmul.f32 -1.442695, %v3017_v37  ;;  %v3021_v42 = vadd.f32 %v3009_v1, %v2990_v4  ;;  %v6182_v33 = vld [vmem:[#allocation4 + $0x44] ss:$16 sps:$4 sm:$0xff]  }
 0x77b   :  { %6464 = vpow2.f32 %v5807_v48  ;;  %v5808_v60 = vmul.f32 -1.442695, %v3018_v58  ;;  %v6185_v43 = vld [vmem:[#allocation4 + $0x4c] ss:$16 sps:$4 sm:$0xff]   ;;  %v6180_v53 = vld [vmem:[#allocation4 + $0x40] ss:$16 sps:$4 sm:$0xff]  }
 0x77c   :  { %6466 = vpow2.f32 %v5809_v57  ;;  %v5810_v32 = vmul.f32 -1.442695, %v3019_v49  ;;  %v5812_v5 = vmul.f32 -1.442695, %v3021_v42  ;;  %v6188_v14 = vld [vmem:[#allocation4 + $0x64] ss:$16 sps:$4 sm:$0xff]  }
 0x77d   :  { %6468 = vpow2.f32 %v5808_v60  ;;  %v6191_v31 = vld [vmem:[#allocation4 + $0x6c] ss:$16 sps:$4 sm:$0xff]   ;;  %v6186_v4 = vld [vmem:[#allocation4 + $0x60] ss:$16 sps:$4 sm:$0xff]   ;;  %v6189_v48 = vld [vmem:[#allocation4 + $0x68] ss:$16 sps:$4 sm:$0xff]  }
 0x77e   :  { %6470 = vpow2.f32 %v5810_v32  ;;  %v6194_v58 = vld [vmem:[#allocation4 + $0x84] ss:$16 sps:$4 sm:$0xff]   ;;  %v6197_v57 = vld [vmem:[#allocation4 + $0x8c] ss:$16 sps:$4 sm:$0xff]   ;;  %v6192_v1 = vld [vmem:[#allocation4 + $0x80] ss:$16 sps:$4 sm:$0xff]  }
 0x77f   :  { %6472 = vtanh.f32 %v3016_v19  ;;  %v6195_v49 = vld [vmem:[#allocation4 + $0x88] ss:$16 sps:$4 sm:$0xff]   ;;  %v6200_v60 = vld [vmem:[#allocation4 + $0xa4] ss:$16 sps:$4 sm:$0xff]   ;;  %v6203_v32 = vld [vmem:[#allocation4 + $0xac] ss:$16 sps:$4 sm:$0xff]  }
 0x780   :  { %6474 = vpow2.f32 %v5811_v35  ;;  %v6198_v36 = vld [vmem:[#allocation4 + $0xa0] ss:$16 sps:$4 sm:$0xff]   ;;  %v6201_v37 = vld [vmem:[#allocation4 + $0xa8] ss:$16 sps:$4 sm:$0xff]   ;;  %v6206_v19 = vld [vmem:[#allocation4 + $0xc4] ss:$16 sps:$4 sm:$0xff]  }
 0x781   :  { %6476 = vtanh.f32 %v3020_v2  ;;  %v6209_v35 = vld [vmem:[#allocation4 + $0xcc] ss:$16 sps:$4 sm:$0xff]   ;;  %v6204_v42 = vld [vmem:[#allocation4 + $0xc0] ss:$16 sps:$4 sm:$0xff]   ;;  %v6207_v2 = vld [vmem:[#allocation4 + $0xc8] ss:$16 sps:$4 sm:$0xff]  }
 0x785   :  { %v6465_v44 = vpop.eup %6464 }
 0x786   :  { %v6467_v9 = vpop.eup %6466  ;;  %v3028_v25 = vadd.f32 1.0, %v6465_v44  ;;  %v6212_v44 = vld [vmem:[#allocation4 + $0xe4] ss:$16 sps:$4 sm:$0xff]  }
 0x787   :  { %v3040_v62 = vadd.f32 1.0, %v6467_v9  ;;  %v6469_v46 = vpop.eup %6468  ;;  %v6215_v9 = vld [vmem:[#allocation4 + $0xec] ss:$16 sps:$4 sm:$0xff]  }
 0x788   :  { %6478 = vrcp.f32 %v3028_v25  ;;  %v3029_v59 = vadd.f32 1.0, %v6469_v46  ;;  %v6471_v63 = vpop.eup %6470  ;;  %v6210_v25 = vld [vmem:[#allocation4 + $0xe0] ss:$16 sps:$4 sm:$0xff]  }
 0x789   :  { %6480 = vrcp.f32 %v3040_v62  ;;  %v3041_v50 = vadd.f32 1.0, %v6471_v63  ;;  %v6473_v13 = vpop.eup %6472  ;;  %v8036_v62 = vld [vmem:[#allocation6 + $0x4] ss:$16 sps:$4 sm:$0xff]   ;;  %v8039_v46 = vld [vmem:[#allocation6] ss:$16 sps:$4 sm:$0xff]   ;;  %v8953_v63 = vld [vmem:[#allocation37_spill] sm:$0xff] }
 0x78a   :  { %6482 = vpow2.f32 %v5812_v5  ;;  %v6475_v16 = vpop.eup %6474  ;;  %v6213_v5 = vld [vmem:[#allocation4 + $0xe8] ss:$16 sps:$4 sm:$0xff]   ;;  %8951 = vst [vmem:[#allocation39_spill] sm:$0xff] %v8036_v62 }
 0x78b   :  { %6484 = vrcp.f32 %v3029_v59  ;;  %v6477_v55 = vpop.eup %6476  ;;  %v3054_v7 = vadd.f32 1.0, %v6475_v16  ;;  %v8952_v59 = vld [vmem:[#allocation36_spill] sm:$0xff]  ;;  %v8956_v16 = vld [vmem:[#allocation15_spill] sm:$0xff] }
 0x78c   :  { %6486 = vrcp.f32 %v3041_v50  ;;  %v8954_v50 = vld [vmem:[#allocation14_spill] sm:$0xff] }
 0x78d   :  { %6488 = vrcp.f32 %v3054_v7  ;;  %v8091_v7 = vld [vmem:[#allocation6 + $0x4c] ss:$16 sps:$4 sm:$0xff]  }
 0x792   :  { %v6479_v47 = vpop.eup %6478 }
 0x793   :  { %v6481_v29 = vpop.eup %6480  ;;  %v3062_v11 = vmul.f32 %v6479_v47, %v6473_v13  ;;  %v8955_v13 = vld [vmem:[#allocation18_spill] sm:$0xff]  ;;  %v8072_v47 = vld [vmem:[#allocation6 + $0x8] ss:$16 sps:$4 sm:$0xff]  }
 0x794   :  { %v6483_v23 = vpop.eup %6482  ;;  %v3060_v41 = vmul.f32 %v6481_v29, %v7964_v39  ;;  %v8078_v29 = vld [vmem:[#allocation6 + $0x2c] ss:$16 sps:$4 sm:$0xff]  }
 0x795   :  { %v6485_v18 = vpop.eup %6484  ;;  %v3055_v45 = vadd.f32 1.0, %v6483_v23  ;;  %v8082_v23 = vld [vmem:[#allocation6 + $0x44] ss:$16 sps:$4 sm:$0xff]  }
 0x796   :  { %v8023_v30 = vadd.f32 %v3062_v11, %v3060_v41  ;;  %v3063_v22 = vmul.f32 %v6485_v18, %v6477_v55  ;;  %v6487_v24 = vpop.eup %6486  ;;  %v8070_v55 = vld [vmem:[#allocation6 + $0xc] ss:$16 sps:$4 sm:$0xff]   ;;  %v8080_v11 = vld [vmem:[#allocation6 + $0x20] ss:$16 sps:$4 sm:$0xff]   ;;  %v8086_v41 = vld [vmem:[#allocation6 + $0x28] ss:$16 sps:$4 sm:$0xff]  }
 0x797   :  { %v3061_v52 = vmul.f32 %v6487_v24, %v7967_v40  ;;  %v6489_v21 = vpop.eup %6488  ;;  %v6179_v40 = vld [vmem:[#allocation4 + $0x2c] ss:$16 sps:$4 sm:$0xff]   ;;  %8957 = vst [vmem:[#allocation16_spill] sm:$0xff] %v8070_v55  ;;  %v8089_v18 = vld [vmem:[#allocation6 + $0x40] ss:$16 sps:$4 sm:$0xff]  }
 0x798   :  { %6490 = vtanh.f32 %v8023_v30  ;;  %v8097_v24 = vld [vmem:[#allocation6 + $0x48] ss:$16 sps:$4 sm:$0xff]  }
 0x799   :  { %v8026_v34 = vadd.f32 %v3063_v22, %v3061_v52  ;;  %6492 = vrcp.f32 %v3055_v45  ;;  %v8094_v22 = vld [vmem:[#allocation6 + $0x64] ss:$16 sps:$4 sm:$0xff]   ;;  %v8100_v45 = vld [vmem:[#allocation6 + $0x6c] ss:$16 sps:$4 sm:$0xff]   ;;  %v8103_v52 = vld [vmem:[#allocation6 + $0x60] ss:$16 sps:$4 sm:$0xff]  }
 0x79b   :  { %6494 = vtanh.f32 %v8026_v34 }
 0x7a2   :  { %v6491_v26 = vpop.eup %6490 }
 0x7a3   :  { %v6493_v39 = vpop.eup %6492  ;;  %v3068_v15 = vmul.f32 %v6491_v26, %v6489_v21  ;;  %v8106_v21 = vld [vmem:[#allocation6 + $0x84] ss:$16 sps:$4 sm:$0xff]   ;;  %v8109_v26 = vld [vmem:[#allocation6 + $0x68] ss:$16 sps:$4 sm:$0xff]  }
 0x7a5   :  { %v6495_v51 = vpop.eup %6494 }
 0x7a6   :  { %v3069_v27 = vmul.f32 %v6495_v51, %v6493_v39  ;;  %v8112_v39 = vld [vmem:[#allocation6 + $0x8c] ss:$16 sps:$4 sm:$0xff]   ;;  %v8115_v51 = vld [vmem:[#allocation6 + $0x80] ss:$16 sps:$4 sm:$0xff]  }
 0x7a8   :  { %v8030_v8 = vpack.c.bf16 %v3069_v27, %v3068_v15  ;;  %v8118_v15 = vld [vmem:[#allocation6 + $0xa4] ss:$16 sps:$4 sm:$0xff]   ;;  %v8121_v27 = vld [vmem:[#allocation6 + $0x88] ss:$16 sps:$4 sm:$0xff]  }
 0x7aa   :  { %3313 = vmatmul.mubr.bf16.vlgmr.msra.gmra.mrb[52].mxu0 %v8030_v8  ;;  %3356 = vmatmul.mubr.bf16.vlgmr.msra.gmra.mrb[68].mxu1 %v8030_v8 }
 0x7ab   :  { %3648 = vmatpush1.bf16.msra.mxu0 %v6168_v6  ;;  %3761 = vmatpush1.bf16.msra.mxu1 %v6171_v17  ;;  %v8125_v6 = vld [vmem:[#allocation6 + $0xa0] ss:$16 sps:$4 sm:$0xff]   ;;  %v8128_v17 = vld [vmem:[#allocation6 + $0xc4] ss:$16 sps:$4 sm:$0xff]  }
 0x7ac   :  { %3649 = vmatprep.subr.bf16.mxu0 %v6176_v0  ;;  %3762 = vmatprep.subr.bf16.mxu1 %v6179_v40  ;;  %v8133_v0 = vld [vmem:[#allocation6 + $0xa8] ss:$16 sps:$4 sm:$0xff]   ;;  %v8137_v40 = vld [vmem:[#allocation6 + $0xc0] ss:$16 sps:$4 sm:$0xff]  }
 0x7ad   :  { %3679 = vmatprep.mubr.bf16.mxu0 %v8906_v61  ;;  %3792 = vmatprep.mubr.bf16.mxu1 %v8906_v61 }
 0x7af   :  { %3650 = vmatpush1.bf16.msra.mxu0 %v6174_v3  ;;  %3763 = vmatpush1.bf16.msra.mxu1 %v6177_v10  ;;  %v8141_v3 = vld [vmem:[#allocation6 + $0xe4] ss:$16 sps:$4 sm:$0xff]   ;;  %v8143_v10 = vld [vmem:[#allocation6 + $0xcc] ss:$16 sps:$4 sm:$0xff]  }
 0x7b0   :  { %3651 = vmatprep.subr.bf16.mxu0 %v6182_v33  ;;  %3764 = vmatprep.subr.bf16.mxu1 %v6185_v43  ;;  %v8145_v33 = vld [vmem:[#allocation6 + $0xc8] ss:$16 sps:$4 sm:$0xff]   ;;  %v8149_v43 = vld [vmem:[#allocation6 + $0xe0] ss:$16 sps:$4 sm:$0xff]  }
 0x7b1   :  { %8958 = vst [vmem:[#allocation22_spill] sm:$0xff] %v8149_v43 }
 0x7b3   :  { %3652 = vmatpush1.bf16.msra.mxu0 %v6180_v53  ;;  %3765 = vmatpush1.bf16.msra.mxu1 %v6183_v12  ;;  %v8153_v53 = vld [vmem:[#allocation6 + $0xec] ss:$16 sps:$4 sm:$0xff]   ;;  %v8155_v12 = vld [vmem:[#allocation6 + $0xe8] ss:$16 sps:$4 sm:$0xff]  }
 0x7b4   :  { %3653 = vmatprep.subr.bf16.mxu0 %v6188_v14  ;;  %3766 = vmatprep.subr.bf16.mxu1 %v6191_v31  ;;  %8959 = vst [vmem:[#allocation17_spill] sm:$0xff] %v8155_v12  ;;  %v3366_v14 = vld [vmem:[%s8782_s3] sm:$0xf]  ;;  %v8960_v31 = vld [vmem:[#allocation12_spill] sm:$0xff] }
 0x7b7   :  { %3654 = vmatpush1.bf16.msra.mxu0 %v6186_v4  ;;  %3767 = vmatpush1.bf16.msra.mxu1 %v6189_v48  ;;  %v3112_v4 = vunpack.c.l.bf16 %v8960_v31  ;;  %v3371_v48 = vrot.slane %v3366_v14, %v8946_v20 }
 0x7b8   :  { %3655 = vmatprep.subr.bf16.mxu0 %v6194_v58  ;;  %3768 = vmatprep.subr.bf16.mxu1 %v6197_v57  ;;  %v8961_v58 = vld [vmem:[#allocation34_spill] sm:$0xff] }
 0x7b9   :  { %v3114_v57 = vunpack.c.l.bf16 %v8961_v58 }
 0x7bb   :  { %3656 = vmatpush1.bf16.msra.mxu0 %v6192_v1  ;;  %3769 = vmatpush1.bf16.msra.mxu1 %v6195_v49 }
 0x7bc   :  { %3657 = vmatprep.subr.bf16.mxu0 %v6200_v60  ;;  %3770 = vmatprep.subr.bf16.mxu1 %v6203_v32  ;;  %v8962_v60 = vld [vmem:[#allocation13_spill] sm:$0xff] }
 0x7bd   :  { %v3113_v32 = vunpack.c.l.bf16 %v8962_v60 }
 0x7bf   :  { %3658 = vmatpush1.bf16.msra.mxu0 %v6198_v36  ;;  %3771 = vmatpush1.bf16.msra.mxu1 %v6201_v37  ;;  %v3375_v36 = vrot.slane %v3366_v14, %v8949_v28  ;;  %v8963_v37 = vld [vmem:[#allocation35_spill] sm:$0xff] }
 0x7c0   :  { %3659 = vmatprep.subr.bf16.mxu0 %v6206_v19  ;;  %3772 = vmatprep.subr.bf16.mxu1 %v6209_v35  ;;  %v3115_v19 = vunpack.c.l.bf16 %v8963_v37 }
 0x7c3   :  { %3660 = vmatpush1.bf16.msra.mxu0 %v6204_v42  ;;  %3773 = vmatpush1.bf16.msra.mxu1 %v6207_v2 }
 0x7c4   :  { %3661 = vmatprep.subr.bf16.mxu0 %v6212_v44  ;;  %3774 = vmatprep.subr.bf16.mxu1 %v6215_v9  ;;  %v3116_v9 = vunpack.c.h.bf16 %v8960_v31 }
 0x7c7   :  { %3662 = vmatpush1.bf16.msra.mxu0 %v6210_v25  ;;  %3775 = vmatpush1.bf16.msra.mxu1 %v6213_v5  ;;  %v3118_v25 = vunpack.c.h.bf16 %v8961_v58  ;;  %v3383_v58 = vrot.slane %v3366_v14, %v7332_v56 }
 0x7c8   :  { %4141 = vmatprep.subr.bf16.mxu0 %v8036_v62  ;;  %4184 = vmatprep.subr.bf16.mxu1 %v8070_v55 }
 0x7ca   :  { %3680 = vmatmul.mubr.bf16.vlgmr.msra.gmra.mrb[56].mxu0 %v8952_v59  ;;  %3793 = vmatmul.mubr.bf16.vlgmr.msra.gmra.mrb[72].mxu1 %v8952_v59 }
 0x7cb   :  { %3689 = vmatprep.mubr.bf16.mxu0 %v8906_v61  ;;  %3802 = vmatprep.mubr.bf16.mxu1 %v8906_v61 }
 0x7cc   :  { %4142 = vmatpush1.bf16.msra.mxu0 %v8039_v46  ;;  %4185 = vmatpush1.bf16.msra.mxu1 %v8072_v47 }
 0x7cd   :  { %4186 = vmatprep.subr.bf16.mxu1 %v8078_v29 }
 0x7d0   :  { %4187 = vmatpush1.bf16.msra.mxu1 %v8086_v41 }
 0x7d1   :  { %4188 = vmatprep.subr.bf16.mxu1 %v8091_v7 }
 0x7d2   :  { %3690 = vmatmul.mubr.bf16.gmra.mrb[60].mxu0 %v8953_v63  ;;  %3803 = vmatmul.mubr.bf16.gmra.mrb[76].mxu1 %v8953_v63 }
 0x7d3   :  { %3699 = vmatprep.mubr.bf16.mxu0 %v8906_v61  ;;  %3812 = vmatprep.mubr.bf16.mxu1 %v8906_v61 }
 0x7d4   :  { %4189 = vmatpush1.bf16.msra.mxu1 %v8097_v24 }
 0x7d5   :  { %4190 = vmatprep.subr.bf16.mxu1 %v8100_v45 }
 0x7d8   :  { %4191 = vmatpush1.bf16.msra.mxu1 %v8109_v26 }
 0x7d9   :  { %4192 = vmatprep.subr.bf16.mxu1 %v8112_v39 }
 0x7da   :  { %3700 = vmatmul.mubr.bf16.gmra.mrb[64].mxu0 %v8954_v50  ;;  %3813 = vmatmul.mubr.bf16.gmra.mrb[80].mxu1 %v8954_v50 }
 0x7db   :  { %3709 = vmatprep.mubr.bf16.mxu0 %v8906_v61  ;;  %3822 = vmatprep.mubr.bf16.mxu1 %v8906_v61 }
 0x7dc   :  { %4193 = vmatpush1.bf16.msra.mxu1 %v8121_v27 }
 0x7e2   :  { %3710 = vmatmul.mubr.bf16.gmra.mrb[68].mxu0 %v8955_v13  ;;  %3823 = vmatmul.mubr.bf16.gmra.mrb[84].mxu1 %v8955_v13  ;;  %v3117_v13 = vunpack.c.h.bf16 %v8962_v60 }
 0x7e3   :  { %3719 = vmatprep.mubr.bf16.mxu0 %v8906_v61  ;;  %3832 = vmatprep.mubr.bf16.mxu1 %v8906_v61 }
 0x7ea   :  { %3720 = vmatmul.mubr.bf16.gmra.mrb[72].mxu0 %v8956_v16  ;;  %3833 = vmatmul.mubr.bf16.gmra.mrb[88].mxu1 %v8956_v16  ;;  %v3119_v16 = vunpack.c.h.bf16 %v8963_v37  ;;  %v3379_v37 = vrot.slane %v3366_v14, %v7328_v54 }
 0x7eb   :  { %3729 = vmatprep.mubr.bf16.mxu0 %v8906_v61  ;;  %3842 = vmatprep.mubr.bf16.mxu1 %v8906_v61 }
 0x7f2   :  { %3730 = vmatmul.mubr.bf16.gmra.mrb[76].mxu0 %v7971_v38  ;;  %3843 = vmatmul.mubr.bf16.gmra.mrb[92].mxu1 %v7971_v38  ;;  %v8076_v38 = vld [vmem:[#allocation6 + $0x24] ss:$16 sps:$4 sm:$0xff]  }
 0x7f3   :  { %3739 = vmatprep.mubr.bf16.mxu0 %v8906_v61  ;;  %3852 = vmatprep.mubr.bf16.mxu1 %v8906_v61 }
 0x7f4   :  { %4143 = vmatprep.subr.bf16.mxu0 %v8076_v38 }
 0x7f5   :  { %4144 = vmatpush1.bf16.msra.mxu0 %v8080_v11 }
 0x7f6   :  { %4145 = vmatprep.subr.bf16.mxu0 %v8082_v23 }
 0x7f9   :  { %4146 = vmatpush1.bf16.msra.mxu0 %v8089_v18 }
 0x7fa   :  { %3740 = vmatmul.mubr.bf16.gmra.mrb[80].mxu0 %v8030_v8  ;;  %3853 = vmatmul.mubr.bf16.gmra.mrb[96].mxu1 %v8030_v8  ;;  %v8131_v8 = vld [vmem:[#allocation6 + $0xac] ss:$16 sps:$4 sm:$0xff]  }
 0x7fb   :  { %3749 = vmatprep.mubr.bf16.mxu0 %v8906_v61  ;;  %3862 = vmatprep.mubr.bf16.mxu1 %v8906_v61 }
 0x7fc   :  { %4147 = vmatprep.subr.bf16.mxu0 %v8094_v22  ;;  %4194 = vmatprep.subr.bf16.mxu1 %v8131_v8 }
 0x7fd   :  { %4148 = vmatpush1.bf16.msra.mxu0 %v8103_v52  ;;  %4195 = vmatpush1.bf16.msra.mxu1 %v8133_v0 }
 0x7fe   :  { %4149 = vmatprep.subr.bf16.mxu0 %v8106_v21  ;;  %4196 = vmatprep.subr.bf16.mxu1 %v8143_v10 }
 0x801   :  { %4150 = vmatpush1.bf16.msra.mxu0 %v8115_v51  ;;  %4197 = vmatpush1.bf16.msra.mxu1 %v8145_v33 }
 0x802   :  { %4151 = vmatprep.subr.bf16.mxu0 %v8118_v15  ;;  %4198 = vmatprep.subr.bf16.mxu1 %v8153_v53 }
 0x805   :  { %4152 = vmatpush1.bf16.msra.mxu0 %v8125_v6  ;;  %4199 = vmatpush1.bf16.msra.mxu1 %v8155_v12 }
 0x806   :  { %4153 = vmatprep.subr.bf16.mxu0 %v8128_v17  ;;  %4361 = vmatprep.subr.bf16.mxu1 %v8070_v55 }
 0x809   :  { %4154 = vmatpush1.bf16.msra.mxu0 %v8137_v40 }
 0x80a   :  { %4155 = vmatprep.subr.bf16.mxu0 %v8141_v3 }
 0x80d   :  { %4156 = vmatpush1.bf16.msra.mxu0 %v8149_v43 }
 0x80e   :  { %4318 = vmatprep.subr.bf16.mxu0 %v8036_v62 }
 0x87d   :  { %v3314_v1 = vpop.f32.mrb[52].mxu0  ;;  %v3357_v49 = vpop.f32.mrb[68].mxu1 }
 0x87e   :  { %v3315_v35 = vadd.f32 %v3314_v1, %v3112_v4  ;;  %v3358_v42 = vadd.f32 %v3357_v49, %v3114_v57  ;;  %v3316_v2 = vpop.f32.mrb[53].mxu0  ;;  %v3359_v44 = vpop.f32.mrb[69].mxu1 }
 0x87f   :  { %v3317_v5 = vadd.f32 %v3316_v2, %v3113_v32  ;;  %v3360_v59 = vadd.f32 %v3359_v44, %v3115_v19  ;;  %v3318_v63 = vpop.f32.mrb[54].mxu0  ;;  %v3361_v50 = vpop.f32.mrb[70].mxu1 }
 0x880   :  { %v3388_v20 = vadd.f32 %v3371_v48, %v3315_v35  ;;  %v3319_v28 = vadd.f32 %v3318_v63, %v3116_v9  ;;  %v3362_v55 = vadd.f32 %v3361_v50, %v3118_v25  ;;  %v3320_v62 = vpop.f32.mrb[55].mxu0  ;;  %v3363_v4 = vpop.f32.mrb[71].mxu1  ;;  %v3390_v2 = vadd.f32 %v3379_v37, %v3358_v42 }
 0x881   :  { %v3389_v57 = vadd.f32 %v3375_v36, %v3317_v5  ;;  %v3321_v1 = vadd.f32 %v3320_v62, %v3117_v13  ;;  %v3364_v49 = vadd.f32 %v3363_v4, %v3119_v16  ;;  %v3391_v35 = vadd.f32 %v3383_v58, %v3360_v59 }
 0x882   :  { %v5845_v12 = vmul.f32 -1.442695, %v3388_v20  ;;  %v3392_v31 = vadd.f32 %v3371_v48, %v3319_v28  ;;  %v3394_v62 = vadd.f32 %v3379_v37, %v3362_v55 }
 0x883   :  { %v5847_v43 = vmul.f32 -1.442695, %v3389_v57  ;;  %v3393_v32 = vadd.f32 %v3375_v36, %v3321_v1  ;;  %v5849_v44 = vmul.f32 -1.442695, %v3391_v35  ;;  %v3395_v9 = vadd.f32 %v3383_v58, %v3364_v49 }
 0x884   :  { %6496 = vpow2.f32 %v5845_v12  ;;  %v5846_v19 = vmul.f32 -1.442695, %v3392_v31 }
 0x885   :  { %6498 = vpow2.f32 %v5847_v43  ;;  %v5848_v60 = vmul.f32 -1.442695, %v3393_v32  ;;  %v5850_v48 = vmul.f32 -1.442695, %v3395_v9 }
 0x886   :  { %6500 = vpow2.f32 %v5846_v19 }
 0x887   :  { %6502 = vpow2.f32 %v5848_v60 }
 0x888   :  { %6504 = vtanh.f32 %v3390_v2 }
 0x889   :  { %6506 = vpow2.f32 %v5849_v44 }
 0x88a   :  { %6508 = vtanh.f32 %v3394_v62 }
 0x88e   :  { %v6497_v25 = vpop.eup %6496 }
 0x88f   :  { %v6499_v20 = vpop.eup %6498  ;;  %v3402_v28 = vadd.f32 1.0, %v6497_v25 }
 0x890   :  { %v3414_v36 = vadd.f32 1.0, %v6499_v20  ;;  %v6501_v12 = vpop.eup %6500 }
 0x891   :  { %6510 = vrcp.f32 %v3402_v28  ;;  %v3403_v43 = vadd.f32 1.0, %v6501_v12  ;;  %v6503_v14 = vpop.eup %6502 }
 0x892   :  { %6512 = vrcp.f32 %v3414_v36  ;;  %v3415_v5 = vadd.f32 1.0, %v6503_v14  ;;  %v6505_v42 = vpop.eup %6504 }
 0x893   :  { %6514 = vpow2.f32 %v5850_v48  ;;  %v6507_v59 = vpop.eup %6506 }
 0x894   :  { %6516 = vrcp.f32 %v3403_v43  ;;  %v6509_v55 = vpop.eup %6508  ;;  %v3428_v16 = vadd.f32 1.0, %v6507_v59 }
 0x895   :  { %6518 = vrcp.f32 %v3415_v5 }
 0x896   :  { %6520 = vrcp.f32 %v3428_v16 }
 0x89b   :  { %v6511_v63 = vpop.eup %6510 }
 0x89c   :  { %v6513_v50 = vpop.eup %6512  ;;  %v3436_v13 = vmul.f32 %v6511_v63, %v6505_v42 }
 0x89d   :  { %v6515_v4 = vpop.eup %6514  ;;  %v3434_v57 = vmul.f32 %v6513_v50, %v8023_v30  ;;  %v3681_v1 = vpop.f32.mrb[56].mxu0 }
 0x89e   :  { %v3794_v49 = vpop.f32.mrb[72].mxu1  ;;  %v6517_v31 = vpop.eup %6516  ;;  %v3429_v44 = vadd.f32 1.0, %v6515_v4 }
 0x89f   :  { %v3683_v58 = vpop.f32.mrb[57].mxu0  ;;  %v3796_v32 = vpop.f32.mrb[73].mxu1  ;;  %v3437_v19 = vmul.f32 %v6517_v31, %v6509_v55  ;;  %v3438_v35 = vadd.f32 %v3436_v13, %v3434_v57 }
 0x8a0   :  { %v3685_v60 = vpop.f32.mrb[58].mxu0  ;;  %v3798_v37 = vpop.f32.mrb[74].mxu1 }
 0x8a1   :  { %v6519_v2 = vpop.eup %6518  ;;  %v8178_v9 = vpack.c.bf16 %v3685_v60, %v3681_v1  ;;  %v8180_v62 = vpack.c.bf16 %v3798_v37, %v3794_v49  ;;  %v3687_v25 = vpop.f32.mrb[59].mxu0  ;;  %6522 = vtanh.f32 %v3438_v35 }
 0x8a2   :  { %v3800_v20 = vpop.f32.mrb[75].mxu1  ;;  %v3435_v30 = vmul.f32 %v6519_v2, %v8026_v34  ;;  %v8183_v28 = vpack.c.bf16 %v3687_v25, %v3683_v58  ;;  %6524 = vrcp.f32 %v3429_v44  ;;  %v6521_v4 = vpop.eup %6520 }
 0x8a3   :  { %v8185_v48 = vpack.c.bf16 %v3800_v20, %v3796_v32 }
 0x8a4   :  { %v3439_v36 = vadd.f32 %v3437_v19, %v3435_v30 }
 0x8a5   :  { %v3691_v12 = vpop.f32.mrb[60].mxu0  ;;  %v3804_v43 = vpop.f32.mrb[76].mxu1 }
 0x8a6   :  { %6526 = vtanh.f32 %v3439_v36  ;;  %v3693_v14 = vpop.f32.mrb[61].mxu0  ;;  %v3806_v5 = vpop.f32.mrb[77].mxu1 }
 0x8a7   :  { %v3695_v42 = vpop.f32.mrb[62].mxu0  ;;  %v3808_v59 = vpop.f32.mrb[78].mxu1 }
 0x8a8   :  { %v8187_v55 = vpack.c.bf16 %v3695_v42, %v3691_v12  ;;  %v8189_v63 = vpack.c.bf16 %v3808_v59, %v3804_v43  ;;  %v3697_v50 = vpop.f32.mrb[63].mxu0  ;;  %v3810_v34 = vpop.f32.mrb[79].mxu1 }
 0x8a9   :  { %v8191_v13 = vpack.c.bf16 %v3697_v50, %v3693_v14  ;;  %v8193_v16 = vpack.c.bf16 %v3810_v34, %v3806_v5 }
 0x8aa   :  { %8964 = vst [vmem:[#allocation24_spill] sm:$0xff] %v8187_v55  ;;  %8965 = vst [vmem:[#allocation40_spill] sm:$0xff] %v8189_v63 }
 0x8ab   :  { %8966 = vst [vmem:[#allocation41_spill] sm:$0xff] %v8191_v13  ;;  %8967 = vst [vmem:[#allocation19_spill] sm:$0xff] %v8193_v16  ;;  %v6523_v57 = vpop.eup %6522 }
 0x8ac   :  { %v3442_v1 = vmul.f32 %v6523_v57, %v6521_v4  ;;  %v6525_v58 = vpop.eup %6524 }
 0x8ad   :  { %v3701_v49 = vpop.f32.mrb[64].mxu0  ;;  %v3814_v31 = vpop.f32.mrb[80].mxu1 }
 0x8ae   :  { %v3703_v32 = vpop.f32.mrb[65].mxu0  ;;  %v3816_v19 = vpop.f32.mrb[81].mxu1 }
 0x8af   :  { %v3705_v37 = vpop.f32.mrb[66].mxu0  ;;  %v3818_v35 = vpop.f32.mrb[82].mxu1 }
 0x8b0   :  { %v6527_v60 = vpop.eup %6526  ;;  %v8195_v2 = vpack.c.bf16 %v3705_v37, %v3701_v49  ;;  %v8197_v44 = vpack.c.bf16 %v3818_v35, %v3814_v31  ;;  %v3707_v25 = vpop.f32.mrb[67].mxu0 }
 0x8b1   :  { %v3820_v20 = vpop.f32.mrb[83].mxu1  ;;  %v3443_v30 = vmul.f32 %v6527_v60, %v6525_v58  ;;  %v8199_v36 = vpack.c.bf16 %v3707_v25, %v3703_v32 }
 0x8b2   :  { %8968 = vst [vmem:[#allocation28_spill] sm:$0xff] %v8195_v2  ;;  %8969 = vst [vmem:[#allocation21_spill] sm:$0xff] %v8197_v44  ;;  %v8201_v12 = vpack.c.bf16 %v3820_v20, %v3816_v19  ;;  %v3980_v2 = vunpack.c.h.bf16 %v8185_v48 }
 0x8b3   :  { %8970 = vst [vmem:[#allocation29_spill] sm:$0xff] %v8199_v36  ;;  %v3444_v43 = vpack.c.bf16 %v3443_v30, %v3442_v1 }
 0x8b4   :  { %8971 = vst [vmem:[#allocation23_spill] sm:$0xff] %v8201_v12 }
 0x8b5   :  { %3750 = vmatmul.mubr.bf16.gmra.mrb[84].mxu0 %v3444_v43  ;;  %3863 = vmatmul.mubr.bf16.gmra.mrb[100].mxu1 %v3444_v43  ;;  %v3711_v14 = vpop.f32.mrb[68].mxu0  ;;  %v3824_v5 = vpop.f32.mrb[84].mxu1 }
 0x8b6   :  { %4173 = vmatprep.mubr.bf16.mxu0 %v8906_v61  ;;  %4216 = vmatprep.mubr.bf16.mxu1 %v8906_v61  ;;  %v3713_v42 = vpop.f32.mrb[69].mxu0  ;;  %v3826_v59 = vpop.f32.mrb[85].mxu1 }
 0x8b7   :  { %v3715_v50 = vpop.f32.mrb[70].mxu0  ;;  %v3828_v34 = vpop.f32.mrb[86].mxu1 }
 0x8b8   :  { %v8205_v4 = vpack.c.bf16 %v3715_v50, %v3711_v14  ;;  %v8207_v57 = vpack.c.bf16 %v3828_v34, %v3824_v5  ;;  %v3717_v49 = vpop.f32.mrb[71].mxu0  ;;  %v3830_v31 = vpop.f32.mrb[87].mxu1 }
 0x8b9   :  { %v8209_v58 = vpack.c.bf16 %v3717_v49, %v3713_v42  ;;  %v8211_v1 = vpack.c.bf16 %v3830_v31, %v3826_v59 }
 0x8ba   :  { %8972 = vst [vmem:[#allocation30_spill] sm:$0xff] %v8205_v4  ;;  %8973 = vst [vmem:[#allocation25_spill] sm:$0xff] %v8207_v57  ;;  %v3973_v57 = vunpack.c.l.bf16 %v8178_v9  ;;  %v3976_v4 = vunpack.c.l.bf16 %v8185_v48 }
 0x8bb   :  { %8974 = vst [vmem:[#allocation31_spill] sm:$0xff] %v8209_v58  ;;  %8975 = vst [vmem:[#allocation20_spill] sm:$0xff] %v8211_v1  ;;  %v8996_v1 = vld [vmem:[#allocation26_spill] sm:$0xff] }
 0x8bd   :  { %4174 = vmatmul.mubr.bf16.vlgmr.msra.gmra.mrb[88].mxu0 %v8906_v61  ;;  %4217 = vmatmul.mubr.bf16.vlgmr.msra.gmra.mrb[104].mxu1 %v8906_v61  ;;  %v3721_v32 = vpop.f32.mrb[72].mxu0  ;;  %v3834_v19 = vpop.f32.mrb[88].mxu1 }
 0x8be   :  { %4319 = vmatpush1.bf16.msra.mxu0 %v8039_v46  ;;  %4362 = vmatpush1.bf16.msra.mxu1 %v8072_v47  ;;  %v3723_v60 = vpop.f32.mrb[73].mxu0  ;;  %v3836_v37 = vpop.f32.mrb[89].mxu1 }
 0x8bf   :  { %4320 = vmatprep.subr.bf16.mxu0 %v8076_v38  ;;  %4363 = vmatprep.subr.bf16.mxu1 %v8078_v29  ;;  %v3725_v35 = vpop.f32.mrb[74].mxu0  ;;  %v3838_v25 = vpop.f32.mrb[90].mxu1 }
 0x8c0   :  { %4350 = vmatprep.mubr.bf16.mxu0 %v8906_v61  ;;  %4393 = vmatprep.mubr.bf16.mxu1 %v8906_v61  ;;  %v8221_v20 = vpack.c.bf16 %v3725_v35, %v3721_v32  ;;  %v8223_v30 = vpack.c.bf16 %v3838_v25, %v3834_v19  ;;  %v3727_v43 = vpop.f32.mrb[75].mxu0  ;;  %v3840_v14 = vpop.f32.mrb[91].mxu1 }
 0x8c1   :  { %v8225_v5 = vpack.c.bf16 %v3727_v43, %v3723_v60  ;;  %v8227_v42 = vpack.c.bf16 %v3840_v14, %v3836_v37 }
 0x8c2   :  { %8976 = vst [vmem:[#allocation38_spill] sm:$0xff] %v8221_v20  ;;  %8977 = vst [vmem:[#allocation10_spill] sm:$0xff] %v8223_v30  ;;  %4321 = vmatpush1.bf16.msra.mxu0 %v8080_v11  ;;  %4364 = vmatpush1.bf16.msra.mxu1 %v8086_v41 }
 0x8c3   :  { %8978 = vst [vmem:[#allocation32_spill] sm:$0xff] %v8225_v5  ;;  %8979 = vst [vmem:[#allocation11_spill] sm:$0xff] %v8227_v42  ;;  %4322 = vmatprep.subr.bf16.mxu0 %v8082_v23  ;;  %4365 = vmatprep.subr.bf16.mxu1 %v8091_v7  ;;  %v4227_v5 = vld [vmem:[%s8785_s6] sm:$0xf] }
 0x8c4   :  { %v8285_v58 = vrot.slane %v4227_v5, %v8996_v1  ;;  %v3977_v1 = vunpack.c.h.bf16 %v8178_v9 }
 0x8c5   :  { %v3731_v59 = vpop.f32.mrb[76].mxu0  ;;  %v3844_v50 = vpop.f32.mrb[92].mxu1 }
 0x8c6   :  { %4323 = vmatpush1.bf16.msra.mxu0 %v8089_v18  ;;  %4366 = vmatpush1.bf16.msra.mxu1 %v8097_v24  ;;  %v3733_v34 = vpop.f32.mrb[77].mxu0  ;;  %v3846_v49 = vpop.f32.mrb[93].mxu1 }
 0x8c7   :  { %4324 = vmatprep.subr.bf16.mxu0 %v8094_v22  ;;  %4367 = vmatprep.subr.bf16.mxu1 %v8100_v45  ;;  %v3735_v31 = vpop.f32.mrb[78].mxu0  ;;  %v3848_v32 = vpop.f32.mrb[94].mxu1 }
 0x8c8   :  { %v8237_v19 = vpack.c.bf16 %v3735_v31, %v3731_v59  ;;  %v8239_v60 = vpack.c.bf16 %v3848_v32, %v3844_v50  ;;  %v3737_v37 = vpop.f32.mrb[79].mxu0  ;;  %v3850_v35 = vpop.f32.mrb[95].mxu1 }
 0x8c9   :  { %v8241_v25 = vpack.c.bf16 %v3737_v37, %v3733_v34  ;;  %v8243_v43 = vpack.c.bf16 %v3850_v35, %v3846_v49 }
 0x8ca   :  { %8980 = vst [vmem:[#allocation33_spill] sm:$0xff] %v8237_v19  ;;  %8981 = vst [vmem:[#allocation36_spill] sm:$0xff] %v8239_v60  ;;  %4325 = vmatpush1.bf16.msra.mxu0 %v8103_v52  ;;  %4368 = vmatpush1.bf16.msra.mxu1 %v8109_v26 }
 0x8cb   :  { %8982 = vst [vmem:[#allocation37_spill] sm:$0xff] %v8241_v25  ;;  %8983 = vst [vmem:[#allocation14_spill] sm:$0xff] %v8243_v43  ;;  %4326 = vmatprep.subr.bf16.mxu0 %v8106_v21  ;;  %4369 = vmatprep.subr.bf16.mxu1 %v8112_v39 }
 0x8cd   :  { %v3741_v14 = vpop.f32.mrb[80].mxu0  ;;  %v3854_v42 = vpop.f32.mrb[96].mxu1 }
 0x8ce   :  { %4327 = vmatpush1.bf16.msra.mxu0 %v8115_v51  ;;  %4370 = vmatpush1.bf16.msra.mxu1 %v8121_v27  ;;  %v3743_v59 = vpop.f32.mrb[81].mxu0  ;;  %v3856_v50 = vpop.f32.mrb[97].mxu1 }
 0x8cf   :  { %4328 = vmatprep.subr.bf16.mxu0 %v8118_v15  ;;  %4371 = vmatprep.subr.bf16.mxu1 %v8131_v8  ;;  %v3745_v34 = vpop.f32.mrb[82].mxu0  ;;  %v3858_v49 = vpop.f32.mrb[98].mxu1 }
 0x8d0   :  { %v8253_v31 = vpack.c.bf16 %v3745_v34, %v3741_v14  ;;  %v8255_v32 = vpack.c.bf16 %v3858_v49, %v3854_v42  ;;  %v3747_v37 = vpop.f32.mrb[83].mxu0  ;;  %v3860_v35 = vpop.f32.mrb[99].mxu1  ;;  %v8988_v42 = vld [vmem:[#allocation22_spill] sm:$0xff]  ;;  %v8989_v14 = vld [vmem:[#allocation17_spill] sm:$0xff] }
 0x8d1   :  { %v8257_v43 = vpack.c.bf16 %v3747_v37, %v3743_v59  ;;  %v8259_v25 = vpack.c.bf16 %v3860_v35, %v3856_v50  ;;  %v8990_v59 = vld [vmem:[#allocation39_spill] sm:$0xff]  ;;  %v8991_v50 = vld [vmem:[#allocation16_spill] sm:$0xff] }
 0x8d2   :  { %8984 = vst [vmem:[#allocation18_spill] sm:$0xff] %v8253_v31  ;;  %8985 = vst [vmem:[#allocation15_spill] sm:$0xff] %v8255_v32  ;;  %4329 = vmatpush1.bf16.msra.mxu0 %v8125_v6  ;;  %4372 = vmatpush1.bf16.msra.mxu1 %v8133_v0 }
 0x8d3   :  { %8986 = vst [vmem:[#allocation12_spill] sm:$0xff] %v8257_v43  ;;  %8987 = vst [vmem:[#allocation34_spill] sm:$0xff] %v8259_v25  ;;  %4330 = vmatprep.subr.bf16.mxu0 %v8128_v17  ;;  %4373 = vmatprep.subr.bf16.mxu1 %v8143_v10 }
 0x8d6   :  { %4331 = vmatpush1.bf16.msra.mxu0 %v8137_v40  ;;  %4374 = vmatpush1.bf16.msra.mxu1 %v8145_v33 }
 0x8d7   :  { %4332 = vmatprep.subr.bf16.mxu0 %v8141_v3  ;;  %4375 = vmatprep.subr.bf16.mxu1 %v8153_v53 }
 0x8da   :  { %4333 = vmatpush1.bf16.msra.mxu0 %v8988_v42  ;;  %4376 = vmatpush1.bf16.msra.mxu1 %v8989_v14 }
 0x8db   :  { %4473 = vmatprep.subr.bf16.mxu0 %v8990_v59  ;;  %4516 = vmatprep.subr.bf16.mxu1 %v8991_v50 }
 0x988   :  { %v3751_v34 = vpop.f32.mrb[84].mxu0  ;;  %v3864_v49 = vpop.f32.mrb[100].mxu1 }
 0x989   :  { %v3753_v37 = vpop.f32.mrb[85].mxu0  ;;  %v3866_v35 = vpop.f32.mrb[101].mxu1 }
 0x98a   :  { %v3755_v25 = vpop.f32.mrb[86].mxu0  ;;  %v3868_v43 = vpop.f32.mrb[102].mxu1 }
 0x98b   :  { %v8273_v32 = vpack.c.bf16 %v3755_v25, %v3751_v34  ;;  %v8275_v31 = vpack.c.bf16 %v3868_v43, %v3864_v49  ;;  %v3757_v60 = vpop.f32.mrb[87].mxu0  ;;  %v3870_v19 = vpop.f32.mrb[103].mxu1  ;;  %v3975_v25 = vunpack.c.l.bf16 %v8180_v62  ;;  %v8997_v34 = vld [vmem:[#allocation27_spill] sm:$0xff] }
 0x98c   :  { %v8280_v30 = vpack.c.bf16 %v3757_v60, %v3753_v37  ;;  %v8282_v20 = vpack.c.bf16 %v3870_v19, %v3866_v35  ;;  %v8290_v43 = vrot.slane %v4227_v5, %v8997_v34  ;;  %v3978_v34 = vunpack.c.h.bf16 %v8183_v28 }
 0x98d   :  { %8992 = vst [vmem:[#allocation13_spill] sm:$0xff] %v8273_v32  ;;  %8993 = vst [vmem:[#allocation35_spill] sm:$0xff] %v8275_v31  ;;  %v3974_v32 = vunpack.c.l.bf16 %v8183_v28 }
 0x98e   :  { %8994 = vst [vmem:[#allocation22_spill] sm:$0xff] %v8280_v30  ;;  %8995 = vst [vmem:[#allocation17_spill] sm:$0xff] %v8282_v20  ;;  %v3979_v20 = vunpack.c.h.bf16 %v8180_v62 }
 0x990   :  { %v4175_v49 = vpop.f32.mrb[88].mxu0  ;;  %v4218_v31 = vpop.f32.mrb[104].mxu1 }
 0x991   :  { %v4176_v60 = vadd.f32 %v4175_v49, %v3973_v57  ;;  %v4219_v37 = vadd.f32 %v4218_v31, %v3975_v25  ;;  %v4177_v19 = vpop.f32.mrb[89].mxu0  ;;  %v4220_v35 = vpop.f32.mrb[105].mxu1 }
 0x992   :  { %v4178_v30 = vadd.f32 %v4177_v19, %v3974_v32  ;;  %v4221_v12 = vadd.f32 %v4220_v35, %v3976_v4  ;;  %v4179_v36 = vpop.f32.mrb[90].mxu0  ;;  %v4222_v44 = vpop.f32.mrb[106].mxu1  ;;  %v8302_v4 = vrot.slane %v4227_v5, %v7332_v56 }
 0x993   :  { %v4249_v16 = vadd.f32 %v8285_v58, %v4176_v60  ;;  %v4180_v13 = vadd.f32 %v4179_v36, %v3977_v1  ;;  %v4223_v63 = vadd.f32 %v4222_v44, %v3979_v20  ;;  %v4181_v57 = vpop.f32.mrb[91].mxu0  ;;  %v4224_v31 = vpop.f32.mrb[107].mxu1  ;;  %v8306_v44 = vrot.slane %v4227_v5, %v7328_v54 }
 0x994   :  { %v4250_v25 = vadd.f32 %v8290_v43, %v4178_v30  ;;  %v4182_v49 = vadd.f32 %v4181_v57, %v3978_v34  ;;  %v4225_v9 = vadd.f32 %v4224_v31, %v3980_v2  ;;  %v4252_v20 = vadd.f32 %v8302_v4, %v4221_v12 }
 0x995   :  { %v5915_v55 = vmul.f32 -1.442695, %v4249_v16  ;;  %v4253_v62 = vadd.f32 %v8285_v58, %v4180_v13  ;;  %v4251_v16 = vadd.f32 %v8306_v44, %v4219_v37  ;;  %v4255_v2 = vadd.f32 %v8306_v44, %v4223_v63 }
 0x996   :  { %v5917_v32 = vmul.f32 -1.442695, %v4250_v25  ;;  %v4254_v28 = vadd.f32 %v8290_v43, %v4182_v49  ;;  %v5919_v13 = vmul.f32 -1.442695, %v4252_v20  ;;  %v4256_v56 = vadd.f32 %v8302_v4, %v4225_v9 }
 0x997   :  { %6528 = vpow2.f32 %v5915_v55  ;;  %v5916_v48 = vmul.f32 -1.442695, %v4253_v62 }
 0x998   :  { %6530 = vpow2.f32 %v5917_v32  ;;  %v5918_v36 = vmul.f32 -1.442695, %v4254_v28  ;;  %v5920_v19 = vmul.f32 -1.442695, %v4256_v56 }
 0x999   :  { %6532 = vpow2.f32 %v5916_v48 }
 0x99a   :  { %6534 = vpow2.f32 %v5918_v36 }
 0x99b   :  { %6536 = vtanh.f32 %v4251_v16 }
 0x99c   :  { %6538 = vpow2.f32 %v5919_v13 }
 0x99d   :  { %6540 = vtanh.f32 %v4255_v2 }
 0x9a1   :  { %v6529_v30 = vpop.eup %6528 }
 0x9a2   :  { %v6531_v55 = vpop.eup %6530  ;;  %v4263_v60 = vadd.f32 1.0, %v6529_v30 }
 0x9a3   :  { %v4275_v35 = vadd.f32 1.0, %v6531_v55  ;;  %v6533_v54 = vpop.eup %6532 }
 0x9a4   :  { %6542 = vrcp.f32 %v4263_v60  ;;  %v4264_v12 = vadd.f32 1.0, %v6533_v54  ;;  %v6535_v5 = vpop.eup %6534 }
 0x9a5   :  { %6544 = vrcp.f32 %v4275_v35  ;;  %v4276_v37 = vadd.f32 1.0, %v6535_v5  ;;  %v6537_v1 = vpop.eup %6536 }
 0x9a6   :  { %6546 = vpow2.f32 %v5920_v19  ;;  %v6539_v34 = vpop.eup %6538 }
 0x9a7   :  { %6548 = vrcp.f32 %v4264_v12  ;;  %v6541_v63 = vpop.eup %6540  ;;  %v4289_v32 = vadd.f32 1.0, %v6539_v34  ;;  %v8999_v12 = vld [vmem:[#allocation40_spill] sm:$0xff]  ;;  %v9000_v34 = vld [vmem:[#allocation41_spill] sm:$0xff] }
 0x9a8   :  { %6550 = vrcp.f32 %v4276_v37  ;;  %v4312_v5 = vunpack.c.l.bf16 %v8999_v12 }
 0x9a9   :  { %6552 = vrcp.f32 %v4289_v32 }
 0x9ae   :  { %v6543_v57 = vpop.eup %6542 }
 0x9af   :  { %v6545_v31 = vpop.eup %6544  ;;  %v4297_v25 = vmul.f32 %v6543_v57, %v6537_v1  ;;  %v9001_v57 = vld [vmem:[#allocation19_spill] sm:$0xff] }
 0x9b0   :  { %v6547_v49 = vpop.eup %6546  ;;  %v4295_v9 = vmul.f32 0.0, %v6545_v31  ;;  %v4313_v31 = vunpack.c.l.bf16 %v9001_v57 }
 0x9b1   :  { %v6549_v62 = vpop.eup %6548  ;;  %v4290_v20 = vadd.f32 1.0, %v6547_v49 }
 0x9b2   :  { %v8312_v28 = vadd.f32 %v4297_v25, %v4295_v9  ;;  %v4298_v48 = vmul.f32 %v6549_v62, %v6541_v63  ;;  %v6551_v36 = vpop.eup %6550  ;;  %v4311_v63 = vunpack.c.l.bf16 %v9000_v34 }
 0x9b3   :  { %v4296_v16 = vmul.f32 0.0, %v6551_v36  ;;  %v6553_v56 = vpop.eup %6552 }
 0x9b4   :  { %6554 = vtanh.f32 %v8312_v28 }
 0x9b5   :  { %v8315_v13 = vadd.f32 %v4298_v48, %v4296_v16  ;;  %6556 = vrcp.f32 %v4290_v20  ;;  %v4315_v16 = vunpack.c.h.bf16 %v9000_v34 }
 0x9b7   :  { %6558 = vtanh.f32 %v8315_v13 }
 0x9be   :  { %v6555_v2 = vpop.eup %6554 }
 0x9bf   :  { %v6557_v30 = vpop.eup %6556  ;;  %v4303_v60 = vmul.f32 %v6555_v2, %v6553_v56  ;;  %v4317_v56 = vunpack.c.h.bf16 %v9001_v57 }
 0x9c1   :  { %v6559_v55 = vpop.eup %6558 }
 0x9c2   :  { %v4304_v19 = vmul.f32 %v6559_v55, %v6557_v30 }
 0x9c4   :  { %v4305_v35 = vpack.c.bf16 %v4304_v19, %v4303_v60 }
 0x9c6   :  { %4351 = vmatmul.mubr.bf16.vlgmr.msra.gmra.mrb[92].mxu0 %v4305_v35  ;;  %4394 = vmatmul.mubr.bf16.vlgmr.msra.gmra.mrb[108].mxu1 %v4305_v35 }
 0x9c7   :  { %4474 = vmatpush1.bf16.msra.mxu0 %v8039_v46  ;;  %4517 = vmatpush1.bf16.msra.mxu1 %v8072_v47  ;;  %v8998_v46 = vld [vmem:[#allocation24_spill] sm:$0xff] }
 0x9c8   :  { %4475 = vmatprep.subr.bf16.mxu0 %v8076_v38  ;;  %4518 = vmatprep.subr.bf16.mxu1 %v8078_v29  ;;  %v4310_v54 = vunpack.c.l.bf16 %v8998_v46  ;;  %v4314_v32 = vunpack.c.h.bf16 %v8998_v46 }
 0x9c9   :  { %4505 = vmatprep.mubr.bf16.mxu0 %v8906_v61  ;;  %4548 = vmatprep.mubr.bf16.mxu1 %v8906_v61 }
 0x9cb   :  { %4476 = vmatpush1.bf16.msra.mxu0 %v8080_v11  ;;  %4519 = vmatpush1.bf16.msra.mxu1 %v8086_v41 }
 0x9cc   :  { %4477 = vmatprep.subr.bf16.mxu0 %v8082_v23  ;;  %4520 = vmatprep.subr.bf16.mxu1 %v8091_v7 }
 0x9cf   :  { %4478 = vmatpush1.bf16.msra.mxu0 %v8089_v18  ;;  %4521 = vmatpush1.bf16.msra.mxu1 %v8097_v24 }
 0x9d0   :  { %4479 = vmatprep.subr.bf16.mxu0 %v8094_v22  ;;  %4522 = vmatprep.subr.bf16.mxu1 %v8100_v45 }
 0x9d3   :  { %4480 = vmatpush1.bf16.msra.mxu0 %v8103_v52  ;;  %4523 = vmatpush1.bf16.msra.mxu1 %v8109_v26 }
 0x9d4   :  { %4481 = vmatprep.subr.bf16.mxu0 %v8106_v21  ;;  %4524 = vmatprep.subr.bf16.mxu1 %v8112_v39 }
 0x9d7   :  { %4482 = vmatpush1.bf16.msra.mxu0 %v8115_v51  ;;  %4525 = vmatpush1.bf16.msra.mxu1 %v8121_v27 }
 0x9d8   :  { %4483 = vmatprep.subr.bf16.mxu0 %v8118_v15  ;;  %4526 = vmatprep.subr.bf16.mxu1 %v8131_v8 }
 0x9db   :  { %4484 = vmatpush1.bf16.msra.mxu0 %v8125_v6  ;;  %4527 = vmatpush1.bf16.msra.mxu1 %v8133_v0 }
 0x9dc   :  { %4485 = vmatprep.subr.bf16.mxu0 %v8128_v17  ;;  %4528 = vmatprep.subr.bf16.mxu1 %v8143_v10 }
 0x9df   :  { %4486 = vmatpush1.bf16.msra.mxu0 %v8137_v40  ;;  %4529 = vmatpush1.bf16.msra.mxu1 %v8145_v33 }
 0x9e0   :  { %4487 = vmatprep.subr.bf16.mxu0 %v8141_v3  ;;  %4530 = vmatprep.subr.bf16.mxu1 %v8153_v53 }
 0x9e3   :  { %4488 = vmatpush1.bf16.msra.mxu0 %v8988_v42  ;;  %4531 = vmatpush1.bf16.msra.mxu1 %v8989_v14 }
 0x9e4   :  { %4628 = vmatprep.subr.bf16.mxu0 %v8990_v59  ;;  %4671 = vmatprep.subr.bf16.mxu1 %v8991_v50  ;;  %v4316_v59 = vunpack.c.h.bf16 %v8999_v12 }
 0xa99   :  { %v4352_v37 = vpop.f32.mrb[92].mxu0  ;;  %v4395_v1 = vpop.f32.mrb[108].mxu1 }
 0xa9a   :  { %v4353_v25 = vadd.f32 %v4352_v37, %v4310_v54  ;;  %v4396_v49 = vadd.f32 %v4395_v1, %v4312_v5  ;;  %v4354_v9 = vpop.f32.mrb[93].mxu0  ;;  %v4397_v62 = vpop.f32.mrb[109].mxu1 }
 0xa9b   :  { %v4355_v48 = vadd.f32 %v4354_v9, %v4311_v63  ;;  %v4398_v50 = vadd.f32 %v4397_v62, %v4313_v31  ;;  %v4356_v36 = vpop.f32.mrb[94].mxu0  ;;  %v4399_v20 = vpop.f32.mrb[110].mxu1 }
 0xa9c   :  { %v4404_v2 = vadd.f32 %v4353_v25, %v8285_v58  ;;  %v4357_v30 = vadd.f32 %v4356_v36, %v4314_v32  ;;  %v4400_v55 = vadd.f32 %v4399_v20, %v4316_v59  ;;  %v4358_v60 = vpop.f32.mrb[95].mxu0  ;;  %v4401_v19 = vpop.f32.mrb[111].mxu1  ;;  %v4406_v31 = vadd.f32 %v4396_v49, %v8306_v44 }
 0xa9d   :  { %v4405_v35 = vadd.f32 %v4355_v48, %v8290_v43  ;;  %v4359_v54 = vadd.f32 %v4358_v60, %v4315_v16  ;;  %v4402_v46 = vadd.f32 %v4401_v19, %v4317_v56  ;;  %v4407_v57 = vadd.f32 %v4398_v50, %v8302_v4 }
 0xa9e   :  { %v5921_v5 = vmul.f32 -1.442695, %v4404_v2  ;;  %v4408_v12 = vadd.f32 %v4357_v30, %v8285_v58  ;;  %v4410_v62 = vadd.f32 %v4400_v55, %v8306_v44 }
 0xa9f   :  { %v5923_v37 = vmul.f32 -1.442695, %v4405_v35  ;;  %v4409_v1 = vadd.f32 %v4359_v54, %v8290_v43  ;;  %v5925_v25 = vmul.f32 -1.442695, %v4407_v57  ;;  %v4411_v9 = vadd.f32 %v4402_v46, %v8302_v4 }
 0xaa0   :  { %6560 = vpow2.f32 %v5921_v5  ;;  %v5922_v34 = vmul.f32 -1.442695, %v4408_v12 }
 0xaa1   :  { %6562 = vpow2.f32 %v5923_v37  ;;  %v5924_v63 = vmul.f32 -1.442695, %v4409_v1  ;;  %v5926_v36 = vmul.f32 -1.442695, %v4411_v9 }
 0xaa2   :  { %6564 = vpow2.f32 %v5922_v34 }
 0xaa3   :  { %6566 = vpow2.f32 %v5924_v63 }
 0xaa4   :  { %6568 = vtanh.f32 %v4406_v31 }
 0xaa5   :  { %6570 = vpow2.f32 %v5925_v25 }
 0xaa6   :  { %6572 = vtanh.f32 %v4410_v62 }
 0xaaa   :  { %v6561_v32 = vpop.eup %6560 }
 0xaab   :  { %v6563_v59 = vpop.eup %6562  ;;  %v4418_v48 = vadd.f32 1.0, %v6561_v32 }
 0xaac   :  { %v4430_v20 = vadd.f32 1.0, %v6563_v59  ;;  %v6565_v16 = vpop.eup %6564 }
 0xaad   :  { %6574 = vrcp.f32 %v4418_v48  ;;  %v4419_v50 = vadd.f32 1.0, %v6565_v16  ;;  %v6567_v56 = vpop.eup %6566 }
 0xaae   :  { %6576 = vrcp.f32 %v4430_v20  ;;  %v4431_v49 = vadd.f32 1.0, %v6567_v56  ;;  %v6569_v2 = vpop.eup %6568 }
 0xaaf   :  { %6578 = vpow2.f32 %v5926_v36  ;;  %v6571_v30 = vpop.eup %6570  ;;  %v8376_v36 = vld [vmem:[#allocation6] ss:$16 sps:$4 sm:$0xff]  }
 0xab0   :  { %6580 = vrcp.f32 %v4419_v50  ;;  %v6573_v55 = vpop.eup %6572  ;;  %v4444_v12 = vadd.f32 1.0, %v6571_v30 }
 0xab1   :  { %6582 = vrcp.f32 %v4431_v49 }
 0xab2   :  { %6584 = vrcp.f32 %v4444_v12 }
 0xab7   :  { %v6575_v60 = vpop.eup %6574 }
 0xab8   :  { %v6577_v19 = vpop.eup %6576  ;;  %v4452_v35 = vmul.f32 %v6575_v60, %v6569_v2 }
 0xab9   :  { %v6579_v54 = vpop.eup %6578  ;;  %v4450_v46 = vmul.f32 %v6577_v19, %v8312_v28 }
 0xaba   :  { %v6581_v5 = vpop.eup %6580  ;;  %v4445_v63 = vadd.f32 1.0, %v6579_v54 }
 0xabb   :  { %v8369_v37 = vadd.f32 %v4452_v35, %v4450_v46  ;;  %v4453_v1 = vmul.f32 %v6581_v5, %v6573_v55  ;;  %v6583_v34 = vpop.eup %6582 }
 0xabc   :  { %v4451_v57 = vmul.f32 %v6583_v34, %v8315_v13  ;;  %v6585_v25 = vpop.eup %6584 }
 0xabd   :  { %6586 = vtanh.f32 %v8369_v37 }
 0xabe   :  { %v8372_v31 = vadd.f32 %v4453_v1, %v4451_v57  ;;  %6588 = vrcp.f32 %v4445_v63 }
 0xac0   :  { %6590 = vtanh.f32 %v8372_v31 }
 0xac7   :  { %v6587_v9 = vpop.eup %6586 }
 0xac8   :  { %v6589_v28 = vpop.eup %6588  ;;  %v4458_v32 = vmul.f32 %v6587_v9, %v6585_v25 }
 0xaca   :  { %v6591_v62 = vpop.eup %6590 }
 0xacb   :  { %v4459_v59 = vmul.f32 %v6591_v62, %v6589_v28 }
 0xacd   :  { %v4460_v48 = vpack.c.bf16 %v4459_v59, %v4458_v32 }
 0xacf   :  { %4506 = vmatmul.mubr.bf16.vlgmr.msra.gmra.mrb[96].mxu0 %v4460_v48  ;;  %4549 = vmatmul.mubr.bf16.vlgmr.msra.gmra.mrb[112].mxu1 %v4460_v48 }
 0xad0   :  { %4629 = vmatpush1.bf16.msra.mxu0 %v8376_v36  ;;  %4672 = vmatpush1.bf16.msra.mxu1 %v8072_v47  ;;  %v8410_v47 = vld [vmem:[#allocation6 + $0x4] ss:$16 sps:$4 sm:$0xff]  }
 0xad1   :  { %4630 = vmatprep.subr.bf16.mxu0 %v8076_v38  ;;  %4673 = vmatprep.subr.bf16.mxu1 %v8078_v29  ;;  %v8413_v38 = vld [vmem:[#allocation6 + $0xc] ss:$16 sps:$4 sm:$0xff]   ;;  %v9003_v29 = vld [vmem:[#allocation28_spill] sm:$0xff] }
 0xad2   :  { %4660 = vmatprep.mubr.bf16.mxu0 %v8906_v61  ;;  %4703 = vmatprep.mubr.bf16.mxu1 %v8906_v61  ;;  %9002 = vst [vmem:[#allocation39_spill] sm:$0xff] %v8413_v38 }
 0xad4   :  { %4631 = vmatpush1.bf16.msra.mxu0 %v8080_v11  ;;  %4674 = vmatpush1.bf16.msra.mxu1 %v8086_v41  ;;  %v4465_v11 = vunpack.c.l.bf16 %v9003_v29 }
 0xad5   :  { %4632 = vmatprep.subr.bf16.mxu0 %v8082_v23  ;;  %4675 = vmatprep.subr.bf16.mxu1 %v8091_v7  ;;  %v9004_v23 = vld [vmem:[#allocation21_spill] sm:$0xff] }
 0xad6   :  { %v4467_v41 = vunpack.c.l.bf16 %v9004_v23 }
 0xad8   :  { %4633 = vmatpush1.bf16.msra.mxu0 %v8089_v18  ;;  %4676 = vmatpush1.bf16.msra.mxu1 %v8097_v24 }
 0xad9   :  { %4634 = vmatprep.subr.bf16.mxu0 %v8094_v22  ;;  %4677 = vmatprep.subr.bf16.mxu1 %v8100_v45  ;;  %v9005_v22 = vld [vmem:[#allocation29_spill] sm:$0xff]  ;;  %v9006_v45 = vld [vmem:[#allocation23_spill] sm:$0xff] }
 0xada   :  { %v4466_v24 = vunpack.c.l.bf16 %v9005_v22 }
 0xadc   :  { %4635 = vmatpush1.bf16.msra.mxu0 %v8103_v52  ;;  %4678 = vmatpush1.bf16.msra.mxu1 %v8109_v26  ;;  %v4468_v52 = vunpack.c.l.bf16 %v9006_v45 }
 0xadd   :  { %4636 = vmatprep.subr.bf16.mxu0 %v8106_v21  ;;  %4679 = vmatprep.subr.bf16.mxu1 %v8112_v39 }
 0xae0   :  { %4637 = vmatpush1.bf16.msra.mxu0 %v8115_v51  ;;  %4680 = vmatpush1.bf16.msra.mxu1 %v8121_v27  ;;  %v4471_v27 = vunpack.c.h.bf16 %v9004_v23 }
 0xae1   :  { %4638 = vmatprep.subr.bf16.mxu0 %v8118_v15  ;;  %4681 = vmatprep.subr.bf16.mxu1 %v8131_v8  ;;  %v4469_v15 = vunpack.c.h.bf16 %v9003_v29 }
 0xae4   :  { %4639 = vmatpush1.bf16.msra.mxu0 %v8125_v6  ;;  %4682 = vmatpush1.bf16.msra.mxu1 %v8133_v0 }
 0xae5   :  { %4640 = vmatprep.subr.bf16.mxu0 %v8128_v17  ;;  %4683 = vmatprep.subr.bf16.mxu1 %v8143_v10 }
 0xae8   :  { %4641 = vmatpush1.bf16.msra.mxu0 %v8137_v40  ;;  %4684 = vmatpush1.bf16.msra.mxu1 %v8145_v33  ;;  %v4470_v40 = vunpack.c.h.bf16 %v9005_v22 }
 0xae9   :  { %4642 = vmatprep.subr.bf16.mxu0 %v8141_v3  ;;  %4685 = vmatprep.subr.bf16.mxu1 %v8153_v53  ;;  %v4472_v3 = vunpack.c.h.bf16 %v9006_v45 }
 0xaec   :  { %4643 = vmatpush1.bf16.msra.mxu0 %v8988_v42  ;;  %4686 = vmatpush1.bf16.msra.mxu1 %v8989_v14 }
 0xaed   :  { %4783 = vmatprep.subr.bf16.mxu0 %v8410_v47  ;;  %4826 = vmatprep.subr.bf16.mxu1 %v8413_v38 }
 0xba2   :  { %v4507_v18 = vpop.f32.mrb[96].mxu0  ;;  %v4550_v7 = vpop.f32.mrb[112].mxu1 }
 0xba3   :  { %v4508_v21 = vadd.f32 %v4507_v18, %v4465_v11  ;;  %v4551_v26 = vadd.f32 %v4550_v7, %v4467_v41  ;;  %v4509_v39 = vpop.f32.mrb[97].mxu0  ;;  %v4552_v51 = vpop.f32.mrb[113].mxu1 }
 0xba4   :  { %v4510_v6 = vadd.f32 %v4509_v39, %v4466_v24  ;;  %v4553_v17 = vadd.f32 %v4552_v51, %v4468_v52  ;;  %v4511_v8 = vpop.f32.mrb[98].mxu0  ;;  %v4554_v0 = vpop.f32.mrb[114].mxu1 }
 0xba5   :  { %v4559_v10 = vadd.f32 %v4508_v21, %v8285_v58  ;;  %v4512_v33 = vadd.f32 %v4511_v8, %v4469_v15  ;;  %v4555_v53 = vadd.f32 %v4554_v0, %v4471_v27  ;;  %v4513_v42 = vpop.f32.mrb[99].mxu0  ;;  %v4556_v14 = vpop.f32.mrb[115].mxu1  ;;  %v4561_v19 = vadd.f32 %v4551_v26, %v8306_v44  ;;  %v8444_v8 = vld [vmem:[#allocation6 + $0x24] ss:$16 sps:$4 sm:$0xff]   ;;  %v8447_v0 = vld [vmem:[#allocation6 + $0x2c] ss:$16 sps:$4 sm:$0xff]  }
 0xba6   :  { %v4560_v13 = vadd.f32 %v4510_v6, %v8290_v43  ;;  %v4514_v20 = vadd.f32 %v4513_v42, %v4470_v40  ;;  %v4557_v16 = vadd.f32 %v4556_v14, %v4472_v3  ;;  %v4562_v60 = vadd.f32 %v4553_v17, %v8302_v4  ;;  %v8452_v40 = vld [vmem:[#allocation6 + $0x20] ss:$16 sps:$4 sm:$0xff]   ;;  %v8455_v3 = vld [vmem:[#allocation6 + $0x28] ss:$16 sps:$4 sm:$0xff]   ;;  %v8470_v14 = vld [vmem:[#allocation6 + $0x64] ss:$16 sps:$4 sm:$0xff]  }
 0xba7   :  { %v5927_v50 = vmul.f32 -1.442695, %v4559_v10  ;;  %v4563_v56 = vadd.f32 %v4512_v33, %v8285_v58  ;;  %v4565_v46 = vadd.f32 %v4555_v53, %v8306_v44  ;;  %v8458_v10 = vld [vmem:[#allocation6 + $0x44] ss:$16 sps:$4 sm:$0xff]   ;;  %v8461_v33 = vld [vmem:[#allocation6 + $0x4c] ss:$16 sps:$4 sm:$0xff]  }
 0xba8   :  { %v5929_v49 = vmul.f32 -1.442695, %v4560_v13  ;;  %v4564_v2 = vadd.f32 %v4514_v20, %v8290_v43  ;;  %v5931_v35 = vmul.f32 -1.442695, %v4562_v60  ;;  %v4566_v54 = vadd.f32 %v4557_v16, %v8302_v4  ;;  %v8464_v53 = vld [vmem:[#allocation6 + $0x40] ss:$16 sps:$4 sm:$0xff]  }
 0xba9   :  { %6592 = vpow2.f32 %v5927_v50  ;;  %v5928_v30 = vmul.f32 -1.442695, %v4563_v56  ;;  %v8467_v42 = vld [vmem:[#allocation6 + $0x48] ss:$16 sps:$4 sm:$0xff]   ;;  %v8473_v13 = vld [vmem:[#allocation6 + $0x6c] ss:$16 sps:$4 sm:$0xff]  }
 0xbaa   :  { %6594 = vpow2.f32 %v5929_v49  ;;  %v5930_v55 = vmul.f32 -1.442695, %v4564_v2  ;;  %v5932_v34 = vmul.f32 -1.442695, %v4566_v54  ;;  %v8476_v20 = vld [vmem:[#allocation6 + $0x60] ss:$16 sps:$4 sm:$0xff]  }
 0xbab   :  { %6596 = vpow2.f32 %v5928_v30  ;;  %v8479_v16 = vld [vmem:[#allocation6 + $0x68] ss:$16 sps:$4 sm:$0xff]   ;;  %v8482_v50 = vld [vmem:[#allocation6 + $0x84] ss:$16 sps:$4 sm:$0xff]   ;;  %v8485_v56 = vld [vmem:[#allocation6 + $0x8c] ss:$16 sps:$4 sm:$0xff]  }
 0xbac   :  { %6598 = vpow2.f32 %v5930_v55  ;;  %v8488_v49 = vld [vmem:[#allocation6 + $0x80] ss:$16 sps:$4 sm:$0xff]   ;;  %v8491_v2 = vld [vmem:[#allocation6 + $0x88] ss:$16 sps:$4 sm:$0xff]   ;;  %v8494_v30 = vld [vmem:[#allocation6 + $0xa4] ss:$16 sps:$4 sm:$0xff]  }
 0xbad   :  { %6600 = vtanh.f32 %v4561_v19  ;;  %v8497_v55 = vld [vmem:[#allocation6 + $0xac] ss:$16 sps:$4 sm:$0xff]   ;;  %v8500_v60 = vld [vmem:[#allocation6 + $0xa0] ss:$16 sps:$4 sm:$0xff]   ;;  %v8503_v19 = vld [vmem:[#allocation6 + $0xa8] ss:$16 sps:$4 sm:$0xff]  }
 0xbae   :  { %6602 = vpow2.f32 %v5931_v35  ;;  %v8506_v35 = vld [vmem:[#allocation6 + $0xc4] ss:$16 sps:$4 sm:$0xff]   ;;  %v8509_v54 = vld [vmem:[#allocation6 + $0xcc] ss:$16 sps:$4 sm:$0xff]  }
 0xbaf   :  { %6604 = vtanh.f32 %v4565_v46  ;;  %v8512_v46 = vld [vmem:[#allocation6 + $0xc0] ss:$16 sps:$4 sm:$0xff]  }
 0xbb3   :  { %v6593_v5 = vpop.eup %6592 }
 0xbb4   :  { %v6595_v12 = vpop.eup %6594  ;;  %v4573_v1 = vadd.f32 1.0, %v6593_v5  ;;  %v8515_v5 = vld [vmem:[#allocation6 + $0xc8] ss:$16 sps:$4 sm:$0xff]  }
 0xbb5   :  { %v4585_v63 = vadd.f32 1.0, %v6595_v12  ;;  %v6597_v57 = vpop.eup %6596  ;;  %v8518_v12 = vld [vmem:[#allocation6 + $0xe4] ss:$16 sps:$4 sm:$0xff]  }
 0xbb6   :  { %6606 = vrcp.f32 %v4573_v1  ;;  %v4574_v25 = vadd.f32 1.0, %v6597_v57  ;;  %v6599_v9 = vpop.eup %6598  ;;  %v8521_v1 = vld [vmem:[#allocation6 + $0xec] ss:$16 sps:$4 sm:$0xff]   ;;  %v9007_v57 = vld [vmem:[#allocation30_spill] sm:$0xff] }
 0xbb7   :  { %6608 = vrcp.f32 %v4585_v63  ;;  %v4586_v28 = vadd.f32 1.0, %v6599_v9  ;;  %v6601_v62 = vpop.eup %6600  ;;  %v8527_v63 = vld [vmem:[#allocation6 + $0xe8] ss:$16 sps:$4 sm:$0xff]  }
 0xbb8   :  { %6610 = vpow2.f32 %v5932_v34  ;;  %v6603_v32 = vpop.eup %6602  ;;  %v8524_v34 = vld [vmem:[#allocation6 + $0xe0] ss:$16 sps:$4 sm:$0xff]   ;;  %v9008_v9 = vld [vmem:[#allocation25_spill] sm:$0xff] }
 0xbb9   :  { %6612 = vrcp.f32 %v4574_v25  ;;  %v6605_v59 = vpop.eup %6604  ;;  %v4599_v7 = vadd.f32 1.0, %v6603_v32  ;;  %v4620_v25 = vunpack.c.l.bf16 %v9007_v57 }
 0xbba   :  { %6614 = vrcp.f32 %v4586_v28  ;;  %v4622_v28 = vunpack.c.l.bf16 %v9008_v9 }
 0xbbb   :  { %6616 = vrcp.f32 %v4599_v7 }
 0xbc0   :  { %v6607_v48 = vpop.eup %6606 }
 0xbc1   :  { %v6609_v29 = vpop.eup %6608  ;;  %v4607_v11 = vmul.f32 %v6607_v48, %v6601_v62 }
 0xbc2   :  { %v6611_v23 = vpop.eup %6610  ;;  %v4605_v41 = vmul.f32 %v6609_v29, %v8369_v37  ;;  %v9010_v29 = vld [vmem:[#allocation20_spill] sm:$0xff] }
 0xbc3   :  { %v6613_v18 = vpop.eup %6612  ;;  %v4600_v52 = vadd.f32 1.0, %v6611_v23 }
 0xbc4   :  { %v8433_v22 = vadd.f32 %v4607_v11, %v4605_v41  ;;  %v4608_v24 = vmul.f32 %v6613_v18, %v6605_v59  ;;  %v6615_v45 = vpop.eup %6614  ;;  %v9009_v59 = vld [vmem:[#allocation31_spill] sm:$0xff]  ;;  %v4623_v11 = vunpack.c.l.bf16 %v9010_v29 }
 0xbc5   :  { %v4606_v21 = vmul.f32 %v6615_v45, %v8372_v31  ;;  %v6617_v39 = vpop.eup %6616  ;;  %v8441_v31 = vld [vmem:[#allocation6 + $0x8] ss:$16 sps:$4 sm:$0xff]   ;;  %v4621_v48 = vunpack.c.l.bf16 %v9009_v59  ;;  %v4626_v45 = vunpack.c.h.bf16 %v9008_v9 }
 0xbc6   :  { %6618 = vtanh.f32 %v8433_v22 }
 0xbc7   :  { %v8436_v26 = vadd.f32 %v4608_v24, %v4606_v21  ;;  %6620 = vrcp.f32 %v4600_v52  ;;  %v4624_v24 = vunpack.c.h.bf16 %v9007_v57 }
 0xbc9   :  { %6622 = vtanh.f32 %v8436_v26 }
 0xbd0   :  { %v6619_v51 = vpop.eup %6618 }
 0xbd1   :  { %v6621_v37 = vpop.eup %6620  ;;  %v4613_v27 = vmul.f32 %v6619_v51, %v6617_v39 }
 0xbd3   :  { %v6623_v15 = vpop.eup %6622 }
 0xbd4   :  { %v4614_v6 = vmul.f32 %v6623_v15, %v6621_v37  ;;  %v4625_v37 = vunpack.c.h.bf16 %v9009_v59  ;;  %v4627_v15 = vunpack.c.h.bf16 %v9010_v29 }
 0xbd6   :  { %v4615_v17 = vpack.c.bf16 %v4614_v6, %v4613_v27 }
 0xbd8   :  { %4661 = vmatmul.mubr.bf16.vlgmr.msra.gmra.mrb[100].mxu0 %v4615_v17  ;;  %4704 = vmatmul.mubr.bf16.vlgmr.msra.gmra.mrb[116].mxu1 %v4615_v17 }
 0xbd9   :  { %4784 = vmatpush1.bf16.msra.mxu0 %v8376_v36  ;;  %4827 = vmatpush1.bf16.msra.mxu1 %v8441_v31 }
 0xbda   :  { %4785 = vmatprep.subr.bf16.mxu0 %v8444_v8  ;;  %4828 = vmatprep.subr.bf16.mxu1 %v8447_v0 }
 0xbdb   :  { %4815 = vmatprep.mubr.bf16.mxu0 %v8906_v61  ;;  %4858 = vmatprep.mubr.bf16.mxu1 %v8906_v61 }
 0xbdd   :  { %4786 = vmatpush1.bf16.msra.mxu0 %v8452_v40  ;;  %4829 = vmatpush1.bf16.msra.mxu1 %v8455_v3 }
 0xbde   :  { %4787 = vmatprep.subr.bf16.mxu0 %v8458_v10  ;;  %4830 = vmatprep.subr.bf16.mxu1 %v8461_v33 }
 0xbe1   :  { %4788 = vmatpush1.bf16.msra.mxu0 %v8464_v53  ;;  %4831 = vmatpush1.bf16.msra.mxu1 %v8467_v42 }
 0xbe2   :  { %4789 = vmatprep.subr.bf16.mxu0 %v8470_v14  ;;  %4832 = vmatprep.subr.bf16.mxu1 %v8473_v13 }
 0xbe5   :  { %4790 = vmatpush1.bf16.msra.mxu0 %v8476_v20  ;;  %4833 = vmatpush1.bf16.msra.mxu1 %v8479_v16 }
 0xbe6   :  { %4791 = vmatprep.subr.bf16.mxu0 %v8482_v50  ;;  %4834 = vmatprep.subr.bf16.mxu1 %v8485_v56 }
 0xbe9   :  { %4792 = vmatpush1.bf16.msra.mxu0 %v8488_v49  ;;  %4835 = vmatpush1.bf16.msra.mxu1 %v8491_v2 }
 0xbea   :  { %4793 = vmatprep.subr.bf16.mxu0 %v8494_v30  ;;  %4836 = vmatprep.subr.bf16.mxu1 %v8497_v55 }
 0xbed   :  { %4794 = vmatpush1.bf16.msra.mxu0 %v8500_v60  ;;  %4837 = vmatpush1.bf16.msra.mxu1 %v8503_v19 }
 0xbee   :  { %4795 = vmatprep.subr.bf16.mxu0 %v8506_v35  ;;  %4838 = vmatprep.subr.bf16.mxu1 %v8509_v54 }
 0xbf1   :  { %4796 = vmatpush1.bf16.msra.mxu0 %v8512_v46  ;;  %4839 = vmatpush1.bf16.msra.mxu1 %v8515_v5 }
 0xbf2   :  { %4797 = vmatprep.subr.bf16.mxu0 %v8518_v12  ;;  %4840 = vmatprep.subr.bf16.mxu1 %v8521_v1 }
 0xbf5   :  { %4798 = vmatpush1.bf16.msra.mxu0 %v8524_v34  ;;  %4841 = vmatpush1.bf16.msra.mxu1 %v8527_v63 }
 0xbf6   :  { %4938 = vmatprep.subr.bf16.mxu0 %v8410_v47  ;;  %4981 = vmatprep.subr.bf16.mxu1 %v8413_v38 }
 0xcab   :  { %v4662_v62 = vpop.f32.mrb[100].mxu0  ;;  %v4705_v32 = vpop.f32.mrb[116].mxu1 }
 0xcac   :  { %v4663_v23 = vadd.f32 %v4662_v62, %v4620_v25  ;;  %v4706_v41 = vadd.f32 %v4705_v32, %v4622_v28  ;;  %v4664_v18 = vpop.f32.mrb[101].mxu0  ;;  %v4707_v7 = vpop.f32.mrb[117].mxu1 }
 0xcad   :  { %v4665_v52 = vadd.f32 %v4664_v18, %v4621_v48  ;;  %v4708_v21 = vadd.f32 %v4707_v7, %v4623_v11  ;;  %v4666_v39 = vpop.f32.mrb[102].mxu0  ;;  %v4709_v51 = vpop.f32.mrb[118].mxu1 }
 0xcae   :  { %v4714_v27 = vadd.f32 %v4663_v23, %v8285_v58  ;;  %v4667_v6 = vadd.f32 %v4666_v39, %v4624_v24  ;;  %v4710_v17 = vadd.f32 %v4709_v51, %v4626_v45  ;;  %v4668_v25 = vpop.f32.mrb[103].mxu0  ;;  %v4711_v28 = vpop.f32.mrb[119].mxu1  ;;  %v4716_v18 = vadd.f32 %v4706_v41, %v8306_v44 }
 0xcaf   :  { %v4715_v62 = vadd.f32 %v4665_v52, %v8290_v43  ;;  %v4669_v32 = vadd.f32 %v4668_v25, %v4625_v37  ;;  %v4712_v57 = vadd.f32 %v4711_v28, %v4627_v15  ;;  %v4717_v23 = vadd.f32 %v4708_v21, %v8302_v4 }
 0xcb0   :  { %v5933_v38 = vmul.f32 -1.442695, %v4714_v27  ;;  %v4718_v9 = vadd.f32 %v4667_v6, %v8285_v58  ;;  %v4720_v45 = vadd.f32 %v4710_v17, %v8306_v44 }
 0xcb1   :  { %v5935_v48 = vmul.f32 -1.442695, %v4715_v62  ;;  %v4719_v11 = vadd.f32 %v4669_v32, %v8290_v43  ;;  %v5937_v7 = vmul.f32 -1.442695, %v4717_v23  ;;  %v4721_v24 = vadd.f32 %v4712_v57, %v8302_v4 }
 0xcb2   :  { %6624 = vpow2.f32 %v5933_v38  ;;  %v5934_v59 = vmul.f32 -1.442695, %v4718_v9 }
 0xcb3   :  { %6626 = vpow2.f32 %v5935_v48  ;;  %v5936_v29 = vmul.f32 -1.442695, %v4719_v11  ;;  %v5938_v38 = vmul.f32 -1.442695, %v4721_v24 }
 0xcb4   :  { %6628 = vpow2.f32 %v5934_v59 }
 0xcb5   :  { %6630 = vpow2.f32 %v5936_v29 }
 0xcb6   :  { %6632 = vtanh.f32 %v4716_v18 }
 0xcb7   :  { %6634 = vpow2.f32 %v5937_v7 }
 0xcb8   :  { %6636 = vtanh.f32 %v4720_v45 }
 0xcbc   :  { %v6625_v52 = vpop.eup %6624 }
 0xcbd   :  { %v6627_v39 = vpop.eup %6626  ;;  %v4728_v51 = vadd.f32 1.0, %v6625_v52 }
 0xcbe   :  { %v4740_v37 = vadd.f32 1.0, %v6627_v39  ;;  %v6629_v15 = vpop.eup %6628 }
 0xcbf   :  { %6638 = vrcp.f32 %v4728_v51  ;;  %v4729_v21 = vadd.f32 1.0, %v6629_v15  ;;  %v6631_v27 = vpop.eup %6630  ;;  %v9012_v15 = vld [vmem:[#allocation38_spill] sm:$0xff] }
 0xcc0   :  { %6640 = vrcp.f32 %v4740_v37  ;;  %v4741_v41 = vadd.f32 1.0, %v6631_v27  ;;  %v6633_v6 = vpop.eup %6632  ;;  %v9013_v27 = vld [vmem:[#allocation10_spill] sm:$0xff] }
 0xcc1   :  { %6642 = vpow2.f32 %v5938_v38  ;;  %v6635_v25 = vpop.eup %6634 }
 0xcc2   :  { %6644 = vrcp.f32 %v4729_v21  ;;  %v6637_v17 = vpop.eup %6636  ;;  %v4754_v11 = vadd.f32 1.0, %v6635_v25  ;;  %v4775_v21 = vunpack.c.l.bf16 %v9012_v15 }
 0xcc3   :  { %6646 = vrcp.f32 %v4741_v41  ;;  %v4777_v41 = vunpack.c.l.bf16 %v9013_v27 }
 0xcc4   :  { %6648 = vrcp.f32 %v4754_v11 }
 0xcc9   :  { %v6639_v28 = vpop.eup %6638 }
 0xcca   :  { %v6641_v62 = vpop.eup %6640  ;;  %v4762_v32 = vmul.f32 %v6639_v28, %v6633_v6 }
 0xccb   :  { %v6643_v57 = vpop.eup %6642  ;;  %v4760_v9 = vmul.f32 %v6641_v62, %v8433_v22  ;;  %v9015_v62 = vld [vmem:[#allocation11_spill] sm:$0xff] }
 0xccc   :  { %v6645_v48 = vpop.eup %6644  ;;  %v4755_v18 = vadd.f32 1.0, %v6643_v57 }
 0xccd   :  { %v8549_v59 = vadd.f32 %v4762_v32, %v4760_v9  ;;  %v4763_v29 = vmul.f32 %v6645_v48, %v6637_v17  ;;  %v6647_v23 = vpop.eup %6646  ;;  %v9014_v17 = vld [vmem:[#allocation32_spill] sm:$0xff]  ;;  %v4778_v32 = vunpack.c.l.bf16 %v9015_v62 }
 0xcce   :  { %v4761_v7 = vmul.f32 %v6647_v23, %v8436_v26  ;;  %v6649_v45 = vpop.eup %6648  ;;  %v9011_v26 = vld [vmem:[#allocation39_spill] sm:$0xff]  ;;  %v4776_v28 = vunpack.c.l.bf16 %v9014_v17  ;;  %v4781_v23 = vunpack.c.h.bf16 %v9013_v27 }
 0xccf   :  { %6650 = vtanh.f32 %v8549_v59 }
 0xcd0   :  { %v8552_v24 = vadd.f32 %v4763_v29, %v4761_v7  ;;  %6652 = vrcp.f32 %v4755_v18  ;;  %v4779_v29 = vunpack.c.h.bf16 %v9012_v15 }
 0xcd2   :  { %6654 = vtanh.f32 %v8552_v24 }
 0xcd9   :  { %v6651_v52 = vpop.eup %6650 }
 0xcda   :  { %v6653_v22 = vpop.eup %6652  ;;  %v4768_v51 = vmul.f32 %v6651_v52, %v6649_v45 }
 0xcdc   :  { %v6655_v39 = vpop.eup %6654 }
 0xcdd   :  { %v4769_v38 = vmul.f32 %v6655_v39, %v6653_v22  ;;  %v4780_v22 = vunpack.c.h.bf16 %v9014_v17  ;;  %v4782_v39 = vunpack.c.h.bf16 %v9015_v62 }
 0xcdf   :  { %v4770_v37 = vpack.c.bf16 %v4769_v38, %v4768_v51 }
 0xce1   :  { %4816 = vmatmul.mubr.bf16.vlgmr.msra.gmra.mrb[104].mxu0 %v4770_v37  ;;  %4859 = vmatmul.mubr.bf16.vlgmr.msra.gmra.mrb[120].mxu1 %v4770_v37 }
 0xce2   :  { %4939 = vmatpush1.bf16.msra.mxu0 %v8376_v36  ;;  %4982 = vmatpush1.bf16.msra.mxu1 %v8441_v31 }
 0xce3   :  { %4940 = vmatprep.subr.bf16.mxu0 %v8444_v8  ;;  %4983 = vmatprep.subr.bf16.mxu1 %v8447_v0 }
 0xce4   :  { %4970 = vmatprep.mubr.bf16.mxu0 %v8906_v61  ;;  %5013 = vmatprep.mubr.bf16.mxu1 %v8906_v61 }
 0xce6   :  { %4941 = vmatpush1.bf16.msra.mxu0 %v8452_v40  ;;  %4984 = vmatpush1.bf16.msra.mxu1 %v8455_v3 }
 0xce7   :  { %4942 = vmatprep.subr.bf16.mxu0 %v8458_v10  ;;  %4985 = vmatprep.subr.bf16.mxu1 %v8461_v33 }
 0xcea   :  { %4943 = vmatpush1.bf16.msra.mxu0 %v8464_v53  ;;  %4986 = vmatpush1.bf16.msra.mxu1 %v8467_v42 }
 0xceb   :  { %4944 = vmatprep.subr.bf16.mxu0 %v8470_v14  ;;  %4987 = vmatprep.subr.bf16.mxu1 %v8473_v13 }
 0xcee   :  { %4945 = vmatpush1.bf16.msra.mxu0 %v8476_v20  ;;  %4988 = vmatpush1.bf16.msra.mxu1 %v8479_v16 }
 0xcef   :  { %4946 = vmatprep.subr.bf16.mxu0 %v8482_v50  ;;  %4989 = vmatprep.subr.bf16.mxu1 %v8485_v56 }
 0xcf2   :  { %4947 = vmatpush1.bf16.msra.mxu0 %v8488_v49  ;;  %4990 = vmatpush1.bf16.msra.mxu1 %v8491_v2 }
 0xcf3   :  { %4948 = vmatprep.subr.bf16.mxu0 %v8494_v30  ;;  %4991 = vmatprep.subr.bf16.mxu1 %v8497_v55 }
 0xcf6   :  { %4949 = vmatpush1.bf16.msra.mxu0 %v8500_v60  ;;  %4992 = vmatpush1.bf16.msra.mxu1 %v8503_v19 }
 0xcf7   :  { %4950 = vmatprep.subr.bf16.mxu0 %v8506_v35  ;;  %4993 = vmatprep.subr.bf16.mxu1 %v8509_v54 }
 0xcfa   :  { %4951 = vmatpush1.bf16.msra.mxu0 %v8512_v46  ;;  %4994 = vmatpush1.bf16.msra.mxu1 %v8515_v5 }
 0xcfb   :  { %4952 = vmatprep.subr.bf16.mxu0 %v8518_v12  ;;  %4995 = vmatprep.subr.bf16.mxu1 %v8521_v1 }
 0xcfe   :  { %4953 = vmatpush1.bf16.msra.mxu0 %v8524_v34  ;;  %4996 = vmatpush1.bf16.msra.mxu1 %v8527_v63 }
 0xcff   :  { %5093 = vmatprep.subr.bf16.mxu0 %v8410_v47  ;;  %5136 = vmatprep.subr.bf16.mxu1 %v9011_v26 }
 0xdb4   :  { %v4817_v6 = vpop.f32.mrb[104].mxu0  ;;  %v4860_v25 = vpop.f32.mrb[120].mxu1 }
 0xdb5   :  { %v4818_v57 = vadd.f32 %v4817_v6, %v4775_v21  ;;  %v4861_v9 = vadd.f32 %v4860_v25, %v4777_v41  ;;  %v4819_v48 = vpop.f32.mrb[105].mxu0  ;;  %v4862_v11 = vpop.f32.mrb[121].mxu1 }
 0xdb6   :  { %v4820_v18 = vadd.f32 %v4819_v48, %v4776_v28  ;;  %v4863_v7 = vadd.f32 %v4862_v11, %v4778_v32  ;;  %v4821_v45 = vpop.f32.mrb[106].mxu0  ;;  %v4864_v52 = vpop.f32.mrb[122].mxu1 }
 0xdb7   :  { %v4869_v51 = vadd.f32 %v4818_v57, %v8285_v58  ;;  %v4822_v38 = vadd.f32 %v4821_v45, %v4779_v29  ;;  %v4865_v37 = vadd.f32 %v4864_v52, %v4781_v23  ;;  %v4823_v21 = vpop.f32.mrb[107].mxu0  ;;  %v4866_v41 = vpop.f32.mrb[123].mxu1  ;;  %v4871_v48 = vadd.f32 %v4861_v9, %v8306_v44 }
 0xdb8   :  { %v4870_v6 = vadd.f32 %v4820_v18, %v8290_v43  ;;  %v4824_v25 = vadd.f32 %v4823_v21, %v4780_v22  ;;  %v4867_v15 = vadd.f32 %v4866_v41, %v4782_v39  ;;  %v4872_v57 = vadd.f32 %v4863_v7, %v8302_v4 }
 0xdb9   :  { %v5939_v26 = vmul.f32 -1.442695, %v4869_v51  ;;  %v4873_v27 = vadd.f32 %v4822_v38, %v8285_v58  ;;  %v4875_v23 = vadd.f32 %v4865_v37, %v8306_v44 }
 0xdba   :  { %v5941_v28 = vmul.f32 -1.442695, %v4870_v6  ;;  %v4874_v32 = vadd.f32 %v4824_v25, %v8290_v43  ;;  %v5943_v11 = vmul.f32 -1.442695, %v4872_v57  ;;  %v4876_v29 = vadd.f32 %v4867_v15, %v8302_v4 }
 0xdbb   :  { %6656 = vpow2.f32 %v5939_v26  ;;  %v5940_v17 = vmul.f32 -1.442695, %v4873_v27 }
 0xdbc   :  { %6658 = vpow2.f32 %v5941_v28  ;;  %v5942_v62 = vmul.f32 -1.442695, %v4874_v32  ;;  %v5944_v26 = vmul.f32 -1.442695, %v4876_v29 }
 0xdbd   :  { %6660 = vpow2.f32 %v5940_v17 }
 0xdbe   :  { %6662 = vpow2.f32 %v5942_v62 }
 0xdbf   :  { %6664 = vtanh.f32 %v4871_v48 }
 0xdc0   :  { %6666 = vpow2.f32 %v5943_v11 }
 0xdc1   :  { %6668 = vtanh.f32 %v4875_v23 }
 0xdc5   :  { %v6657_v18 = vpop.eup %6656 }
 0xdc6   :  { %v6659_v45 = vpop.eup %6658  ;;  %v4883_v52 = vadd.f32 1.0, %v6657_v18 }
 0xdc7   :  { %v4895_v22 = vadd.f32 1.0, %v6659_v45  ;;  %v6661_v39 = vpop.eup %6660 }
 0xdc8   :  { %6670 = vrcp.f32 %v4883_v52  ;;  %v4884_v7 = vadd.f32 1.0, %v6661_v39  ;;  %v6663_v51 = vpop.eup %6662  ;;  %v9017_v39 = vld [vmem:[#allocation33_spill] sm:$0xff] }
 0xdc9   :  { %6672 = vrcp.f32 %v4895_v22  ;;  %v4896_v9 = vadd.f32 1.0, %v6663_v51  ;;  %v6665_v38 = vpop.eup %6664  ;;  %v9018_v51 = vld [vmem:[#allocation36_spill] sm:$0xff] }
 0xdca   :  { %6674 = vpow2.f32 %v5944_v26  ;;  %v6667_v21 = vpop.eup %6666 }
 0xdcb   :  { %6676 = vrcp.f32 %v4884_v7  ;;  %v6669_v37 = vpop.eup %6668  ;;  %v4909_v32 = vadd.f32 1.0, %v6667_v21  ;;  %v4930_v7 = vunpack.c.l.bf16 %v9017_v39 }
 0xdcc   :  { %6678 = vrcp.f32 %v4896_v9  ;;  %v4932_v9 = vunpack.c.l.bf16 %v9018_v51 }
 0xdcd   :  { %6680 = vrcp.f32 %v4909_v32 }
 0xdd2   :  { %v6671_v41 = vpop.eup %6670 }
 0xdd3   :  { %v6673_v6 = vpop.eup %6672  ;;  %v4917_v25 = vmul.f32 %v6671_v41, %v6665_v38 }
 0xdd4   :  { %v6675_v15 = vpop.eup %6674  ;;  %v4915_v27 = vmul.f32 %v6673_v6, %v8549_v59  ;;  %v9020_v6 = vld [vmem:[#allocation14_spill] sm:$0xff] }
 0xdd5   :  { %v6677_v28 = vpop.eup %6676  ;;  %v4910_v48 = vadd.f32 1.0, %v6675_v15 }
 0xdd6   :  { %v8607_v17 = vadd.f32 %v4917_v25, %v4915_v27  ;;  %v4918_v62 = vmul.f32 %v6677_v28, %v6669_v37  ;;  %v6679_v57 = vpop.eup %6678  ;;  %v9019_v37 = vld [vmem:[#allocation37_spill] sm:$0xff]  ;;  %v4933_v25 = vunpack.c.l.bf16 %v9020_v6 }
 0xdd7   :  { %v4916_v11 = vmul.f32 %v6679_v57, %v8552_v24  ;;  %v6681_v23 = vpop.eup %6680  ;;  %v9016_v24 = vld [vmem:[#allocation39_spill] sm:$0xff]  ;;  %v4931_v41 = vunpack.c.l.bf16 %v9019_v37 }
 0xdd8   :  { %6682 = vtanh.f32 %v8607_v17 }
 0xdd9   :  { %v8610_v29 = vadd.f32 %v4918_v62, %v4916_v11  ;;  %6684 = vrcp.f32 %v4910_v48  ;;  %v4934_v62 = vunpack.c.h.bf16 %v9017_v39 }
 0xddb   :  { %6686 = vtanh.f32 %v8610_v29 }
 0xde2   :  { %v6683_v18 = vpop.eup %6682 }
 0xde3   :  { %v6685_v59 = vpop.eup %6684  ;;  %v4923_v52 = vmul.f32 %v6683_v18, %v6681_v23  ;;  %v4935_v18 = vunpack.c.h.bf16 %v9019_v37 }
 0xde5   :  { %v6687_v45 = vpop.eup %6686 }
 0xde6   :  { %v4924_v26 = vmul.f32 %v6687_v45, %v6685_v59  ;;  %v4937_v59 = vunpack.c.h.bf16 %v9020_v6 }
 0xde8   :  { %v4925_v22 = vpack.c.bf16 %v4924_v26, %v4923_v52 }
 0xdea   :  { %4971 = vmatmul.mubr.bf16.vlgmr.msra.gmra.mrb[108].mxu0 %v4925_v22  ;;  %5014 = vmatmul.mubr.bf16.vlgmr.msra.gmra.mrb[124].mxu1 %v4925_v22 }
 0xdeb   :  { %5094 = vmatpush1.bf16.msra.mxu0 %v8376_v36  ;;  %5137 = vmatpush1.bf16.msra.mxu1 %v8441_v31 }
 0xdec   :  { %5095 = vmatprep.subr.bf16.mxu0 %v8444_v8  ;;  %5138 = vmatprep.subr.bf16.mxu1 %v8447_v0 }
 0xded   :  { %5125 = vmatprep.mubr.bf16.mxu0 %v8906_v61  ;;  %5168 = vmatprep.mubr.bf16.mxu1 %v8906_v61 }
 0xdef   :  { %5096 = vmatpush1.bf16.msra.mxu0 %v8452_v40  ;;  %5139 = vmatpush1.bf16.msra.mxu1 %v8455_v3 }
 0xdf0   :  { %5097 = vmatprep.subr.bf16.mxu0 %v8458_v10  ;;  %5140 = vmatprep.subr.bf16.mxu1 %v8461_v33 }
 0xdf3   :  { %5098 = vmatpush1.bf16.msra.mxu0 %v8464_v53  ;;  %5141 = vmatpush1.bf16.msra.mxu1 %v8467_v42 }
 0xdf4   :  { %5099 = vmatprep.subr.bf16.mxu0 %v8470_v14  ;;  %5142 = vmatprep.subr.bf16.mxu1 %v8473_v13 }
 0xdf7   :  { %5100 = vmatpush1.bf16.msra.mxu0 %v8476_v20  ;;  %5143 = vmatpush1.bf16.msra.mxu1 %v8479_v16 }
 0xdf8   :  { %5101 = vmatprep.subr.bf16.mxu0 %v8482_v50  ;;  %5144 = vmatprep.subr.bf16.mxu1 %v8485_v56 }
 0xdfb   :  { %5102 = vmatpush1.bf16.msra.mxu0 %v8488_v49  ;;  %5145 = vmatpush1.bf16.msra.mxu1 %v8491_v2 }
 0xdfc   :  { %5103 = vmatprep.subr.bf16.mxu0 %v8494_v30  ;;  %5146 = vmatprep.subr.bf16.mxu1 %v8497_v55 }
 0xdff   :  { %5104 = vmatpush1.bf16.msra.mxu0 %v8500_v60  ;;  %5147 = vmatpush1.bf16.msra.mxu1 %v8503_v19 }
 0xe00   :  { %5105 = vmatprep.subr.bf16.mxu0 %v8506_v35  ;;  %5148 = vmatprep.subr.bf16.mxu1 %v8509_v54 }
 0xe03   :  { %5106 = vmatpush1.bf16.msra.mxu0 %v8512_v46  ;;  %5149 = vmatpush1.bf16.msra.mxu1 %v8515_v5 }
 0xe04   :  { %5107 = vmatprep.subr.bf16.mxu0 %v8518_v12  ;;  %5150 = vmatprep.subr.bf16.mxu1 %v8521_v1 }
 0xe07   :  { %5108 = vmatpush1.bf16.msra.mxu0 %v8524_v34  ;;  %5151 = vmatpush1.bf16.msra.mxu1 %v8527_v63 }
 0xe08   :  { %5248 = vmatprep.subr.bf16.mxu0 %v8410_v47  ;;  %5291 = vmatprep.subr.bf16.mxu1 %v9016_v24  ;;  %v4936_v47 = vunpack.c.h.bf16 %v9018_v51 }
 0xebd   :  { %v4972_v38 = vpop.f32.mrb[108].mxu0  ;;  %v5015_v21 = vpop.f32.mrb[124].mxu1 }
 0xebe   :  { %v4973_v15 = vadd.f32 %v4972_v38, %v4930_v7  ;;  %v5016_v27 = vadd.f32 %v5015_v21, %v4932_v9  ;;  %v4974_v28 = vpop.f32.mrb[109].mxu0  ;;  %v5017_v32 = vpop.f32.mrb[125].mxu1 }
 0xebf   :  { %v4975_v57 = vadd.f32 %v4974_v28, %v4931_v41  ;;  %v5018_v48 = vadd.f32 %v5017_v32, %v4933_v25  ;;  %v4976_v11 = vpop.f32.mrb[110].mxu0  ;;  %v5019_v23 = vpop.f32.mrb[126].mxu1 }
 0xec0   :  { %v5024_v45 = vadd.f32 %v4973_v15, %v8285_v58  ;;  %v4977_v52 = vadd.f32 %v4976_v11, %v4934_v62  ;;  %v5020_v26 = vadd.f32 %v5019_v23, %v4936_v47  ;;  %v4978_v22 = vpop.f32.mrb[111].mxu0  ;;  %v5021_v24 = vpop.f32.mrb[127].mxu1  ;;  %v5026_v15 = vadd.f32 %v5016_v27, %v8306_v44 }
 0xec1   :  { %v5025_v7 = vadd.f32 %v4975_v57, %v8290_v43  ;;  %v4979_v9 = vadd.f32 %v4978_v22, %v4935_v18  ;;  %v5022_v39 = vadd.f32 %v5021_v24, %v4937_v59  ;;  %v5027_v25 = vadd.f32 %v5018_v48, %v8302_v4 }
 0xec2   :  { %v5945_v38 = vmul.f32 -1.442695, %v5024_v45  ;;  %v5028_v51 = vadd.f32 %v4977_v52, %v8285_v58  ;;  %v5030_v62 = vadd.f32 %v5020_v26, %v8306_v44 }
 0xec3   :  { %v5947_v21 = vmul.f32 -1.442695, %v5025_v7  ;;  %v5029_v41 = vadd.f32 %v4979_v9, %v8290_v43  ;;  %v5949_v28 = vmul.f32 -1.442695, %v5027_v25  ;;  %v5031_v32 = vadd.f32 %v5022_v39, %v8302_v4 }
 0xec4   :  { %6688 = vpow2.f32 %v5945_v38  ;;  %v5946_v37 = vmul.f32 -1.442695, %v5028_v51 }
 0xec5   :  { %6690 = vpow2.f32 %v5947_v21  ;;  %v5948_v6 = vmul.f32 -1.442695, %v5029_v41  ;;  %v5950_v23 = vmul.f32 -1.442695, %v5031_v32 }
 0xec6   :  { %6692 = vpow2.f32 %v5946_v37 }
 0xec7   :  { %6694 = vpow2.f32 %v5948_v6 }
 0xec8   :  { %6696 = vtanh.f32 %v5026_v15 }
 0xec9   :  { %6698 = vpow2.f32 %v5949_v28 }
 0xeca   :  { %6700 = vtanh.f32 %v5030_v62 }
 0xece   :  { %v6689_v47 = vpop.eup %6688 }
 0xecf   :  { %v6691_v57 = vpop.eup %6690  ;;  %v5038_v11 = vadd.f32 1.0, %v6689_v47 }
 0xed0   :  { %v5050_v18 = vadd.f32 1.0, %v6691_v57  ;;  %v6693_v59 = vpop.eup %6692 }
 0xed1   :  { %6702 = vrcp.f32 %v5038_v11  ;;  %v5039_v48 = vadd.f32 1.0, %v6693_v59  ;;  %v6695_v45 = vpop.eup %6694 }
 0xed2   :  { %6704 = vrcp.f32 %v5050_v18  ;;  %v5051_v27 = vadd.f32 1.0, %v6695_v45  ;;  %v6697_v52 = vpop.eup %6696 }
 0xed3   :  { %6706 = vpow2.f32 %v5950_v23  ;;  %v6699_v22 = vpop.eup %6698 }
 0xed4   :  { %6708 = vrcp.f32 %v5039_v48  ;;  %v6701_v26 = vpop.eup %6700  ;;  %v5064_v21 = vadd.f32 1.0, %v6699_v22 }
 0xed5   :  { %6710 = vrcp.f32 %v5051_v27 }
 0xed6   :  { %6712 = vrcp.f32 %v5064_v21 }
 0xedb   :  { %v6703_v24 = vpop.eup %6702 }
 0xedc   :  { %v6705_v7 = vpop.eup %6704  ;;  %v5072_v9 = vmul.f32 %v6703_v24, %v6697_v52 }
 0xedd   :  { %v6707_v39 = vpop.eup %6706  ;;  %v5070_v38 = vmul.f32 %v6705_v7, %v8607_v17 }
 0xede   :  { %v6709_v51 = vpop.eup %6708  ;;  %v5065_v25 = vadd.f32 1.0, %v6707_v39 }
 0xedf   :  { %v8665_v41 = vadd.f32 %v5072_v9, %v5070_v38  ;;  %v5073_v37 = vmul.f32 %v6709_v51, %v6701_v26  ;;  %v6711_v6 = vpop.eup %6710 }
 0xee0   :  { %v5071_v15 = vmul.f32 %v6711_v6, %v8610_v29  ;;  %v6713_v32 = vpop.eup %6712 }
 0xee1   :  { %6714 = vtanh.f32 %v8665_v41 }
 0xee2   :  { %v8668_v28 = vadd.f32 %v5073_v37, %v5071_v15  ;;  %6716 = vrcp.f32 %v5065_v25 }
 0xee4   :  { %6718 = vtanh.f32 %v8668_v28 }
 0xeeb   :  { %v6715_v62 = vpop.eup %6714 }
 0xeec   :  { %v6717_v17 = vpop.eup %6716  ;;  %v5078_v57 = vmul.f32 %v6715_v62, %v6713_v32 }
 0xeee   :  { %v6719_v47 = vpop.eup %6718 }
 0xeef   :  { %v5079_v11 = vmul.f32 %v6719_v47, %v6717_v17 }
 0xef1   :  { %v5080_v23 = vpack.c.bf16 %v5079_v11, %v5078_v57 }
 0xef3   :  { %5126 = vmatmul.mubr.bf16.vlgmr.msra.gmra.mrb[112].mxu0 %v5080_v23  ;;  %5169 = vmatmul.mubr.bf16.vlgmr.msra.gmra.mrb[128].mxu1 %v5080_v23 }
 0xef4   :  { %5249 = vmatpush1.bf16.msra.mxu0 %v8376_v36  ;;  %5292 = vmatpush1.bf16.msra.mxu1 %v8441_v31  ;;  %v9022_v31 = vld [vmem:[#allocation15_spill] sm:$0xff] }
 0xef5   :  { %5250 = vmatprep.subr.bf16.mxu0 %v8444_v8  ;;  %5293 = vmatprep.subr.bf16.mxu1 %v8447_v0  ;;  %v5087_v8 = vunpack.c.l.bf16 %v9022_v31 }
 0xef6   :  { %5280 = vmatprep.mubr.bf16.mxu0 %v8906_v61  ;;  %5323 = vmatprep.mubr.bf16.mxu1 %v8906_v61  ;;  %v9021_v61 = vld [vmem:[#allocation18_spill] sm:$0xff] }
 0xef7   :  { %v5085_v36 = vunpack.c.l.bf16 %v9021_v61 }
 0xef8   :  { %5251 = vmatpush1.bf16.msra.mxu0 %v8452_v40  ;;  %5294 = vmatpush1.bf16.msra.mxu1 %v8455_v3  ;;  %v9023_v3 = vld [vmem:[#allocation12_spill] sm:$0xff] }
 0xef9   :  { %5252 = vmatprep.subr.bf16.mxu0 %v8458_v10  ;;  %5295 = vmatprep.subr.bf16.mxu1 %v8461_v33  ;;  %v5086_v10 = vunpack.c.l.bf16 %v9023_v3  ;;  %v9024_v33 = vld [vmem:[#allocation34_spill] sm:$0xff] }
 0xefc   :  { %5253 = vmatpush1.bf16.msra.mxu0 %v8464_v53  ;;  %5296 = vmatpush1.bf16.msra.mxu1 %v8467_v42  ;;  %v5088_v53 = vunpack.c.l.bf16 %v9024_v33 }
 0xefd   :  { %5254 = vmatprep.subr.bf16.mxu0 %v8470_v14  ;;  %5297 = vmatprep.subr.bf16.mxu1 %v8473_v13 }
 0xf00   :  { %5255 = vmatpush1.bf16.msra.mxu0 %v8476_v20  ;;  %5298 = vmatpush1.bf16.msra.mxu1 %v8479_v16  ;;  %v5089_v16 = vunpack.c.h.bf16 %v9021_v61 }
 0xf01   :  { %5256 = vmatprep.subr.bf16.mxu0 %v8482_v50  ;;  %5299 = vmatprep.subr.bf16.mxu1 %v8485_v56  ;;  %v5091_v50 = vunpack.c.h.bf16 %v9022_v31 }
 0xf04   :  { %5257 = vmatpush1.bf16.msra.mxu0 %v8488_v49  ;;  %5300 = vmatpush1.bf16.msra.mxu1 %v8491_v2 }
 0xf05   :  { %5258 = vmatprep.subr.bf16.mxu0 %v8494_v30  ;;  %5301 = vmatprep.subr.bf16.mxu1 %v8497_v55  ;;  %v5090_v55 = vunpack.c.h.bf16 %v9023_v3 }
 0xf08   :  { %5259 = vmatpush1.bf16.msra.mxu0 %v8500_v60  ;;  %5302 = vmatpush1.bf16.msra.mxu1 %v8503_v19  ;;  %v5092_v60 = vunpack.c.h.bf16 %v9024_v33 }
 0xf09   :  { %5260 = vmatprep.subr.bf16.mxu0 %v8506_v35  ;;  %5303 = vmatprep.subr.bf16.mxu1 %v8509_v54 }
 0xf0c   :  { %5261 = vmatpush1.bf16.msra.mxu0 %v8512_v46  ;;  %5304 = vmatpush1.bf16.msra.mxu1 %v8515_v5 }
 0xf0d   :  { %5262 = vmatprep.subr.bf16.mxu0 %v8518_v12  ;;  %5305 = vmatprep.subr.bf16.mxu1 %v8521_v1 }
 0xf10   :  { %5263 = vmatpush1.bf16.msra.mxu0 %v8524_v34  ;;  %5306 = vmatpush1.bf16.msra.mxu1 %v8527_v63 }
 0xfc6   :  { %v5127_v0 = vpop.f32.mrb[112].mxu0  ;;  %v5170_v40 = vpop.f32.mrb[128].mxu1 }
 0xfc7   :  { %v5128_v42 = vadd.f32 %v5127_v0, %v5085_v36  ;;  %v5171_v14 = vadd.f32 %v5170_v40, %v5087_v8  ;;  %v5129_v13 = vpop.f32.mrb[113].mxu0  ;;  %v5172_v20 = vpop.f32.mrb[129].mxu1 }
 0xfc8   :  { %v5130_v56 = vadd.f32 %v5129_v13, %v5086_v10  ;;  %v5173_v49 = vadd.f32 %v5172_v20, %v5088_v53  ;;  %v5131_v2 = vpop.f32.mrb[114].mxu0  ;;  %v5174_v30 = vpop.f32.mrb[130].mxu1 }
 0xfc9   :  { %v5179_v19 = vadd.f32 %v5128_v42, %v8285_v58  ;;  %v5132_v35 = vadd.f32 %v5131_v2, %v5089_v16  ;;  %v5175_v54 = vadd.f32 %v5174_v30, %v5091_v50  ;;  %v5133_v46 = vpop.f32.mrb[115].mxu0  ;;  %v5176_v5 = vpop.f32.mrb[131].mxu1  ;;  %v5181_v52 = vadd.f32 %v5171_v14, %v8306_v44  ;;  %v6265_v50 = vld [vmem:[%s8786_s7 + $0x8] sm:$0xff]   ;;  %v6268_v2 = vld [vmem:[%s8786_s7 + $0x20] sm:$0xff]  }
 0xfca   :  { %v5180_v12 = vadd.f32 %v5130_v56, %v8290_v43  ;;  %v5134_v1 = vadd.f32 %v5133_v46, %v5090_v55  ;;  %v5177_v34 = vadd.f32 %v5176_v5, %v5092_v60  ;;  %v5182_v27 = vadd.f32 %v5173_v49, %v8302_v4  ;;  %v6266_v56 = vld [vmem:[%s8786_s7 + $0x10] sm:$0xff]   ;;  %v6267_v49 = vld [vmem:[%s8786_s7 + $0x18] sm:$0xff]   ;;  %v6269_v30 = vld [vmem:[%s8786_s7 + $0x28] sm:$0xff]  }
 0xfcb   :  { %v5951_v63 = vmul.f32 -1.442695, %v5179_v19  ;;  %v5183_v29 = vadd.f32 %v5132_v35, %v8285_v58  ;;  %v5185_v24 = vadd.f32 %v5175_v54, %v8306_v44  ;;  %v6869_v16 = vmov 0.0   ;;  %v6270_v55 = vld [vmem:[%s8786_s7 + $0x30] sm:$0xff]   ;;  %v6271_v60 = vld [vmem:[%s8786_s7 + $0x38] sm:$0xff]   ;;  %v9026_v54 = vld [vmem:[#allocation35_spill] sm:$0xff] }
 0xfcc   :  { %v5953_v18 = vmul.f32 -1.442695, %v5180_v12  ;;  %v5184_v59 = vadd.f32 %v5134_v1, %v8290_v43  ;;  %v5955_v22 = vmul.f32 -1.442695, %v5182_v27  ;;  %v5186_v26 = vadd.f32 %v5177_v34, %v8302_v4  ;;  %5981 = vmatprep.subr.bf16.mxu0 %v6869_v16  ;;  %v9025_v19 = vld [vmem:[#allocation13_spill] sm:$0xff]  ;;  %v9027_v1 = vld [vmem:[#allocation22_spill] sm:$0xff] }
 0xfcd   :  { %6720 = vpow2.f32 %v5951_v63  ;;  %v5952_v48 = vmul.f32 -1.442695, %v5183_v29  ;;  %v5240_v35 = vunpack.c.l.bf16 %v9025_v19  ;;  %v5242_v46 = vunpack.c.l.bf16 %v9026_v54  ;;  %v9028_v63 = vld [vmem:[#allocation17_spill] sm:$0xff] }
 0xfce   :  { %6722 = vpow2.f32 %v5953_v18  ;;  %v5954_v45 = vmul.f32 -1.442695, %v5184_v59  ;;  %v5956_v38 = vmul.f32 -1.442695, %v5186_v26  ;;  %v5241_v34 = vunpack.c.l.bf16 %v9027_v1 }
 0xfcf   :  { %6724 = vpow2.f32 %v5952_v48  ;;  %v5243_v29 = vunpack.c.l.bf16 %v9028_v63  ;;  %v5244_v27 = vunpack.c.h.bf16 %v9025_v19 }
 0xfd0   :  { %6726 = vpow2.f32 %v5954_v45 }
 0xfd1   :  { %6728 = vtanh.f32 %v5181_v52  ;;  %v5246_v52 = vunpack.c.h.bf16 %v9026_v54 }
 0xfd2   :  { %6730 = vpow2.f32 %v5955_v22 }
 0xfd3   :  { %6732 = vtanh.f32 %v5185_v24 }
 0xfd7   :  { %v6721_v7 = vpop.eup %6720 }
 0xfd8   :  { %v6723_v9 = vpop.eup %6722  ;;  %v5193_v39 = vadd.f32 1.0, %v6721_v7 }
 0xfd9   :  { %v5205_v51 = vadd.f32 1.0, %v6723_v9  ;;  %v6725_v21 = vpop.eup %6724  ;;  %v5245_v9 = vunpack.c.h.bf16 %v9027_v1 }
 0xfda   :  { %6734 = vrcp.f32 %v5193_v39  ;;  %v5194_v37 = vadd.f32 1.0, %v6725_v21  ;;  %v6727_v6 = vpop.eup %6726  ;;  %v5247_v39 = vunpack.c.h.bf16 %v9028_v63 }
 0xfdb   :  { %6736 = vrcp.f32 %v5205_v51  ;;  %v5206_v25 = vadd.f32 1.0, %v6727_v6  ;;  %v6729_v15 = vpop.eup %6728 }
 0xfdc   :  { %6738 = vpow2.f32 %v5956_v38  ;;  %v6731_v32 = vpop.eup %6730 }
 0xfdd   :  { %6740 = vrcp.f32 %v5194_v37  ;;  %v6733_v62 = vpop.eup %6732  ;;  %v5219_v36 = vadd.f32 1.0, %v6731_v32 }
 0xfde   :  { %6742 = vrcp.f32 %v5206_v25 }
 0xfdf   :  { %6744 = vrcp.f32 %v5219_v36 }
 0xfe4   :  { %v6735_v17 = vpop.eup %6734 }
 0xfe5   :  { %v6737_v47 = vpop.eup %6736  ;;  %v5227_v57 = vmul.f32 %v6735_v17, %v6729_v15 }
 0xfe6   :  { %v6739_v11 = vpop.eup %6738  ;;  %v5225_v23 = vmul.f32 %v6737_v47, %v8665_v41 }
 0xfe7   :  { %v6741_v61 = vpop.eup %6740  ;;  %v5220_v40 = vadd.f32 1.0, %v6739_v11 }
 0xfe8   :  { %v8721_v31 = vadd.f32 %v5227_v57, %v5225_v23  ;;  %v5228_v8 = vmul.f32 %v6741_v61, %v6733_v62  ;;  %v6743_v0 = vpop.eup %6742 }
 0xfe9   :  { %v5226_v3 = vmul.f32 %v6743_v0, %v8668_v28  ;;  %v6745_v33 = vpop.eup %6744  ;;  %v6264_v28 = vld [vmem:[%s8786_s7] sm:$0xff]  }
 0xfea   :  { %6746 = vtanh.f32 %v8721_v31 }
 0xfeb   :  { %v8724_v10 = vadd.f32 %v5228_v8, %v5226_v3  ;;  %6748 = vrcp.f32 %v5220_v40 }
 0xfed   :  { %6750 = vtanh.f32 %v8724_v10 }
 0xff4   :  { %v6747_v53 = vpop.eup %6746 }
 0xff5   :  { %v6749_v41 = vpop.eup %6748  ;;  %v5233_v14 = vmul.f32 %v6747_v53, %v6745_v33 }
 0xff7   :  { %v6751_v42 = vpop.eup %6750 }
 0xff8   :  { %v5234_v13 = vmul.f32 %v6751_v42, %v6749_v41 }
 0xffa   :  { %v5235_v20 = vpack.c.bf16 %v5234_v13, %v5233_v14 }
 0xffc   :  { %5281 = vmatmul.mubr.bf16.vlgmr.msra.gmra.mrb[116].mxu0 %v5235_v20  ;;  %5324 = vmatmul.mubr.bf16.vlgmr.msra.gmra.mrb[132].mxu1 %v5235_v20 }
 0xffd   :  { %5982 = vmatpush3.bf16.msra.mxu0 %v6264_v28  ;;  %5997 = vmatprep.mubr.msk.bf16.mxu0 %vm6870_vm1, %v6869_v16 }
 0xffe   :  { %5983 = vmatprep.subr.bf16.mxu0 %v6869_v16 }
0x1001   :  { %5984 = vmatpush3.bf16.msra.mxu0 %v6265_v50 }
0x1002   :  { %5985 = vmatprep.subr.bf16.mxu0 %v6869_v16 }
0x1005   :  { %5986 = vmatpush3.bf16.msra.mxu0 %v6266_v56 }
0x1006   :  { %5987 = vmatprep.subr.bf16.mxu0 %v6869_v16 }
0x1009   :  { %5988 = vmatpush3.bf16.msra.mxu0 %v6267_v49 }
0x100a   :  { %5989 = vmatprep.subr.bf16.mxu0 %v6869_v16 }
0x100d   :  { %5990 = vmatpush3.bf16.msra.mxu0 %v6268_v2 }
0x100e   :  { %5991 = vmatprep.subr.bf16.mxu0 %v6869_v16 }
0x1011   :  { %5992 = vmatpush3.bf16.msra.mxu0 %v6269_v30 }
0x1012   :  { %5993 = vmatprep.subr.bf16.mxu0 %v6869_v16 }
0x1015   :  { %5994 = vmatpush3.bf16.msra.mxu0 %v6270_v55 }
0x1016   :  { %5995 = vmatprep.subr.bf16.mxu0 %v6869_v16 }
0x1019   :  { %5996 = vmatpush3.bf16.msra.mxu0 %v6271_v60 }
0x10cf   :  { %v5282_v5 = vpop.f32.mrb[116].mxu0  ;;  %v5325_v12 = vpop.f32.mrb[132].mxu1 }
0x10d0   :  { %v5283_v18 = vadd.f32 %v5282_v5, %v5240_v35  ;;  %v5326_v59 = vadd.f32 %v5325_v12, %v5242_v46  ;;  %v5284_v48 = vpop.f32.mrb[117].mxu0  ;;  %v5327_v45 = vpop.f32.mrb[133].mxu1 }
0x10d1   :  { %v5285_v22 = vadd.f32 %v5284_v48, %v5241_v34  ;;  %v5328_v26 = vadd.f32 %v5327_v45, %v5243_v29  ;;  %v5286_v24 = vpop.f32.mrb[118].mxu0  ;;  %v5329_v7 = vpop.f32.mrb[134].mxu1 }
0x10d2   :  { %v5334_v38 = vadd.f32 %v5283_v18, %v8285_v58  ;;  %v5287_v51 = vadd.f32 %v5286_v24, %v5244_v27  ;;  %v5330_v21 = vadd.f32 %v5329_v7, %v5246_v52  ;;  %v5288_v37 = vpop.f32.mrb[119].mxu0  ;;  %v5331_v6 = vpop.f32.mrb[135].mxu1  ;;  %v5336_v36 = vadd.f32 %v5326_v59, %v8306_v44 }
0x10d3   :  { %v5335_v25 = vadd.f32 %v5285_v22, %v8290_v43  ;;  %v5289_v15 = vadd.f32 %v5288_v37, %v5245_v9  ;;  %v5332_v32 = vadd.f32 %v5331_v6, %v5247_v39  ;;  %v5337_v61 = vadd.f32 %v5328_v26, %v8302_v4 }
0x10d4   :  { %v5957_v62 = vmul.f32 -1.442695, %v5334_v38  ;;  %v5338_v17 = vadd.f32 %v5287_v51, %v8285_v58  ;;  %v5340_v40 = vadd.f32 %v5330_v21, %v8306_v44 }
0x10d5   :  { %v5959_v47 = vmul.f32 -1.442695, %v5335_v25  ;;  %v5339_v57 = vadd.f32 %v5289_v15, %v8290_v43  ;;  %v5961_v8 = vmul.f32 -1.442695, %v5337_v61  ;;  %v5341_v0 = vadd.f32 %v5332_v32, %v8302_v4 }
0x10d6   :  { %6752 = vpow2.f32 %v5957_v62  ;;  %v5958_v11 = vmul.f32 -1.442695, %v5338_v17 }
0x10d7   :  { %6754 = vpow2.f32 %v5959_v47  ;;  %v5960_v23 = vmul.f32 -1.442695, %v5339_v57  ;;  %v5962_v43 = vmul.f32 -1.442695, %v5341_v0 }
0x10d8   :  { %6756 = vpow2.f32 %v5958_v11 }
0x10d9   :  { %6758 = vpow2.f32 %v5960_v23 }
0x10da   :  { %6760 = vtanh.f32 %v5336_v36 }
0x10db   :  { %6762 = vpow2.f32 %v5961_v8 }
0x10dc   :  { %6764 = vtanh.f32 %v5340_v40 }
0x10e0   :  { %v6753_v3 = vpop.eup %6752 }
0x10e1   :  { %v6755_v58 = vpop.eup %6754  ;;  %v5348_v33 = vadd.f32 1.0, %v6753_v3 }
0x10e2   :  { %v5360_v53 = vadd.f32 1.0, %v6755_v58  ;;  %v6757_v41 = vpop.eup %6756 }
0x10e3   :  { %6766 = vrcp.f32 %v5348_v33  ;;  %v5349_v42 = vadd.f32 1.0, %v6757_v41  ;;  %v6759_v14 = vpop.eup %6758 }
0x10e4   :  { %6768 = vrcp.f32 %v5360_v53  ;;  %v5361_v13 = vadd.f32 1.0, %v6759_v14  ;;  %v6761_v4 = vpop.eup %6760 }
0x10e5   :  { %6770 = vpow2.f32 %v5962_v43  ;;  %v6763_v20 = vpop.eup %6762 }
0x10e6   :  { %6772 = vrcp.f32 %v5349_v42  ;;  %v6765_v44 = vpop.eup %6764  ;;  %v5374_v56 = vadd.f32 1.0, %v6763_v20 }
0x10e7   :  { %6774 = vrcp.f32 %v5361_v13 }
0x10e8   :  { %6776 = vrcp.f32 %v5374_v56 }
0x10ed   :  { %v6767_v28 = vpop.eup %6766 }
0x10ee   :  { %v6769_v16 = vpop.eup %6768  ;;  %v5382_v50 = vmul.f32 %v6767_v28, %v6761_v4 }
0x10ef   :  { %v6771_v49 = vpop.eup %6770  ;;  %v5380_v2 = vmul.f32 %v6769_v16, %v8721_v31  ;;  %v5963_v31 = vld [vmem:[%s8787_s8] ss:$0 sm:$0xff] }
0x10f0   :  { %v6773_v30 = vpop.eup %6772  ;;  %v5375_v35 = vadd.f32 1.0, %v6771_v49 }
0x10f1   :  { %v5384_v55 = vadd.f32 %v5382_v50, %v5380_v2  ;;  %v5383_v60 = vmul.f32 %v6773_v30, %v6765_v44  ;;  %v6775_v19 = vpop.eup %6774 }
0x10f2   :  { %v5381_v54 = vmul.f32 %v6775_v19, %v8724_v10  ;;  %v6777_v5 = vpop.eup %6776 }
0x10f3   :  { %6778 = vtanh.f32 %v5384_v55 }
0x10f4   :  { %v5385_v46 = vadd.f32 %v5383_v60, %v5381_v54  ;;  %6780 = vrcp.f32 %v5375_v35 }
0x10f6   :  { %6782 = vtanh.f32 %v5385_v46 }
0x10fd   :  { %v6779_v12 = vpop.eup %6778 }
0x10fe   :  { %v5388_v1 = vmul.f32 %v6779_v12, %v6777_v5  ;;  %v6781_v34 = vpop.eup %6780 }
0x1100   :  { %v6783_v63 = vpop.eup %6782 }
0x1101   :  { %v5389_v29 = vmul.f32 %v6783_v63, %v6781_v34 }
0x1103   :  { %v5390_v18 = vpack.c.bf16 %v5389_v29, %v5388_v1 }
0x1105   :  { %5998 = vmatmul.mubr.bf16.vlgmr.msra.gmra.mrb[120].mxu0 %v5390_v18 }
0x11d8   :  { %v5496_v59 = vpop.f32.mrb[120].mxu0 }
0x11d9   :  { %v5497_v48 = vadd.f32 %v5963_v31, %v5496_v59  ;;  %v5999_v45 = vpop.f32.mrb[121].mxu0 }
0x11da   :  { %v5499_v10 = vpop.f32.mrb[122].mxu0 }
0x11db   :  { %5504 = vst.msk [vmem:[%s8788_s9] sm:$0xff] %vm5503_vm2, %v5497_v48  ;;  %v5500_v27 = vadd.f32 %v5963_v31, %v5499_v10  ;;  %v6000_v52 = vpop.f32.mrb[123].mxu0 }
0x11dd   :  { %5505 = vst.msk [vmem:[%s8788_s9 + $0x8] sm:$0xff] %vm5503_vm2, %v5500_v27 }
0x11de   :  { %5510 = vsyncpa [#allocation5], 1 }
0x11df   :  { %5511 = vsyncpa [#allocation7], 1 }

</bundles_post_ra>
